<compile_context>
chip_gen: v7x
topology: tpu7x:2x2x1
jax: 0.10.0
libtpu: 0.0.40
codegen_flags: <defaults>
</compile_context>

<pallas_src>
import jax
import jax.numpy as jnp
import numpy as np
from jax.experimental import pallas as pl
from jax.experimental.pallas import tpu as pltpu

EMB = 100            # embedding_dim (logical)
HID = 32             # hidden_size
BATCH = 32           # hard-coded in the PyTorch module
NUM_CLASSES = 3
D1 = 128             # Dense1 output size
OUT_PAD = 128        # lane-dense padded logits width


# ----------------------------- fused kernel ----------------------------------
def _fused_kernel(ids_ref, table_ref, whh_ref, h0_ref, c0_ref, eye_ref,
                  ei_ref, ej_ref, w1_ref, b1_ref, w2_ref, b2_ref,
                  out_ref, xproj_sc):
    """Whole Ma_LSTM forward for one (sent1, sent2) batch.

    ids_ref   : (T, 1, 2B) int32   token ids, both sentences stacked on batch
    table_ref : (4H, V_pad) f32    pre-projected embedding (W_ih @ E^T + bias),
                                   gate rows ordered [i, f, o, g]
    whh_ref   : (4H, HID)  f32     W_hh, gate rows [i, f, o, g]
    h0_ref, c0_ref : (HID, 2B) f32 [init_*_1 | init_*_2] feature-major
    eye_ref   : (2B, 2B)   f32     identity (epilogue transpose via MXU)
    ei_ref, ej_ref : (HID, HID*HID) f32  lane-dense expansion constants
    w1_ref    : (HID*HID, D1) bf16,  b1_ref : (1, D1) f32
    w2_ref    : (D1, OUT_PAD) f32,   b2_ref : (1, OUT_PAD) f32  (zero-padded)
    out_ref   : (B, OUT_PAD) f32
    xproj_sc  : VMEM scratch (T, 4H, 2B) f32
    """
    n_steps = ids_ref.shape[0]                  # T (static)
    two_b = h0_ref.shape[1]                     # 2 * BATCH
    v_pad = table_ref.shape[1]

    # -- in-kernel embedding + hoisted input projection (bias folded) ---------
    # xproj_sc[t][:, n] = table[:, ids[t, n]]
    table = table_ref[...]                                      # (4H, V_pad)
    iota_v = jax.lax.broadcasted_iota(jnp.int32, (v_pad, two_b), 0)
    for t in range(n_steps):                    # static; independent stores
        onehot = (iota_v == ids_ref[t]).astype(jnp.float32)     # (V_pad, 2B)
        xproj_sc[t] = jnp.dot(table, onehot,
                              preferred_element_type=jnp.float32)

    whh = whh_ref[...]                          # (4H, HID), stays resident

    # -- serial recurrence: only W_hh @ h + gate nonlinearities per step ------
    # Feature-major layout: gate split = sublane slices (no lane rotates).
    def step(t, carry):
        h, c = carry                                            # (HID, 2B)
        gates = xproj_sc[t] + jnp.dot(whh, h,
                                      preferred_element_type=jnp.float32)
        sig = jax.nn.sigmoid(gates[:3 * HID, :])                # i | f | o
        g = jnp.tanh(gates[3 * HID:, :])
        i = sig[0 * HID:1 * HID, :]
        f = sig[1 * HID:2 * HID, :]
        o = sig[2 * HID:3 * HID, :]
        c = f * c + i * g
        h = o * jnp.tanh(c)
        return h, c

    h, _ = jax.lax.fori_loop(0, n_steps, step,
                             (h0_ref[...], c0_ref[...]),
                             unroll=min(n_steps, 8))

    # -- single epilogue transpose (HID, 2B) -> (2B, HID), done on the MXU ----
    # h_bt[b, k] = sum_j eye[b, j] * h[k, j] = h[k, b]
    h_bt = jax.lax.dot_general(eye_ref[...], h, (((1,), (1,)), ((), ())),
                               preferred_element_type=jnp.float32)
    h1 = h_bt[:BATCH, :]                        # last hidden, sentence 1
    h2 = h_bt[BATCH:, :]                        # last hidden, sentence 2

    # -- lane-dense alignment: sim[b, i*H + j] = h1[b, i] * h2[b, j] ----------
    a_exp = jnp.dot(h1, ei_ref[...], preferred_element_type=jnp.float32)
    b_exp = jnp.dot(h2, ej_ref[...], preferred_element_type=jnp.float32)
    sim = a_exp * b_exp                                         # (B, H*H)

    # nn.Softmax() with no dim on a 3-D tensor -> softmax over dim 0 (batch);
    # in the flattened layout this is a sublane (axis-0) reduce.
    m = jnp.max(sim, axis=0, keepdims=True)
    e = jnp.exp(sim - m)
    s = jnp.sum(e, axis=0, keepdims=True)
    align = (e / s) * sim                                       # alignment*sim

    # -- MLP head, never leaving VMEM -----------------------------------------
    v = jnp.maximum(align, 0.0)                                 # relu
    v = jnp.dot(v.astype(jnp.bfloat16), w1_ref[...],
                preferred_element_type=jnp.float32) + b1_ref[...]
    v = jnp.maximum(v, 0.0)                                     # relu
    out_ref[...] = (jnp.dot(v, w2_ref[...],
                            preferred_element_type=jnp.float32)
                    + b2_ref[...])


def ma_lstm_fused(ids, pp):
    """ids: (T, 1, 2B) int32 -> (B, OUT_PAD) padded logits."""
    t = ids.shape[0]
    vmem = pl.BlockSpec(memory_space=pltpu.MemorySpace.VMEM)
    return pl.pallas_call(
        _fused_kernel,
        out_shape=jax.ShapeDtypeStruct((BATCH, OUT_PAD), jnp.float32),
        in_specs=[vmem] * 12,
        out_specs=vmem,
        scratch_shapes=[pltpu.VMEM((t, 4 * HID, 2 * BATCH), jnp.float32)],
        compiler_params=pltpu.CompilerParams(
            vmem_limit_bytes=32 * 1024 * 1024),
    )(ids, pp["table_t"], pp["whh"], pp["h0"], pp["c0"], pp["eye2b"],
      pp["ei"], pp["ej"], pp["w1_t"], pp["b1"], pp["w2_t"], pp["b2"])


# ------------------------------ parameters -----------------------------------
def init_params(key, vocab_size):
    ks = jax.random.split(key, 13)
    k_lstm = 1.0 / np.sqrt(HID)
    k_d1 = 1.0 / np.sqrt(HID * HID)
    k_d2 = 1.0 / np.sqrt(D1)
    u = jax.random.uniform
    return {
        "embedding": jax.random.normal(ks[0], (vocab_size, EMB), jnp.float32),
        "w_ih": u(ks[1], (4 * HID, EMB), jnp.float32, -k_lstm, k_lstm),
        "w_hh": u(ks[2], (4 * HID, HID), jnp.float32, -k_lstm, k_lstm),
        "b_ih": u(ks[3], (4 * HID,), jnp.float32, -k_lstm, k_lstm),
        "b_hh": u(ks[4], (4 * HID,), jnp.float32, -k_lstm, k_lstm),
        "init_h_1": u(ks[5], (1, BATCH, HID), jnp.float32),
        "init_c_1": u(ks[6], (1, BATCH, HID), jnp.float32),
        "init_h_2": u(ks[7], (1, BATCH, HID), jnp.float32),
        "init_c_2": u(ks[8], (1, BATCH, HID), jnp.float32),
        "dense1_w": u(ks[9], (D1, HID * HID), jnp.float32, -k_d1, k_d1),
        "dense1_b": u(ks[10], (D1,), jnp.float32, -k_d1, k_d1),
        "dense2_w": u(ks[11], (NUM_CLASSES, D1), jnp.float32, -k_d2, k_d2),
        "dense2_b": u(ks[12], (D1,), jnp.float32, -k_d2, k_d2)[:NUM_CLASSES],
    }


def prepare_params(p):
    """One-time prep: gate-permute [i,f,g,o]->[i,f,o,g], pre-project the
    embedding table through W_ih (+ combined bias), transpose the recurrence
    operands to feature-major, build the expansion/identity constants, pad the
    output head, and cast Dense1 weights to bf16."""
    perm = jnp.concatenate([jnp.arange(0, 2 * HID),           # i, f
                            jnp.arange(3 * HID, 4 * HID),     # o
                            jnp.arange(2 * HID, 3 * HID)])    # g
    w_ih_p = p["w_ih"][perm, :]                               # (4H, EMB)
    w_hh_p = p["w_hh"][perm, :]                               # (4H, HID)
    bias_p = (p["b_ih"] + p["b_hh"])[perm]                    # (4H,)

    vocab = p["embedding"].shape[0]
    v_pad = ((vocab + 127) // 128) * 128
    proj = p["embedding"] @ w_ih_p.T + bias_p                 # (vocab, 4H)
    table_t = jnp.pad(proj, ((0, v_pad - vocab), (0, 0))).T   # (4H, V_pad)

    h0 = jnp.concatenate([p["init_h_1"][0], p["init_h_2"][0]], axis=0).T
    c0 = jnp.concatenate([p["init_c_1"][0], p["init_c_2"][0]], axis=0).T

    idx = jnp.arange(HID * HID)
    rows = jnp.arange(HID)[:, None]
    ei = (idx[None, :] // HID == rows).astype(jnp.float32)    # (H, H*H)
    ej = (idx[None, :] % HID == rows).astype(jnp.float32)     # (H, H*H)
    eye2b = jnp.eye(2 * BATCH, dtype=jnp.float32)

    w2_t = jnp.pad(p["dense2_w"].T,
                   ((0, 0), (0, OUT_PAD - NUM_CLASSES)))      # (D1, OUT_PAD)
    b2 = jnp.pad(p["dense2_b"],
                 (0, OUT_PAD - NUM_CLASSES)).reshape(1, OUT_PAD)

    return {
        "table_t": table_t,
        "whh": w_hh_p,
        "h0": h0,
        "c0": c0,
        "eye2b": eye2b,
        "ei": ei,
        "ej": ej,
        "w1_t": p["dense1_w"].T.astype(jnp.bfloat16),         # (H*H, D1) bf16
        "b1": p["dense1_b"].reshape(1, D1),
        "w2_t": w2_t,
        "b2": b2,
    }


# ------------------------------ full forward ---------------------------------
def ma_lstm_forward(prepped, sent1, sent2):
    """sent1, sent2: (T, B) int32 token ids -> (B, NUM_CLASSES) logits."""
    ids = jnp.concatenate([sent1, sent2], axis=1).astype(jnp.int32)  # (T, 2B)
    ids = ids[:, None, :]                                            # (T,1,2B)
    out = ma_lstm_fused(ids, prepped)                                # (B, 128)
    return out[:, :NUM_CLASSES]


# ------------------------------ pure-JAX reference ---------------------------
def reference_forward(params, sent1, sent2):
    emb = params["embedding"]
    w_ih, w_hh = params["w_ih"], params["w_hh"]
    b = params["b_ih"] + params["b_hh"]

    def run_lstm(x, h0, c0):
        def step(carry, x_t):
            h, c = carry
            gates = x_t @ w_ih.T + h @ w_hh.T + b
            i, f, g, o = jnp.split(gates, 4, axis=-1)
            i, f, o = jax.nn.sigmoid(i), jax.nn.sigmoid(f), jax.nn.sigmoid(o)
            g = jnp.tanh(g)
            c = f * c + i * g
            h = o * jnp.tanh(c)
            return (h, c), h
        (h, _), _ = jax.lax.scan(step, (h0, c0), x)
        return h

    x1 = jnp.take(emb, sent1, axis=0)
    x2 = jnp.take(emb, sent2, axis=0)
    h1 = run_lstm(x1, params["init_h_1"][0], params["init_c_1"][0])
    h2 = run_lstm(x2, params["init_h_2"][0], params["init_c_2"][0])
    sim = h1[:, :, None] * h2[:, None, :]
    align = jax.nn.softmax(sim, axis=0) * sim
    fc = align.reshape(BATCH, HID * HID)
    v = jnp.maximum(fc, 0.0)
    v = v @ params["dense1_w"].T + params["dense1_b"]
    v = jnp.maximum(v, 0.0)
    return v @ params["dense2_w"].T + params["dense2_b"]


if __name__ == "__main__":
    key = jax.random.PRNGKey(0)
    pkey, s1key, s2key = jax.random.split(key, 3)

    VOCAB = 50
    SEQ = 8
    params = init_params(pkey, VOCAB)
    prepped = prepare_params(params)

    sent1 = jax.random.randint(s1key, (SEQ, BATCH), 0, VOCAB, dtype=jnp.int32)
    sent2 = jax.random.randint(s2key, (SEQ, BATCH), 0, VOCAB, dtype=jnp.int32)

    fwd = jax.jit(ma_lstm_forward)
    logits = jax.block_until_ready(fwd(prepped, sent1, sent2))
    assert logits.shape == (BATCH, NUM_CLASSES)

    ref = jax.block_until_ready(reference_forward(params, sent1, sent2))
    np.testing.assert_allclose(np.asarray(logits), np.asarray(ref),
                               rtol=1e-2, atol=1e-2)
    print("KERNEL_OK")
</pallas_src>

<mosaic_0001>
module attributes {stable_mosaic.version = 11 : i64} {
  func.func @_fused_kernel(%arg0: memref<8x1x64xi32, #tpu.memory_space<vmem>>, %arg1: memref<128x128xf32, #tpu.memory_space<vmem>>, %arg2: memref<128x32xf32, #tpu.memory_space<vmem>>, %arg3: memref<32x64xf32, #tpu.memory_space<vmem>>, %arg4: memref<32x64xf32, #tpu.memory_space<vmem>>, %arg5: memref<64x64xf32, #tpu.memory_space<vmem>>, %arg6: memref<32x1024xf32, #tpu.memory_space<vmem>>, %arg7: memref<32x1024xf32, #tpu.memory_space<vmem>>, %arg8: memref<1024x128xbf16, #tpu.memory_space<vmem>>, %arg9: memref<1x128xf32, #tpu.memory_space<vmem>>, %arg10: memref<128x128xf32, #tpu.memory_space<vmem>>, %arg11: memref<1x128xf32, #tpu.memory_space<vmem>>, %arg12: memref<32x128xf32, #tpu.memory_space<vmem>>, %arg13: memref<8x128x64xf32, #tpu.memory_space<vmem>>) attributes {dimension_semantics = [], scalar_prefetch = 0 : i64, scratch_operands = 1 : i64, tpu.core_type = #tpu.core_type<tc>} {
    %c0 = arith.constant 0 : index
    %c0_0 = arith.constant 0 : index
    %0 = vector.load %arg1[%c0, %c0_0] : memref<128x128xf32, #tpu.memory_space<vmem>>, vector<128x128xf32>
    %1 = tpu.iota {dimensions = array<i32: 0>} : vector<128x64xi32>
    %c0_1 = arith.constant 0 : index
    %c0_2 = arith.constant 0 : index
    %c0_3 = arith.constant 0 : index
    %2 = vector.load %arg0[%c0_1, %c0_2, %c0_3] : memref<8x1x64xi32, #tpu.memory_space<vmem>>, vector<1x1x64xi32>
    %3 = vector.shape_cast %2 : vector<1x1x64xi32> to vector<1x64xi32>
    %4 = vector.broadcast %3 : vector<1x64xi32> to vector<128x64xi32>
    %5 = arith.cmpi eq, %1, %4 : vector<128x64xi32>
    %6 = arith.extui %5 : vector<128x64xi1> to vector<128x64xi32>
    %7 = arith.sitofp %6 : vector<128x64xi32> to vector<128x64xf32>
    %cst = arith.constant dense<0.000000e+00> : vector<128x64xf32>
    %8 = tpu.matmul %0, %7, %cst {dimension_numbers = #tpu.dot_dimension_numbers<[1], [0], [0], [1], [0, 0, 1, 1], [], []>} : vector<128x128xf32>, vector<128x64xf32>, vector<128x64xf32> -> vector<128x64xf32>
    %c0_4 = arith.constant 0 : index
    %c0_5 = arith.constant 0 : index
    %c0_6 = arith.constant 0 : index
    %9 = vector.load %arg13[%c0_4, %c0_5, %c0_6] : memref<8x128x64xf32, #tpu.memory_space<vmem>>, vector<1x128x64xf32>
    %10 = vector.shape_cast %9 : vector<1x128x64xf32> to vector<128x64xf32>
    %11 = vector.shape_cast %8 : vector<128x64xf32> to vector<1x128x64xf32>
    tpu.vector_store %arg13[%c0_4, %c0_5, %c0_6], %11 {strides = array<i32>} : memref<8x128x64xf32, #tpu.memory_space<vmem>>, vector<1x128x64xf32>,
    %c1 = arith.constant 1 : index
    %c0_7 = arith.constant 0 : index
    %c0_8 = arith.constant 0 : index
    %12 = vector.load %arg0[%c1, %c0_7, %c0_8] : memref<8x1x64xi32, #tpu.memory_space<vmem>>, vector<1x1x64xi32>
    %13 = vector.shape_cast %12 : vector<1x1x64xi32> to vector<1x64xi32>
    %14 = vector.broadcast %13 : vector<1x64xi32> to vector<128x64xi32>
    %15 = arith.cmpi eq, %1, %14 : vector<128x64xi32>
    %16 = arith.extui %15 : vector<128x64xi1> to vector<128x64xi32>
    %17 = arith.sitofp %16 : vector<128x64xi32> to vector<128x64xf32>
    %cst_9 = arith.constant dense<0.000000e+00> : vector<128x64xf32>
    %18 = tpu.matmul %0, %17, %cst_9 {dimension_numbers = #tpu.dot_dimension_numbers<[1], [0], [0], [1], [0, 0, 1, 1], [], []>} : vector<128x128xf32>, vector<128x64xf32>, vector<128x64xf32> -> vector<128x64xf32>
    %c1_10 = arith.constant 1 : index
    %c0_11 = arith.constant 0 : index
    %c0_12 = arith.constant 0 : index
    %19 = vector.load %arg13[%c1_10, %c0_11, %c0_12] : memref<8x128x64xf32, #tpu.memory_space<vmem>>, vector<1x128x64xf32>
    %20 = vector.shape_cast %19 : vector<1x128x64xf32> to vector<128x64xf32>
    %21 = vector.shape_cast %18 : vector<128x64xf32> to vector<1x128x64xf32>
    tpu.vector_store %arg13[%c1_10, %c0_11, %c0_12], %21 {strides = array<i32>} : memref<8x128x64xf32, #tpu.memory_space<vmem>>, vector<1x128x64xf32>,
    %c2 = arith.constant 2 : index
    %c0_13 = arith.constant 0 : index
    %c0_14 = arith.constant 0 : index
    %22 = vector.load %arg0[%c2, %c0_13, %c0_14] : memref<8x1x64xi32, #tpu.memory_space<vmem>>, vector<1x1x64xi32>
    %23 = vector.shape_cast %22 : vector<1x1x64xi32> to vector<1x64xi32>
    %24 = vector.broadcast %23 : vector<1x64xi32> to vector<128x64xi32>
    %25 = arith.cmpi eq, %1, %24 : vector<128x64xi32>
    %26 = arith.extui %25 : vector<128x64xi1> to vector<128x64xi32>
    %27 = arith.sitofp %26 : vector<128x64xi32> to vector<128x64xf32>
    %cst_15 = arith.constant dense<0.000000e+00> : vector<128x64xf32>
    %28 = tpu.matmul %0, %27, %cst_15 {dimension_numbers = #tpu.dot_dimension_numbers<[1], [0], [0], [1], [0, 0, 1, 1], [], []>} : vector<128x128xf32>, vector<128x64xf32>, vector<128x64xf32> -> vector<128x64xf32>
    %c2_16 = arith.constant 2 : index
    %c0_17 = arith.constant 0 : index
    %c0_18 = arith.constant 0 : index
    %29 = vector.load %arg13[%c2_16, %c0_17, %c0_18] : memref<8x128x64xf32, #tpu.memory_space<vmem>>, vector<1x128x64xf32>
    %30 = vector.shape_cast %29 : vector<1x128x64xf32> to vector<128x64xf32>
    %31 = vector.shape_cast %28 : vector<128x64xf32> to vector<1x128x64xf32>
    tpu.vector_store %arg13[%c2_16, %c0_17, %c0_18], %31 {strides = array<i32>} : memref<8x128x64xf32, #tpu.memory_space<vmem>>, vector<1x128x64xf32>,
    %c3 = arith.constant 3 : index
    %c0_19 = arith.constant 0 : index
    %c0_20 = arith.constant 0 : index
    %32 = vector.load %arg0[%c3, %c0_19, %c0_20] : memref<8x1x64xi32, #tpu.memory_space<vmem>>, vector<1x1x64xi32>
    %33 = vector.shape_cast %32 : vector<1x1x64xi32> to vector<1x64xi32>
    %34 = vector.broadcast %33 : vector<1x64xi32> to vector<128x64xi32>
    %35 = arith.cmpi eq, %1, %34 : vector<128x64xi32>
    %36 = arith.extui %35 : vector<128x64xi1> to vector<128x64xi32>
    %37 = arith.sitofp %36 : vector<128x64xi32> to vector<128x64xf32>
    %cst_21 = arith.constant dense<0.000000e+00> : vector<128x64xf32>
    %38 = tpu.matmul %0, %37, %cst_21 {dimension_numbers = #tpu.dot_dimension_numbers<[1], [0], [0], [1], [0, 0, 1, 1], [], []>} : vector<128x128xf32>, vector<128x64xf32>, vector<128x64xf32> -> vector<128x64xf32>
    %c3_22 = arith.constant 3 : index
    %c0_23 = arith.constant 0 : index
    %c0_24 = arith.constant 0 : index
    %39 = vector.load %arg13[%c3_22, %c0_23, %c0_24] : memref<8x128x64xf32, #tpu.memory_space<vmem>>, vector<1x128x64xf32>
    %40 = vector.shape_cast %39 : vector<1x128x64xf32> to vector<128x64xf32>
    %41 = vector.shape_cast %38 : vector<128x64xf32> to vector<1x128x64xf32>
    tpu.vector_store %arg13[%c3_22, %c0_23, %c0_24], %41 {strides = array<i32>} : memref<8x128x64xf32, #tpu.memory_space<vmem>>, vector<1x128x64xf32>,
    %c4 = arith.constant 4 : index
    %c0_25 = arith.constant 0 : index
    %c0_26 = arith.constant 0 : index
    %42 = vector.load %arg0[%c4, %c0_25, %c0_26] : memref<8x1x64xi32, #tpu.memory_space<vmem>>, vector<1x1x64xi32>
    %43 = vector.shape_cast %42 : vector<1x1x64xi32> to vector<1x64xi32>
    %44 = vector.broadcast %43 : vector<1x64xi32> to vector<128x64xi32>
    %45 = arith.cmpi eq, %1, %44 : vector<128x64xi32>
    %46 = arith.extui %45 : vector<128x64xi1> to vector<128x64xi32>
    %47 = arith.sitofp %46 : vector<128x64xi32> to vector<128x64xf32>
    %cst_27 = arith.constant dense<0.000000e+00> : vector<128x64xf32>
    %48 = tpu.matmul %0, %47, %cst_27 {dimension_numbers = #tpu.dot_dimension_numbers<[1], [0], [0], [1], [0, 0, 1, 1], [], []>} : vector<128x128xf32>, vector<128x64xf32>, vector<128x64xf32> -> vector<128x64xf32>
    %c4_28 = arith.constant 4 : index
    %c0_29 = arith.constant 0 : index
    %c0_30 = arith.constant 0 : index
    %49 = vector.load %arg13[%c4_28, %c0_29, %c0_30] : memref<8x128x64xf32, #tpu.memory_space<vmem>>, vector<1x128x64xf32>
    %50 = vector.shape_cast %49 : vector<1x128x64xf32> to vector<128x64xf32>
    %51 = vector.shape_cast %48 : vector<128x64xf32> to vector<1x128x64xf32>
    tpu.vector_store %arg13[%c4_28, %c0_29, %c0_30], %51 {strides = array<i32>} : memref<8x128x64xf32, #tpu.memory_space<vmem>>, vector<1x128x64xf32>,
    %c5 = arith.constant 5 : index
    %c0_31 = arith.constant 0 : index
    %c0_32 = arith.constant 0 : index
    %52 = vector.load %arg0[%c5, %c0_31, %c0_32] : memref<8x1x64xi32, #tpu.memory_space<vmem>>, vector<1x1x64xi32>
    %53 = vector.shape_cast %52 : vector<1x1x64xi32> to vector<1x64xi32>
    %54 = vector.broadcast %53 : vector<1x64xi32> to vector<128x64xi32>
    %55 = arith.cmpi eq, %1, %54 : vector<128x64xi32>
    %56 = arith.extui %55 : vector<128x64xi1> to vector<128x64xi32>
    %57 = arith.sitofp %56 : vector<128x64xi32> to vector<128x64xf32>
    %cst_33 = arith.constant dense<0.000000e+00> : vector<128x64xf32>
    %58 = tpu.matmul %0, %57, %cst_33 {dimension_numbers = #tpu.dot_dimension_numbers<[1], [0], [0], [1], [0, 0, 1, 1], [], []>} : vector<128x128xf32>, vector<128x64xf32>, vector<128x64xf32> -> vector<128x64xf32>
    %c5_34 = arith.constant 5 : index
    %c0_35 = arith.constant 0 : index
    %c0_36 = arith.constant 0 : index
    %59 = vector.load %arg13[%c5_34, %c0_35, %c0_36] : memref<8x128x64xf32, #tpu.memory_space<vmem>>, vector<1x128x64xf32>
    %60 = vector.shape_cast %59 : vector<1x128x64xf32> to vector<128x64xf32>
    %61 = vector.shape_cast %58 : vector<128x64xf32> to vector<1x128x64xf32>
    tpu.vector_store %arg13[%c5_34, %c0_35, %c0_36], %61 {strides = array<i32>} : memref<8x128x64xf32, #tpu.memory_space<vmem>>, vector<1x128x64xf32>,
    %c6 = arith.constant 6 : index
    %c0_37 = arith.constant 0 : index
    %c0_38 = arith.constant 0 : index
    %62 = vector.load %arg0[%c6, %c0_37, %c0_38] : memref<8x1x64xi32, #tpu.memory_space<vmem>>, vector<1x1x64xi32>
    %63 = vector.shape_cast %62 : vector<1x1x64xi32> to vector<1x64xi32>
    %64 = vector.broadcast %63 : vector<1x64xi32> to vector<128x64xi32>
    %65 = arith.cmpi eq, %1, %64 : vector<128x64xi32>
    %66 = arith.extui %65 : vector<128x64xi1> to vector<128x64xi32>
    %67 = arith.sitofp %66 : vector<128x64xi32> to vector<128x64xf32>
    %cst_39 = arith.constant dense<0.000000e+00> : vector<128x64xf32>
    %68 = tpu.matmul %0, %67, %cst_39 {dimension_numbers = #tpu.dot_dimension_numbers<[1], [0], [0], [1], [0, 0, 1, 1], [], []>} : vector<128x128xf32>, vector<128x64xf32>, vector<128x64xf32> -> vector<128x64xf32>
    %c6_40 = arith.constant 6 : index
    %c0_41 = arith.constant 0 : index
    %c0_42 = arith.constant 0 : index
    %69 = vector.load %arg13[%c6_40, %c0_41, %c0_42] : memref<8x128x64xf32, #tpu.memory_space<vmem>>, vector<1x128x64xf32>
    %70 = vector.shape_cast %69 : vector<1x128x64xf32> to vector<128x64xf32>
    %71 = vector.shape_cast %68 : vector<128x64xf32> to vector<1x128x64xf32>
    tpu.vector_store %arg13[%c6_40, %c0_41, %c0_42], %71 {strides = array<i32>} : memref<8x128x64xf32, #tpu.memory_space<vmem>>, vector<1x128x64xf32>,
    %c7 = arith.constant 7 : index
    %c0_43 = arith.constant 0 : index
    %c0_44 = arith.constant 0 : index
    %72 = vector.load %arg0[%c7, %c0_43, %c0_44] : memref<8x1x64xi32, #tpu.memory_space<vmem>>, vector<1x1x64xi32>
    %73 = vector.shape_cast %72 : vector<1x1x64xi32> to vector<1x64xi32>
    %74 = vector.broadcast %73 : vector<1x64xi32> to vector<128x64xi32>
    %75 = arith.cmpi eq, %1, %74 : vector<128x64xi32>
    %76 = arith.extui %75 : vector<128x64xi1> to vector<128x64xi32>
    %77 = arith.sitofp %76 : vector<128x64xi32> to vector<128x64xf32>
    %cst_45 = arith.constant dense<0.000000e+00> : vector<128x64xf32>
    %78 = tpu.matmul %0, %77, %cst_45 {dimension_numbers = #tpu.dot_dimension_numbers<[1], [0], [0], [1], [0, 0, 1, 1], [], []>} : vector<128x128xf32>, vector<128x64xf32>, vector<128x64xf32> -> vector<128x64xf32>
    %c7_46 = arith.constant 7 : index
    %c0_47 = arith.constant 0 : index
    %c0_48 = arith.constant 0 : index
    %79 = vector.load %arg13[%c7_46, %c0_47, %c0_48] : memref<8x128x64xf32, #tpu.memory_space<vmem>>, vector<1x128x64xf32>
    %80 = vector.shape_cast %79 : vector<1x128x64xf32> to vector<128x64xf32>
    %81 = vector.shape_cast %78 : vector<128x64xf32> to vector<1x128x64xf32>
    tpu.vector_store %arg13[%c7_46, %c0_47, %c0_48], %81 {strides = array<i32>} : memref<8x128x64xf32, #tpu.memory_space<vmem>>, vector<1x128x64xf32>,
    %c0_49 = arith.constant 0 : index
    %c0_50 = arith.constant 0 : index
    %82 = vector.load %arg2[%c0_49, %c0_50] : memref<128x32xf32, #tpu.memory_space<vmem>>, vector<128x32xf32>
    %c0_51 = arith.constant 0 : index
    %c0_52 = arith.constant 0 : index
    %83 = vector.load %arg3[%c0_51, %c0_52] : memref<32x64xf32, #tpu.memory_space<vmem>>, vector<32x64xf32>
    %c0_53 = arith.constant 0 : index
    %c0_54 = arith.constant 0 : index
    %84 = vector.load %arg4[%c0_53, %c0_54] : memref<32x64xf32, #tpu.memory_space<vmem>>, vector<32x64xf32>
    %c0_i32 = arith.constant 0 : i32
    %85 = arith.index_cast %c0_i32 : i32 to index
    %c0_55 = arith.constant 0 : index
    %c0_56 = arith.constant 0 : index
    %86 = vector.load %arg13[%85, %c0_55, %c0_56] : memref<8x128x64xf32, #tpu.memory_space<vmem>>, vector<1x128x64xf32>
    %87 = vector.shape_cast %86 : vector<1x128x64xf32> to vector<128x64xf32>
    %cst_57 = arith.constant dense<0.000000e+00> : vector<128x64xf32>
    %88 = tpu.matmul %82, %83, %cst_57 {dimension_numbers = #tpu.dot_dimension_numbers<[1], [0], [0], [1], [0, 0, 1, 1], [], []>} : vector<128x32xf32>, vector<32x64xf32>, vector<128x64xf32> -> vector<128x64xf32>
    %89 = arith.addf %87, %88 : vector<128x64xf32>
    %90 = vector.extract_strided_slice %89 {offsets = [0, 0], sizes = [96, 64], strides = [1, 1]} : vector<128x64xf32> to vector<96x64xf32>
    %91 = arith.negf %90 : vector<96x64xf32>
    %92 = math.exp %91 : vector<96x64xf32>
    %cst_58 = arith.constant 1.000000e+00 : f32
    %93 = vector.broadcast %cst_58 : f32 to vector<96x64xf32>
    %94 = arith.addf %93, %92 : vector<96x64xf32>
    %95 = arith.divf %93, %94 : vector<96x64xf32>
    %96 = vector.extract_strided_slice %89 {offsets = [96, 0], sizes = [32, 64], strides = [1, 1]} : vector<128x64xf32> to vector<32x64xf32>
    %97 = math.tanh %96 : vector<32x64xf32>
    %98 = vector.extract_strided_slice %95 {offsets = [0, 0], sizes = [32, 64], strides = [1, 1]} : vector<96x64xf32> to vector<32x64xf32>
    %99 = vector.extract_strided_slice %95 {offsets = [32, 0], sizes = [32, 64], strides = [1, 1]} : vector<96x64xf32> to vector<32x64xf32>
    %100 = vector.extract_strided_slice %95 {offsets = [64, 0], sizes = [32, 64], strides = [1, 1]} : vector<96x64xf32> to vector<32x64xf32>
    %101 = arith.mulf %99, %84 : vector<32x64xf32>
    %102 = arith.mulf %98, %97 : vector<32x64xf32>
    %103 = arith.addf %101, %102 : vector<32x64xf32>
    %104 = math.tanh %103 : vector<32x64xf32>
    %105 = arith.mulf %100, %104 : vector<32x64xf32>
    %c1_i32 = arith.constant 1 : i32
    %106 = arith.index_cast %c1_i32 : i32 to index
    %c0_59 = arith.constant 0 : index
    %c0_60 = arith.constant 0 : index
    %107 = vector.load %arg13[%106, %c0_59, %c0_60] : memref<8x128x64xf32, #tpu.memory_space<vmem>>, vector<1x128x64xf32>
    %108 = vector.shape_cast %107 : vector<1x128x64xf32> to vector<128x64xf32>
    %cst_61 = arith.constant dense<0.000000e+00> : vector<128x64xf32>
    %109 = tpu.matmul %82, %105, %cst_61 {dimension_numbers = #tpu.dot_dimension_numbers<[1], [0], [0], [1], [0, 0, 1, 1], [], []>} : vector<128x32xf32>, vector<32x64xf32>, vector<128x64xf32> -> vector<128x64xf32>
    %110 = arith.addf %108, %109 : vector<128x64xf32>
    %111 = vector.extract_strided_slice %110 {offsets = [0, 0], sizes = [96, 64], strides = [1, 1]} : vector<128x64xf32> to vector<96x64xf32>
    %112 = arith.negf %111 : vector<96x64xf32>
    %113 = math.exp %112 : vector<96x64xf32>
    %cst_62 = arith.constant 1.000000e+00 : f32
    %114 = vector.broadcast %cst_62 : f32 to vector<96x64xf32>
    %115 = arith.addf %114, %113 : vector<96x64xf32>
    %116 = arith.divf %114, %115 : vector<96x64xf32>
    %117 = vector.extract_strided_slice %110 {offsets = [96, 0], sizes = [32, 64], strides = [1, 1]} : vector<128x64xf32> to vector<32x64xf32>
    %118 = math.tanh %117 : vector<32x64xf32>
    %119 = vector.extract_strided_slice %116 {offsets = [0, 0], sizes = [32, 64], strides = [1, 1]} : vector<96x64xf32> to vector<32x64xf32>
    %120 = vector.extract_strided_slice %116 {offsets = [32, 0], sizes = [32, 64], strides = [1, 1]} : vector<96x64xf32> to vector<32x64xf32>
    %121 = vector.extract_strided_slice %116 {offsets = [64, 0], sizes = [32, 64], strides = [1, 1]} : vector<96x64xf32> to vector<32x64xf32>
    %122 = arith.mulf %120, %103 : vector<32x64xf32>
    %123 = arith.mulf %119, %118 : vector<32x64xf32>
    %124 = arith.addf %122, %123 : vector<32x64xf32>
    %125 = math.tanh %124 : vector<32x64xf32>
    %126 = arith.mulf %121, %125 : vector<32x64xf32>
    %c2_i32 = arith.constant 2 : i32
    %127 = arith.index_cast %c2_i32 : i32 to index
    %c0_63 = arith.constant 0 : index
    %c0_64 = arith.constant 0 : index
    %128 = vector.load %arg13[%127, %c0_63, %c0_64] : memref<8x128x64xf32, #tpu.memory_space<vmem>>, vector<1x128x64xf32>
    %129 = vector.shape_cast %128 : vector<1x128x64xf32> to vector<128x64xf32>
    %cst_65 = arith.constant dense<0.000000e+00> : vector<128x64xf32>
    %130 = tpu.matmul %82, %126, %cst_65 {dimension_numbers = #tpu.dot_dimension_numbers<[1], [0], [0], [1], [0, 0, 1, 1], [], []>} : vector<128x32xf32>, vector<32x64xf32>, vector<128x64xf32> -> vector<128x64xf32>
    %131 = arith.addf %129, %130 : vector<128x64xf32>
    %132 = vector.extract_strided_slice %131 {offsets = [0, 0], sizes = [96, 64], strides = [1, 1]} : vector<128x64xf32> to vector<96x64xf32>
    %133 = arith.negf %132 : vector<96x64xf32>
    %134 = math.exp %133 : vector<96x64xf32>
    %cst_66 = arith.constant 1.000000e+00 : f32
    %135 = vector.broadcast %cst_66 : f32 to vector<96x64xf32>
    %136 = arith.addf %135, %134 : vector<96x64xf32>
    %137 = arith.divf %135, %136 : vector<96x64xf32>
    %138 = vector.extract_strided_slice %131 {offsets = [96, 0], sizes = [32, 64], strides = [1, 1]} : vector<128x64xf32> to vector<32x64xf32>
    %139 = math.tanh %138 : vector<32x64xf32>
    %140 = vector.extract_strided_slice %137 {offsets = [0, 0], sizes = [32, 64], strides = [1, 1]} : vector<96x64xf32> to vector<32x64xf32>
    %141 = vector.extract_strided_slice %137 {offsets = [32, 0], sizes = [32, 64], strides = [1, 1]} : vector<96x64xf32> to vector<32x64xf32>
    %142 = vector.extract_strided_slice %137 {offsets = [64, 0], sizes = [32, 64], strides = [1, 1]} : vector<96x64xf32> to vector<32x64xf32>
    %143 = arith.mulf %141, %124 : vector<32x64xf32>
    %144 = arith.mulf %140, %139 : vector<32x64xf32>
    %145 = arith.addf %143, %144 : vector<32x64xf32>
    %146 = math.tanh %145 : vector<32x64xf32>
    %147 = arith.mulf %142, %146 : vector<32x64xf32>
    %c3_i32 = arith.constant 3 : i32
    %148 = arith.index_cast %c3_i32 : i32 to index
    %c0_67 = arith.constant 0 : index
    %c0_68 = arith.constant 0 : index
    %149 = vector.load %arg13[%148, %c0_67, %c0_68] : memref<8x128x64xf32, #tpu.memory_space<vmem>>, vector<1x128x64xf32>
    %150 = vector.shape_cast %149 : vector<1x128x64xf32> to vector<128x64xf32>
    %cst_69 = arith.constant dense<0.000000e+00> : vector<128x64xf32>
    %151 = tpu.matmul %82, %147, %cst_69 {dimension_numbers = #tpu.dot_dimension_numbers<[1], [0], [0], [1], [0, 0, 1, 1], [], []>} : vector<128x32xf32>, vector<32x64xf32>, vector<128x64xf32> -> vector<128x64xf32>
    %152 = arith.addf %150, %151 : vector<128x64xf32>
    %153 = vector.extract_strided_slice %152 {offsets = [0, 0], sizes = [96, 64], strides = [1, 1]} : vector<128x64xf32> to vector<96x64xf32>
    %154 = arith.negf %153 : vector<96x64xf32>
    %155 = math.exp %154 : vector<96x64xf32>
    %cst_70 = arith.constant 1.000000e+00 : f32
    %156 = vector.broadcast %cst_70 : f32 to vector<96x64xf32>
    %157 = arith.addf %156, %155 : vector<96x64xf32>
    %158 = arith.divf %156, %157 : vector<96x64xf32>
    %159 = vector.extract_strided_slice %152 {offsets = [96, 0], sizes = [32, 64], strides = [1, 1]} : vector<128x64xf32> to vector<32x64xf32>
    %160 = math.tanh %159 : vector<32x64xf32>
    %161 = vector.extract_strided_slice %158 {offsets = [0, 0], sizes = [32, 64], strides = [1, 1]} : vector<96x64xf32> to vector<32x64xf32>
    %162 = vector.extract_strided_slice %158 {offsets = [32, 0], sizes = [32, 64], strides = [1, 1]} : vector<96x64xf32> to vector<32x64xf32>
    %163 = vector.extract_strided_slice %158 {offsets = [64, 0], sizes = [32, 64], strides = [1, 1]} : vector<96x64xf32> to vector<32x64xf32>
    %164 = arith.mulf %162, %145 : vector<32x64xf32>
    %165 = arith.mulf %161, %160 : vector<32x64xf32>
    %166 = arith.addf %164, %165 : vector<32x64xf32>
    %167 = math.tanh %166 : vector<32x64xf32>
    %168 = arith.mulf %163, %167 : vector<32x64xf32>
    %c4_i32 = arith.constant 4 : i32
    %169 = arith.index_cast %c4_i32 : i32 to index
    %c0_71 = arith.constant 0 : index
    %c0_72 = arith.constant 0 : index
    %170 = vector.load %arg13[%169, %c0_71, %c0_72] : memref<8x128x64xf32, #tpu.memory_space<vmem>>, vector<1x128x64xf32>
    %171 = vector.shape_cast %170 : vector<1x128x64xf32> to vector<128x64xf32>
    %cst_73 = arith.constant dense<0.000000e+00> : vector<128x64xf32>
    %172 = tpu.matmul %82, %168, %cst_73 {dimension_numbers = #tpu.dot_dimension_numbers<[1], [0], [0], [1], [0, 0, 1, 1], [], []>} : vector<128x32xf32>, vector<32x64xf32>, vector<128x64xf32> -> vector<128x64xf32>
    %173 = arith.addf %171, %172 : vector<128x64xf32>
    %174 = vector.extract_strided_slice %173 {offsets = [0, 0], sizes = [96, 64], strides = [1, 1]} : vector<128x64xf32> to vector<96x64xf32>
    %175 = arith.negf %174 : vector<96x64xf32>
    %176 = math.exp %175 : vector<96x64xf32>
    %cst_74 = arith.constant 1.000000e+00 : f32
    %177 = vector.broadcast %cst_74 : f32 to vector<96x64xf32>
    %178 = arith.addf %177, %176 : vector<96x64xf32>
    %179 = arith.divf %177, %178 : vector<96x64xf32>
    %180 = vector.extract_strided_slice %173 {offsets = [96, 0], sizes = [32, 64], strides = [1, 1]} : vector<128x64xf32> to vector<32x64xf32>
    %181 = math.tanh %180 : vector<32x64xf32>
    %182 = vector.extract_strided_slice %179 {offsets = [0, 0], sizes = [32, 64], strides = [1, 1]} : vector<96x64xf32> to vector<32x64xf32>
    %183 = vector.extract_strided_slice %179 {offsets = [32, 0], sizes = [32, 64], strides = [1, 1]} : vector<96x64xf32> to vector<32x64xf32>
    %184 = vector.extract_strided_slice %179 {offsets = [64, 0], sizes = [32, 64], strides = [1, 1]} : vector<96x64xf32> to vector<32x64xf32>
    %185 = arith.mulf %183, %166 : vector<32x64xf32>
    %186 = arith.mulf %182, %181 : vector<32x64xf32>
    %187 = arith.addf %185, %186 : vector<32x64xf32>
    %188 = math.tanh %187 : vector<32x64xf32>
    %189 = arith.mulf %184, %188 : vector<32x64xf32>
    %c5_i32 = arith.constant 5 : i32
    %190 = arith.index_cast %c5_i32 : i32 to index
    %c0_75 = arith.constant 0 : index
    %c0_76 = arith.constant 0 : index
    %191 = vector.load %arg13[%190, %c0_75, %c0_76] : memref<8x128x64xf32, #tpu.memory_space<vmem>>, vector<1x128x64xf32>
    %192 = vector.shape_cast %191 : vector<1x128x64xf32> to vector<128x64xf32>
    %cst_77 = arith.constant dense<0.000000e+00> : vector<128x64xf32>
    %193 = tpu.matmul %82, %189, %cst_77 {dimension_numbers = #tpu.dot_dimension_numbers<[1], [0], [0], [1], [0, 0, 1, 1], [], []>} : vector<128x32xf32>, vector<32x64xf32>, vector<128x64xf32> -> vector<128x64xf32>
    %194 = arith.addf %192, %193 : vector<128x64xf32>
    %195 = vector.extract_strided_slice %194 {offsets = [0, 0], sizes = [96, 64], strides = [1, 1]} : vector<128x64xf32> to vector<96x64xf32>
    %196 = arith.negf %195 : vector<96x64xf32>
    %197 = math.exp %196 : vector<96x64xf32>
    %cst_78 = arith.constant 1.000000e+00 : f32
    %198 = vector.broadcast %cst_78 : f32 to vector<96x64xf32>
    %199 = arith.addf %198, %197 : vector<96x64xf32>
    %200 = arith.divf %198, %199 : vector<96x64xf32>
    %201 = vector.extract_strided_slice %194 {offsets = [96, 0], sizes = [32, 64], strides = [1, 1]} : vector<128x64xf32> to vector<32x64xf32>
    %202 = math.tanh %201 : vector<32x64xf32>
    %203 = vector.extract_strided_slice %200 {offsets = [0, 0], sizes = [32, 64], strides = [1, 1]} : vector<96x64xf32> to vector<32x64xf32>
    %204 = vector.extract_strided_slice %200 {offsets = [32, 0], sizes = [32, 64], strides = [1, 1]} : vector<96x64xf32> to vector<32x64xf32>
    %205 = vector.extract_strided_slice %200 {offsets = [64, 0], sizes = [32, 64], strides = [1, 1]} : vector<96x64xf32> to vector<32x64xf32>
    %206 = arith.mulf %204, %187 : vector<32x64xf32>
    %207 = arith.mulf %203, %202 : vector<32x64xf32>
    %208 = arith.addf %206, %207 : vector<32x64xf32>
    %209 = math.tanh %208 : vector<32x64xf32>
    %210 = arith.mulf %205, %209 : vector<32x64xf32>
    %c6_i32 = arith.constant 6 : i32
    %211 = arith.index_cast %c6_i32 : i32 to index
    %c0_79 = arith.constant 0 : index
    %c0_80 = arith.constant 0 : index
    %212 = vector.load %arg13[%211, %c0_79, %c0_80] : memref<8x128x64xf32, #tpu.memory_space<vmem>>, vector<1x128x64xf32>
    %213 = vector.shape_cast %212 : vector<1x128x64xf32> to vector<128x64xf32>
    %cst_81 = arith.constant dense<0.000000e+00> : vector<128x64xf32>
    %214 = tpu.matmul %82, %210, %cst_81 {dimension_numbers = #tpu.dot_dimension_numbers<[1], [0], [0], [1], [0, 0, 1, 1], [], []>} : vector<128x32xf32>, vector<32x64xf32>, vector<128x64xf32> -> vector<128x64xf32>
    %215 = arith.addf %213, %214 : vector<128x64xf32>
    %216 = vector.extract_strided_slice %215 {offsets = [0, 0], sizes = [96, 64], strides = [1, 1]} : vector<128x64xf32> to vector<96x64xf32>
    %217 = arith.negf %216 : vector<96x64xf32>
    %218 = math.exp %217 : vector<96x64xf32>
    %cst_82 = arith.constant 1.000000e+00 : f32
    %219 = vector.broadcast %cst_82 : f32 to vector<96x64xf32>
    %220 = arith.addf %219, %218 : vector<96x64xf32>
    %221 = arith.divf %219, %220 : vector<96x64xf32>
    %222 = vector.extract_strided_slice %215 {offsets = [96, 0], sizes = [32, 64], strides = [1, 1]} : vector<128x64xf32> to vector<32x64xf32>
    %223 = math.tanh %222 : vector<32x64xf32>
    %224 = vector.extract_strided_slice %221 {offsets = [0, 0], sizes = [32, 64], strides = [1, 1]} : vector<96x64xf32> to vector<32x64xf32>
    %225 = vector.extract_strided_slice %221 {offsets = [32, 0], sizes = [32, 64], strides = [1, 1]} : vector<96x64xf32> to vector<32x64xf32>
    %226 = vector.extract_strided_slice %221 {offsets = [64, 0], sizes = [32, 64], strides = [1, 1]} : vector<96x64xf32> to vector<32x64xf32>
    %227 = arith.mulf %225, %208 : vector<32x64xf32>
    %228 = arith.mulf %224, %223 : vector<32x64xf32>
    %229 = arith.addf %227, %228 : vector<32x64xf32>
    %230 = math.tanh %229 : vector<32x64xf32>
    %231 = arith.mulf %226, %230 : vector<32x64xf32>
    %c7_i32 = arith.constant 7 : i32
    %232 = arith.index_cast %c7_i32 : i32 to index
    %c0_83 = arith.constant 0 : index
    %c0_84 = arith.constant 0 : index
    %233 = vector.load %arg13[%232, %c0_83, %c0_84] : memref<8x128x64xf32, #tpu.memory_space<vmem>>, vector<1x128x64xf32>
    %234 = vector.shape_cast %233 : vector<1x128x64xf32> to vector<128x64xf32>
    %cst_85 = arith.constant dense<0.000000e+00> : vector<128x64xf32>
    %235 = tpu.matmul %82, %231, %cst_85 {dimension_numbers = #tpu.dot_dimension_numbers<[1], [0], [0], [1], [0, 0, 1, 1], [], []>} : vector<128x32xf32>, vector<32x64xf32>, vector<128x64xf32> -> vector<128x64xf32>
    %236 = arith.addf %234, %235 : vector<128x64xf32>
    %237 = vector.extract_strided_slice %236 {offsets = [0, 0], sizes = [96, 64], strides = [1, 1]} : vector<128x64xf32> to vector<96x64xf32>
    %238 = arith.negf %237 : vector<96x64xf32>
    %239 = math.exp %238 : vector<96x64xf32>
    %cst_86 = arith.constant 1.000000e+00 : f32
    %240 = vector.broadcast %cst_86 : f32 to vector<96x64xf32>
    %241 = arith.addf %240, %239 : vector<96x64xf32>
    %242 = arith.divf %240, %241 : vector<96x64xf32>
    %243 = vector.extract_strided_slice %236 {offsets = [96, 0], sizes = [32, 64], strides = [1, 1]} : vector<128x64xf32> to vector<32x64xf32>
    %244 = math.tanh %243 : vector<32x64xf32>
    %245 = vector.extract_strided_slice %242 {offsets = [0, 0], sizes = [32, 64], strides = [1, 1]} : vector<96x64xf32> to vector<32x64xf32>
    %246 = vector.extract_strided_slice %242 {offsets = [32, 0], sizes = [32, 64], strides = [1, 1]} : vector<96x64xf32> to vector<32x64xf32>
    %247 = vector.extract_strided_slice %242 {offsets = [64, 0], sizes = [32, 64], strides = [1, 1]} : vector<96x64xf32> to vector<32x64xf32>
    %248 = arith.mulf %246, %229 : vector<32x64xf32>
    %249 = arith.mulf %245, %244 : vector<32x64xf32>
    %250 = arith.addf %248, %249 : vector<32x64xf32>
    %251 = math.tanh %250 : vector<32x64xf32>
    %252 = arith.mulf %247, %251 : vector<32x64xf32>
    %c8_i32 = arith.constant 8 : i32
    %c0_87 = arith.constant 0 : index
    %c0_88 = arith.constant 0 : index
    %253 = vector.load %arg5[%c0_87, %c0_88] : memref<64x64xf32, #tpu.memory_space<vmem>>, vector<64x64xf32>
    %cst_89 = arith.constant dense<0.000000e+00> : vector<64x32xf32>
    %254 = tpu.matmul %253, %252, %cst_89 {dimension_numbers = #tpu.dot_dimension_numbers<[1], [1], [0], [0], [0, 0, 1, 0], [], []>} : vector<64x64xf32>, vector<32x64xf32>, vector<64x32xf32> -> vector<64x32xf32>
    %255 = vector.extract_strided_slice %254 {offsets = [0, 0], sizes = [32, 32], strides = [1, 1]} : vector<64x32xf32> to vector<32x32xf32>
    %256 = vector.extract_strided_slice %254 {offsets = [32, 0], sizes = [32, 32], strides = [1, 1]} : vector<64x32xf32> to vector<32x32xf32>
    %c0_90 = arith.constant 0 : index
    %c0_91 = arith.constant 0 : index
    %257 = vector.load %arg6[%c0_90, %c0_91] : memref<32x1024xf32, #tpu.memory_space<vmem>>, vector<32x1024xf32>
    %cst_92 = arith.constant dense<0.000000e+00> : vector<32x1024xf32>
    %258 = tpu.matmul %255, %257, %cst_92 {dimension_numbers = #tpu.dot_dimension_numbers<[1], [0], [0], [1], [0, 0, 1, 1], [], []>} : vector<32x32xf32>, vector<32x1024xf32>, vector<32x1024xf32> -> vector<32x1024xf32>
    %c0_93 = arith.constant 0 : index
    %c0_94 = arith.constant 0 : index
    %259 = vector.load %arg7[%c0_93, %c0_94] : memref<32x1024xf32, #tpu.memory_space<vmem>>, vector<32x1024xf32>
    %cst_95 = arith.constant dense<0.000000e+00> : vector<32x1024xf32>
    %260 = tpu.matmul %256, %259, %cst_95 {dimension_numbers = #tpu.dot_dimension_numbers<[1], [0], [0], [1], [0, 0, 1, 1], [], []>} : vector<32x32xf32>, vector<32x1024xf32>, vector<32x1024xf32> -> vector<32x1024xf32>
    %261 = arith.mulf %258, %260 : vector<32x1024xf32>
    %cst_96 = arith.constant dense<0xFF800000> : vector<1024xf32>
    %262 = vector.multi_reduction <maximumf>, %261, %cst_96 [0] : vector<32x1024xf32> to vector<1024xf32>
    %263 = vector.shape_cast %262 : vector<1024xf32> to vector<1x1024xf32>
    %264 = vector.broadcast %263 : vector<1x1024xf32> to vector<32x1024xf32>
    %265 = arith.subf %261, %264 : vector<32x1024xf32>
    %266 = math.exp %265 : vector<32x1024xf32>
    %cst_97 = arith.constant dense<0.000000e+00> : vector<1024xf32>
    %267 = vector.multi_reduction <add>, %266, %cst_97 [0] : vector<32x1024xf32> to vector<1024xf32>
    %268 = vector.shape_cast %267 : vector<1024xf32> to vector<1x1024xf32>
    %269 = vector.broadcast %268 : vector<1x1024xf32> to vector<32x1024xf32>
    %270 = arith.divf %266, %269 : vector<32x1024xf32>
    %271 = arith.mulf %270, %261 : vector<32x1024xf32>
    %cst_98 = arith.constant 0.000000e+00 : f32
    %272 = vector.broadcast %cst_98 : f32 to vector<32x1024xf32>
    %273 = arith.maximumf %271, %272 : vector<32x1024xf32>
    %274 = arith.truncf %273 : vector<32x1024xf32> to vector<32x1024xbf16>
    %c0_99 = arith.constant 0 : index
    %c0_100 = arith.constant 0 : index
    %275 = vector.load %arg8[%c0_99, %c0_100] : memref<1024x128xbf16, #tpu.memory_space<vmem>>, vector<1024x128xbf16>
    %cst_101 = arith.constant dense<0.000000e+00> : vector<32x128xf32>
    %276 = tpu.matmul %274, %275, %cst_101 {dimension_numbers = #tpu.dot_dimension_numbers<[1], [0], [0], [1], [0, 0, 1, 1], [], []>} : vector<32x1024xbf16>, vector<1024x128xbf16>, vector<32x128xf32> -> vector<32x128xf32>
    %c0_102 = arith.constant 0 : index
    %c0_103 = arith.constant 0 : index
    %277 = vector.load %arg9[%c0_102, %c0_103] : memref<1x128xf32, #tpu.memory_space<vmem>>, vector<1x128xf32>
    %278 = vector.broadcast %277 : vector<1x128xf32> to vector<32x128xf32>
    %279 = arith.addf %276, %278 : vector<32x128xf32>
    %cst_104 = arith.constant 0.000000e+00 : f32
    %280 = vector.broadcast %cst_104 : f32 to vector<32x128xf32>
    %281 = arith.maximumf %279, %280 : vector<32x128xf32>
    %c0_105 = arith.constant 0 : index
    %c0_106 = arith.constant 0 : index
    %282 = vector.load %arg10[%c0_105, %c0_106] : memref<128x128xf32, #tpu.memory_space<vmem>>, vector<128x128xf32>
    %cst_107 = arith.constant dense<0.000000e+00> : vector<32x128xf32>
    %283 = tpu.matmul %281, %282, %cst_107 {dimension_numbers = #tpu.dot_dimension_numbers<[1], [0], [0], [1], [0, 0, 1, 1], [], []>} : vector<32x128xf32>, vector<128x128xf32>, vector<32x128xf32> -> vector<32x128xf32>
    %c0_108 = arith.constant 0 : index
    %c0_109 = arith.constant 0 : index
    %284 = vector.load %arg11[%c0_108, %c0_109] : memref<1x128xf32, #tpu.memory_space<vmem>>, vector<1x128xf32>
    %285 = vector.broadcast %284 : vector<1x128xf32> to vector<32x128xf32>
    %286 = arith.addf %283, %285 : vector<32x128xf32>
    %c0_110 = arith.constant 0 : index
    %c0_111 = arith.constant 0 : index
    %287 = vector.load %arg12[%c0_110, %c0_111] : memref<32x128xf32, #tpu.memory_space<vmem>>, vector<32x128xf32>
    tpu.vector_store %arg12[%c0_110, %c0_111], %286 {strides = array<i32>} : memref<32x128xf32, #tpu.memory_space<vmem>>, vector<32x128xf32>,
    return
  }
}

</mosaic_0001>

<bundles_post_ra>
// kernel: ma_lstm_forward.1
= control target key start
LH: loop header
LB: loop body
LE: loop exit
PB: predicated region body
PF: predicated region fallthrough
CT: control target
= control target key end

     0   :  { %17 = vsyncpa [#allocation4], 0  ;;  %s11700_s0 = inlined_call_operand.vmem [shape: s32[8,1,64], index: 0, kind: input, shape index: {}]   ;;  %s11701_s1 = inlined_call_operand.vmem [shape: f32[128,128], index: 1, kind: input, shape index: {}]   ;;  %s11702_s2 = inlined_call_operand.vmem [shape: f32[128,32], index: 2, kind: input, shape index: {}]   ;;  %s11703_s3 = inlined_call_operand.hbm [shape: f32[32,64], index: 3, kind: input, shape index: {}]   ;;  %s11704_s4 = inlined_call_operand.hbm [shape: f32[32,64], index: 4, kind: input, shape index: {}]   ;;  %s11705_s5 = inlined_call_operand.vmem [shape: f32[64,64], index: 5, kind: input, shape index: {}]   ;;  %s11706_s6 = inlined_call_operand.hbm [shape: f32[32,1024], index: 6, kind: input, shape index: {}]   ;;  %s11707_s7 = inlined_call_operand.hbm [shape: f32[32,1024], index: 7, kind: input, shape index: {}]   ;;  %s11708_s8 = inlined_call_operand.hbm [shape: bf16[1024,128], index: 8, kind: input, shape index: {}]   ;;  %s11709_s9 = inlined_call_operand.vmem [shape: f32[1,128], index: 9, kind: input, shape index: {}]   ;;  %s11710_s10 = inlined_call_operand.hbm [shape: f32[128,128], index: 10, kind: input, shape index: {}]   ;;  %s11711_s11 = inlined_call_operand.hbm [shape: f32[1,128], index: 11, kind: input, shape index: {}]   ;;  %s11712_s12 = inlined_call_operand.vmem [shape: f32[32,128], index: 12, kind: output, shape index: {}]  }
   0x1   :  { %18 = vsyncpa [#allocation6], 0 }
   0x2   :  { %19 = vsyncpa [#allocation9], 0 }
   0x3   :  { %20 = vsyncpa [#allocation12], 0  ;;  %s9579_s21 = smov [#allocation5]   ;;  %s9417_s25 = scalar_lea.hbm %s11704_s4, 512 }
   0x4   :  { %s44_s22 = sshll.u32 %s9579_s21, 4  ;;  %p9418_p0 = scmp.ne.s32.totalorder %s11704_s4, %s9417_s25  ;;  %s45_s22 = int_to_ptr.vmem [resolvable:$true] %s44_s22 }
   0x5   :  { %p9421_p1 = scmp.lt.u32.totalorder %s9417_s25, %s11704_s4 }
   0x7   :  { %p9423_p2 = pnand %p9421_p1, %p9418_p0 }
   0x9   :  { %9426 = shalt.err (!%p9423_p2)
}
   0xa   :  { %s9427_s30 = scalar_lea.vmem %s45_s22, 512  ;;  %p9432_p4 = scmp.lt.s32.totalorder %s45_s22, %s45_s22 }
   0xb   :  { %p9428_p3 = scmp.ne.s32.totalorder %s45_s22, %s9427_s30  ;;  %p9433_p5 = scmp.lt.s32.totalorder %s9427_s30, %s9427_s30 }
   0xd   :  { %p9434_p6 = por %p9433_p5, %p9432_p4 }
   0xf   :  { %p9435_p7 = pnand %p9434_p6, %p9428_p3 }
  0x11   :  { %9438 = shalt.err (!%p9435_p7)
}
  0x12   :  { %s9580_s13 = smov 128   ;;  %s9581_s14 = smov 8  }
  0x13   :  { %50 = dma.hbm_to_vmem [thread:$0]  %s11704_s4, 512, %s45_s22, [#allocation6], %s9580_s13, %s9580_s13, %s9581_s14  }
  0x14   :  { %s9582_s17 = smov [#allocation8]   ;;  %s9583_s19 = smov [#allocation11]  }
  0x15   :  { %s70_s18 = sshll.u32 %s9582_s17, 4  ;;  %s96_s20 = sshll.u32 %s9583_s19, 4  ;;  %s71_s18 = int_to_ptr.vmem [resolvable:$true] %s70_s18  ;;  %s97_s20 = int_to_ptr.vmem [resolvable:$true] %s96_s20 }
  0x16   :  { %s9439_s24 = scalar_lea.hbm %s11707_s7, 4096 }
  0x17   :  { %p9440_p8 = scmp.ne.s32.totalorder %s11707_s7, %s9439_s24  ;;  %p9443_p9 = scmp.lt.u32.totalorder %s9439_s24, %s11707_s7 }
  0x19   :  { %p9445_p10 = pnand %p9443_p9, %p9440_p8 }
  0x1b   :  { %9448 = shalt.err (!%p9445_p10)
}
  0x1c   :  { %s9449_s4 = scalar_lea.vmem %s71_s18, 4096  ;;  %p9454_p12 = scmp.lt.s32.totalorder %s71_s18, %s71_s18 }
  0x1d   :  { %p9450_p11 = scmp.ne.s32.totalorder %s71_s18, %s9449_s4  ;;  %p9455_p13 = scmp.lt.s32.totalorder %s9449_s4, %s9449_s4 }
  0x1f   :  { %p9456_p0 = por %p9455_p13, %p9454_p12 }
  0x21   :  { %p9457_p1 = pnand %p9456_p0, %p9450_p11 }
  0x23   :  { %9460 = shalt.err (!%p9457_p1)
}
  0x24   :  { %s9584_s22 = smov 1024   ;;  %s9585_s29 = smov 64  }
  0x25   :  { %76 = dma.hbm_to_vmem [thread:$0]  %s11707_s7, 4096, %s71_s18, [#allocation9], %s9584_s22, %s9584_s22, %s9585_s29  }
  0x26   :  { %s9461_s19 = scalar_lea.hbm %s11710_s10, 2048 }
  0x27   :  { %p9462_p2 = scmp.ne.s32.totalorder %s11710_s10, %s9461_s19  ;;  %p9465_p3 = scmp.lt.u32.totalorder %s9461_s19, %s11710_s10 }
  0x29   :  { %p9467_p4 = pnand %p9465_p3, %p9462_p2 }
  0x2b   :  { %9470 = shalt.err (!%p9467_p4)
}
  0x2c   :  { %s9471_s26 = scalar_lea.vmem %s97_s20, 2048  ;;  %p9476_p6 = scmp.lt.s32.totalorder %s97_s20, %s97_s20 }
  0x2d   :  { %p9472_p5 = scmp.ne.s32.totalorder %s97_s20, %s9471_s26  ;;  %p9477_p7 = scmp.lt.s32.totalorder %s9471_s26, %s9471_s26 }
  0x2f   :  { %p9478_p8 = por %p9477_p7, %p9476_p6 }
  0x31   :  { %p9479_p9 = pnand %p9478_p8, %p9472_p5 }
  0x33   :  { %9482 = shalt.err (!%p9479_p9)
}
  0x34   :  { %102 = dma.hbm_to_vmem [thread:$0]  %s11710_s10, 2048, %s97_s20, [#allocation12], %s9580_s13, %s9580_s13, %s9581_s14  }
  0x35   :  { %s9586_s27 = smov [#allocation3]   ;;  %s9587_s4 = smov [#allocation7]  }
  0x36   :  { %s32_s28 = sshll.u32 %s9586_s27, 4  ;;  %s58_s30 = sshll.u32 %s9587_s4, 4  ;;  %s33_s28 = int_to_ptr.vmem [resolvable:$true] %s32_s28  ;;  %s59_s30 = int_to_ptr.vmem [resolvable:$true] %s58_s30 }
  0x37   :  { %s9483_s17 = scalar_lea.hbm %s11703_s3, 512 }
  0x38   :  { %p9484_p10 = scmp.ne.s32.totalorder %s11703_s3, %s9483_s17  ;;  %p9487_p11 = scmp.lt.u32.totalorder %s9483_s17, %s11703_s3 }
  0x3a   :  { %p9489_p12 = pnand %p9487_p11, %p9484_p10 }
  0x3c   :  { %9492 = shalt.err (!%p9489_p12)
}
  0x3d   :  { %s9493_s10 = scalar_lea.vmem %s33_s28, 512  ;;  %p9498_p0 = scmp.lt.s32.totalorder %s33_s28, %s33_s28 }
  0x3e   :  { %p9494_p13 = scmp.ne.s32.totalorder %s33_s28, %s9493_s10  ;;  %p9499_p1 = scmp.lt.s32.totalorder %s9493_s10, %s9493_s10 }
  0x40   :  { %p9500_p2 = por %p9499_p1, %p9498_p0 }
  0x42   :  { %p9501_p3 = pnand %p9500_p2, %p9494_p13 }
  0x44   :  { %9504 = shalt.err (!%p9501_p3)
}
  0x45   :  { %38 = dma.hbm_to_vmem [thread:$0]  %s11703_s3, 512, %s33_s28, [#allocation4], %s9580_s13, %s9580_s13, %s9581_s14  }
  0x46   :  { %s9505_s18 = scalar_lea.hbm %s11706_s6, 4096 }
  0x47   :  { %p9506_p4 = scmp.ne.s32.totalorder %s11706_s6, %s9505_s18  ;;  %p9509_p5 = scmp.lt.u32.totalorder %s9505_s18, %s11706_s6 }
  0x49   :  { %p9511_p6 = pnand %p9509_p5, %p9506_p4 }
  0x4b   :  { %9514 = shalt.err (!%p9511_p6)
}
  0x4c   :  { %s9515_s17 = scalar_lea.vmem %s59_s30, 4096  ;;  %p9520_p8 = scmp.lt.s32.totalorder %s59_s30, %s59_s30 }
  0x4d   :  { %p9516_p7 = scmp.ne.s32.totalorder %s59_s30, %s9515_s17  ;;  %p9521_p9 = scmp.lt.s32.totalorder %s9515_s17, %s9515_s17 }
  0x4f   :  { %p9522_p10 = por %p9521_p9, %p9520_p8 }
  0x51   :  { %p9523_p11 = pnand %p9522_p10, %p9516_p7 }
  0x53   :  { %9526 = shalt.err (!%p9523_p11)
}
  0x54   :  { %64 = dma.hbm_to_vmem [thread:$0]  %s11706_s6, 4096, %s59_s30, [#allocation6], %s9584_s22, %s9584_s22, %s9585_s29  }
  0x55   :  { %s9588_s14 = smov [#allocation10]   ;;  %s9527_s23 = scalar_lea.hbm %s11708_s8, 8192 }
  0x56   :  { %s82_s28 = sshll.u32 %s9588_s14, 4  ;;  %p9528_p12 = scmp.ne.s32.totalorder %s11708_s8, %s9527_s23  ;;  %s83_s28 = int_to_ptr.vmem [resolvable:$true] %s82_s28 }
  0x57   :  { %p9531_p13 = scmp.lt.u32.totalorder %s9527_s23, %s11708_s8 }
  0x59   :  { %p9533_p0 = pnand %p9531_p13, %p9528_p12 }
  0x5b   :  { %9536 = shalt.err (!%p9533_p0)
}
  0x5c   :  { %s9537_s26 = scalar_lea.vmem %s83_s28, 8192  ;;  %p9542_p2 = scmp.lt.s32.totalorder %s83_s28, %s83_s28 }
  0x5d   :  { %p9538_p1 = scmp.ne.s32.totalorder %s83_s28, %s9537_s26  ;;  %p9543_p3 = scmp.lt.s32.totalorder %s9537_s26, %s9537_s26 }
  0x5f   :  { %p9544_p4 = por %p9543_p3, %p9542_p2 }
  0x61   :  { %p9545_p5 = pnand %p9544_p4, %p9538_p1 }
  0x63   :  { %9548 = shalt.err (!%p9545_p5)
}
  0x64   :  { %s9589_s6 = smov 4   ;;  %s9590_s7 = smov [#allocation13]  }
  0x65   :  { %88 = dma.hbm_to_vmem [thread:$0]  %s11708_s8, 8192, %s83_s28, [#allocation9], %s9585_s29, %s9585_s29, %s9589_s6  }
  0x66   :  { %s109_s18 = sshll.u32 %s9590_s7, 4  ;;  %s9549_s15 = scalar_lea.hbm %s11711_s11, 16  ;;  %s110_s18 = int_to_ptr.vmem [resolvable:$true] %s109_s18 }
  0x67   :  { %p9550_p6 = scmp.ne.s32.totalorder %s11711_s11, %s9549_s15  ;;  %p9553_p7 = scmp.lt.u32.totalorder %s9549_s15, %s11711_s11 }
  0x69   :  { %p9555_p8 = pnand %p9553_p7, %p9550_p6 }
  0x6b   :  { %9558 = shalt.err (!%p9555_p8)
}
  0x6c   :  { %s9559_s14 = scalar_lea.vmem %s110_s18, 16  ;;  %s9563_s8 = scalar_lea.vmem %s110_s18, 32 }
  0x6d   :  { %p9560_p9 = scmp.ne.s32.totalorder %s110_s18, %s9559_s14  ;;  %p9564_p10 = scmp.lt.s32.totalorder %s110_s18, %s110_s18 }
  0x6e   :  { %p9565_p11 = scmp.lt.s32.totalorder %s9563_s8, %s9559_s14 }
  0x70   :  { %p9566_p12 = por %p9565_p11, %p9564_p10 }
  0x72   :  { %p9567_p13 = pnand %p9566_p12, %p9560_p9 }
  0x74   :  { %9570 = shalt.err (!%p9567_p13)
}
  0x75   :  { %112 = dma.hbm_to_vmem [thread:$0]  %s11711_s11, 16, %s110_s18, [#allocation12]  }
  0x76   :  { %9571 = dma.done.wait [#allocation4], 512  }
  0x77   :  { %9572 = vsyncadd [#allocation4], 4294966784 }
  0x78   :  { %9573 = dma.done.wait [#allocation6], 4608  }
  0x79   :  { %9574 = vsyncadd [#allocation6], 4294962688 }
  0x7a   :  { %9575 = dma.done.wait [#allocation9], 12288  }
  0x7b   :  { %9576 = vsyncadd [#allocation9], 4294955008 }
  0x7c   :  { %9577 = dma.done.wait [#allocation12], 2064  }
  0x7d   :  { %9578 = vsyncadd [#allocation12], 4294965232  ;;  %v151_v0 = vlaneseq  ;;  %v6332_v7 = vld [vmem:[%s11700_s0] ss:$0 sm:$0xff]  ;;  %v9591_v9 = vmov 1.0|1.0  }
  0x7e   :  { %v9782_v8 = vld [vmem:[%s11701_s1] sm:$0xff]  ;;  %v9864_v21 = vld [vmem:[%s11701_s1 + $0x8] sm:$0xff]  ;;  %v9869_v22 = vld [vmem:[%s11701_s1 + $0x10] sm:$0xff] }
  0x7f   :  { %v9759_v1 = vshrl.u32 %v151_v0, 7  ;;  %7529 = vmatprep.mubr.f32.mxu0 %v9782_v8  ;;  %7585 = vmatprep.mubr.f32.mxu1 %v9782_v8  ;;  %v9847_v20 = vld [vmem:[%s11700_s0 + $0x2] ss:$0 sm:$0xff]  ;;  %v9879_v23 = vld [vmem:[%s11701_s1 + $0x18] sm:$0xff]  ;;  %v9901_v26 = vld [vmem:[%s11701_s1 + $0x28] sm:$0xff] }
  0x80   :  { %v9885_v24 = vld [vmem:[%s11701_s1 + $0x20] sm:$0xff]  ;;  %v9907_v27 = vld [vmem:[%s11701_s1 + $0x30] sm:$0xff]  ;;  %v9925_v29 = vld [vmem:[%s11701_s1 + $0x38] sm:$0xff] }
  0x81   :  { %v9762_v2 = vadd.s32 8, %v9759_v1  ;;  %v9765_v3 = vadd.s32 16, %v9759_v1  ;;  %v9768_v4 = vadd.s32 24, %v9759_v1  ;;  %v9771_v5 = vadd.s32 32, %v9759_v1  ;;  %v9931_v30 = vld [vmem:[%s11701_s1 + $0x40] sm:$0xff]  ;;  %v9951_v32 = vld [vmem:[%s11701_s1 + $0x48] sm:$0xff] }
  0x82   :  { %v9774_v6 = vadd.s32 40, %v9759_v1  ;;  %vm173_vm0 = vcmp.eq.s32.totalorder %v9759_v1, %v6332_v7  ;;  %v9794_v10 = vadd.s32 48, %v9759_v1  ;;  %v9797_v11 = vadd.s32 56, %v9759_v1  ;;  %v9957_v33 = vld [vmem:[%s11701_s1 + $0x50] sm:$0xff]  ;;  %v9977_v35 = vld [vmem:[%s11701_s1 + $0x58] sm:$0xff]  ;;  %v9983_v36 = vld [vmem:[%s11701_s1 + $0x60] sm:$0xff] }
  0x83   :  { %vm174_vm1 = vcmp.eq.s32.totalorder %v9762_v2, %v6332_v7  ;;  %vm175_vm2 = vcmp.eq.s32.totalorder %v9765_v3, %v6332_v7  ;;  %vm176_vm3 = vcmp.eq.s32.totalorder %v9768_v4, %v6332_v7  ;;  %vm177_vm6 = vcmp.eq.s32.totalorder %v9771_v5, %v6332_v7  ;;  %v9988_v37 = vld [vmem:[%s11700_s0 + $0x4] ss:$0 sm:$0xff]  ;;  %v10008_v39 = vld [vmem:[%s11701_s1 + $0x68] sm:$0xff]  ;;  %v10014_v40 = vld [vmem:[%s11701_s1 + $0x70] sm:$0xff] }
  0x84   :  { %vm8259_vm4 = vmpackc.low %vm174_vm1, %vm173_vm0  ;;  %vm178_vm7 = vcmp.eq.s32.totalorder %v9774_v6, %v6332_v7  ;;  %vm179_vm9 = vcmp.eq.s32.totalorder %v9794_v10, %v6332_v7  ;;  %vm180_vm10 = vcmp.eq.s32.totalorder %v9797_v11, %v6332_v7  ;;  %v9804_v12 = vadd.s32 64, %v9759_v1  ;;  %v10034_v41 = vld [vmem:[%s11701_s1 + $0x78] sm:$0xff]  ;;  %v6536_v43 = vld [vmem:[%s11700_s0 + $0x6] ss:$0 sm:$0xff] }
  0x85   :  { %8260 = vmatprep.subr.msk.bf16.mxu0 %vm8259_vm4, %v9591_v9  ;;  %vm8263_vm5 = vmpackc.low %vm176_vm3, %vm175_vm2  ;;  %v9807_v13 = vadd.s32 72, %v9759_v1  ;;  %v9814_v14 = vadd.s32 80, %v9759_v1  ;;  %v9817_v15 = vadd.s32 88, %v9759_v1  ;;  %v9824_v16 = vadd.s32 96, %v9759_v1  ;;  %v1911_v44 = vld [vmem:[#allocation3] sm:$0xff]  ;;  %v1912_v45 = vld [vmem:[#allocation3 + $0x8] sm:$0xff] }
  0x86   :  { %8262 = vmatpush3.bf16.msk.msra.mxu0 %vm8259_vm4, %v9591_v9  ;;  %vm8267_vm8 = vmpackc.low %vm178_vm7, %vm177_vm6  ;;  %vm181_vm12 = vcmp.eq.s32.totalorder %v9804_v12, %v6332_v7  ;;  %v9827_v17 = vadd.s32 104, %v9759_v1  ;;  %v9834_v18 = vadd.s32 112, %v9759_v1  ;;  %v9837_v19 = vadd.s32 120, %v9759_v1  ;;  %v1913_v47 = vld [vmem:[#allocation3 + $0x10] sm:$0xff]  ;;  %v1914_v48 = vld [vmem:[#allocation3 + $0x18] sm:$0xff] }
  0x87   :  { %8264 = vmatprep.subr.msk.bf16.mxu0 %vm8263_vm5, %v9591_v9  ;;  %vm8271_vm11 = vmpackc.low %vm180_vm10, %vm179_vm9  ;;  %vm182_vm13 = vcmp.eq.s32.totalorder %v9807_v13, %v6332_v7  ;;  %vm183_vm15 = vcmp.eq.s32.totalorder %v9814_v14, %v6332_v7  ;;  %vm184_vm0 = vcmp.eq.s32.totalorder %v9817_v15, %v6332_v7  ;;  %vm185_vm2 = vcmp.eq.s32.totalorder %v9824_v16, %v6332_v7  ;;  %v10173_v50 = vld [vmem:[%s11700_s0 + $0x1] ss:$0 sm:$0xff]  ;;  %v1896_v52 = vld [vmem:[%s11702_s2 + $0x8] sm:$0xff] }
  0x88   :  { %vm8275_vm14 = vmpackc.low %vm182_vm13, %vm181_vm12  ;;  %vm186_vm3 = vcmp.eq.s32.totalorder %v9827_v17, %v6332_v7  ;;  %vm188_vm6 = vcmp.eq.s32.totalorder %v9837_v19, %v6332_v7  ;;  %vm606_vm9 = vcmp.eq.s32.totalorder %v9762_v2, %v9847_v20  ;;  %vm608_vm12 = vcmp.eq.s32.totalorder %v9768_v4, %v9847_v20  ;;  %v10194_v51 = vld [vmem:[%s11702_s2] sm:$0xff]  ;;  %v1897_v53 = vld [vmem:[%s11702_s2 + $0x10] sm:$0xff] }
  0x89   :  { %vm8279_vm1 = vmpackc.low %vm184_vm0, %vm183_vm15  ;;  %vm610_vm15 = vcmp.eq.s32.totalorder %v9774_v6, %v9847_v20  ;;  %v8515_v46 = vpack.c.bf16 %v1912_v45, %v1911_v44  ;;  %v8519_v49 = vpack.c.bf16 %v1914_v48, %v1913_v47  ;;  %v1898_v54 = vld [vmem:[%s11702_s2 + $0x18] sm:$0xff]  ;;  %v1899_v55 = vld [vmem:[%s11702_s2 + $0x20] sm:$0xff] }
  0x8a   :  { %8266 = vmatpush3.bf16.msk.msra.mxu0 %vm8263_vm5, %v9591_v9  ;;  %vm8283_vm4 = vmpackc.low %vm186_vm3, %vm185_vm2  ;;  %vm187_vm5 = vcmp.eq.s32.totalorder %v9834_v18, %v6332_v7  ;;  %vm612_vm2 = vcmp.eq.s32.totalorder %v9797_v11, %v9847_v20  ;;  %v1900_v56 = vld [vmem:[%s11702_s2 + $0x28] sm:$0xff]  ;;  %v1901_v57 = vld [vmem:[%s11702_s2 + $0x30] sm:$0xff] }
  0x8b   :  { %8268 = vmatprep.subr.msk.bf16.mxu0 %vm8267_vm8, %v9591_v9  ;;  %vm8287_vm7 = vmpackc.low %vm188_vm6, %vm187_vm5  ;;  %vm614_vm5 = vcmp.eq.s32.totalorder %v9807_v13, %v9847_v20  ;;  %v1902_v58 = vld [vmem:[%s11702_s2 + $0x38] sm:$0xff]  ;;  %v1903_v59 = vld [vmem:[%s11702_s2 + $0x40] sm:$0xff] }
  0x8c   :  { %v1904_v60 = vld [vmem:[%s11702_s2 + $0x48] sm:$0xff]  ;;  %v1905_v61 = vld [vmem:[%s11702_s2 + $0x50] sm:$0xff]  ;;  %v1906_v62 = vld [vmem:[%s11702_s2 + $0x58] sm:$0xff] }
  0x8d   :  { %v6434_v63 = vld [vmem:[%s11700_s0 + $0x3] ss:$0 sm:$0xff]  ;;  %v1908_v7 = vld [vmem:[%s11702_s2 + $0x68] sm:$0xff]  ;;  %v6502_v28 = vld [vmem:[%s11700_s0 + $0x5] ss:$0 sm:$0xff] }
  0x8e   :  { %8270 = vmatpush3.bf16.msk.msra.mxu0 %vm8267_vm8, %v9591_v9  ;;  %vm605_vm8 = vcmp.eq.s32.totalorder %v9759_v1, %v9847_v20  ;;  %v1907_v0 = vld [vmem:[%s11702_s2 + $0x60] sm:$0xff]  ;;  %v9364_v38 = vld [vmem:[%s11701_s1 + $0x38] sm:$0xff]  ;;  %v9366_v45 = vld [vmem:[%s11701_s1 + $0x48] sm:$0xff] }
  0x8f   :  { %8272 = vmatprep.subr.msk.bf16.mxu0 %vm8271_vm11, %v9591_v9  ;;  %vm8323_vm10 = vmpackc.low %vm606_vm9, %vm605_vm8  ;;  %vm616_vm8 = vcmp.eq.s32.totalorder %v9817_v15, %v9847_v20  ;;  %v10349_v25 = vld [vmem:[%s11701_s1] sm:$0xff]  ;;  %v9367_v47 = vld [vmem:[%s11701_s1 + $0x50] sm:$0xff] }
  0x90   :  { %v10405_v31 = vld [vmem:[%s11700_s0 + $0x7] ss:$0 sm:$0xff] }
  0x92   :  { %8274 = vmatpush3.bf16.msk.msra.mxu0 %vm8271_vm11, %v9591_v9  ;;  %vm607_vm11 = vcmp.eq.s32.totalorder %v9765_v3, %v9847_v20 }
  0x93   :  { %8276 = vmatprep.subr.msk.bf16.mxu0 %vm8275_vm14, %v9591_v9  ;;  %vm8327_vm13 = vmpackc.low %vm608_vm12, %vm607_vm11  ;;  %vm618_vm11 = vcmp.eq.s32.totalorder %v9827_v17, %v9847_v20 }
  0x96   :  { %8278 = vmatpush3.bf16.msk.msra.mxu0 %vm8275_vm14, %v9591_v9  ;;  %vm609_vm14 = vcmp.eq.s32.totalorder %v9771_v5, %v9847_v20 }
  0x97   :  { %8280 = vmatprep.subr.msk.bf16.mxu0 %vm8279_vm1, %v9591_v9  ;;  %vm9889_vm0 = vmpackc.low %vm610_vm15, %vm609_vm14  ;;  %vm620_vm14 = vcmp.eq.s32.totalorder %v9837_v19, %v9847_v20 }
  0x9a   :  { %8282 = vmatpush3.bf16.msk.msra.mxu0 %vm8279_vm1, %v9591_v9  ;;  %vm611_vm1 = vcmp.eq.s32.totalorder %v9794_v10, %v9847_v20 }
  0x9b   :  { %8284 = vmatprep.subr.msk.bf16.mxu0 %vm8283_vm4, %v9591_v9  ;;  %vm9911_vm3 = vmpackc.low %vm612_vm2, %vm611_vm1  ;;  %vm1038_vm1 = vcmp.eq.s32.totalorder %v9762_v2, %v9988_v37  ;;  %vm1039_vm2 = vcmp.eq.s32.totalorder %v9765_v3, %v9988_v37 }
  0x9e   :  { %8286 = vmatpush3.bf16.msk.msra.mxu0 %vm8283_vm4, %v9591_v9  ;;  %vm613_vm4 = vcmp.eq.s32.totalorder %v9804_v12, %v9847_v20 }
  0x9f   :  { %8288 = vmatprep.subr.msk.bf16.mxu0 %vm8287_vm7, %v9591_v9  ;;  %vm9937_vm6 = vmpackc.low %vm614_vm5, %vm613_vm4 }
  0xa2   :  { %8290 = vmatpush3.bf16.msk.msra.mxu0 %vm8287_vm7, %v9591_v9  ;;  %vm615_vm7 = vcmp.eq.s32.totalorder %v9814_v14, %v9847_v20 }
  0xa3   :  { %8324 = vmatprep.subr.msk.bf16.mxu0 %vm8323_vm10, %v9591_v9  ;;  %vm9963_vm9 = vmpackc.low %vm616_vm8, %vm615_vm7  ;;  %vm1042_vm7 = vcmp.eq.s32.totalorder %v9774_v6, %v9988_v37 }
  0xa5   :  { %7530 = vmatmul.mubr.f32.vlgmr.msra.gmra.mrb[0].mxu0 %v9864_v21 }
  0xa6   :  { %8326 = vmatpush3.bf16.msk.msra.mxu0 %vm8323_vm10, %v9591_v9  ;;  %7532 = vmatprep.mubr.f32.mxu0 %v9869_v22  ;;  %vm617_vm10 = vcmp.eq.s32.totalorder %v9824_v16, %v9847_v20 }
  0xa7   :  { %8328 = vmatprep.subr.msk.bf16.mxu0 %vm8327_vm13, %v9591_v9  ;;  %vm9994_vm12 = vmpackc.low %vm618_vm11, %vm617_vm10  ;;  %vm1044_vm10 = vcmp.eq.s32.totalorder %v9797_v11, %v9988_v37 }
  0xa9   :  { %7533 = vmatmul.mubr.f32.gmra.mrb[2].mxu0 %v9879_v23 }
  0xaa   :  { %8330 = vmatpush3.bf16.msk.msra.mxu0 %vm8327_vm13, %v9591_v9  ;;  %7535 = vmatprep.mubr.f32.mxu0 %v9885_v24  ;;  %vm619_vm13 = vcmp.eq.s32.totalorder %v9834_v18, %v9847_v20  ;;  %v1910_v20 = vld [vmem:[%s11702_s2 + $0x78] sm:$0xff] }
  0xab   :  { %8332 = vmatprep.subr.msk.bf16.mxu0 %vm9889_vm0, %v9591_v9  ;;  %vm8351_vm15 = vmpackc.low %vm620_vm14, %vm619_vm13  ;;  %vm1046_vm13 = vcmp.eq.s32.totalorder %v9807_v13, %v9988_v37 }
  0xad   :  { %7536 = vmatmul.mubr.f32.gmra.mrb[4].mxu0 %v9901_v26 }
  0xae   :  { %8334 = vmatpush3.bf16.msk.msra.mxu0 %vm9889_vm0, %v9591_v9  ;;  %7538 = vmatprep.mubr.f32.mxu0 %v9907_v27  ;;  %vm1037_vm0 = vcmp.eq.s32.totalorder %v9759_v1, %v9988_v37 }
  0xaf   :  { %8336 = vmatprep.subr.msk.bf16.mxu0 %vm9911_vm3, %v9591_v9  ;;  %vm8387_vm4 = vmpackc.low %vm1038_vm1, %vm1037_vm0  ;;  %vm1048_vm0 = vcmp.eq.s32.totalorder %v9817_v15, %v9988_v37 }
  0xb1   :  { %7539 = vmatmul.mubr.f32.gmra.mrb[6].mxu0 %v9925_v29 }
  0xb2   :  { %8338 = vmatpush3.bf16.msk.msra.mxu0 %vm9911_vm3, %v9591_v9  ;;  %7541 = vmatprep.mubr.f32.mxu0 %v9931_v30  ;;  %vm1040_vm3 = vcmp.eq.s32.totalorder %v9768_v4, %v9988_v37 }
  0xb3   :  { %8340 = vmatprep.subr.msk.bf16.mxu0 %vm9937_vm6, %v9591_v9  ;;  %vm10041_vm5 = vmpackc.low %vm1040_vm3, %vm1039_vm2  ;;  %vm1049_vm2 = vcmp.eq.s32.totalorder %v9824_v16, %v9988_v37  ;;  %vm1050_vm3 = vcmp.eq.s32.totalorder %v9827_v17, %v9988_v37 }
  0xb5   :  { %7542 = vmatmul.mubr.f32.gmra.mrb[8].mxu0 %v9951_v32 }
  0xb6   :  { %8342 = vmatpush3.bf16.msk.msra.mxu0 %vm9937_vm6, %v9591_v9  ;;  %7544 = vmatprep.mubr.f32.mxu0 %v9957_v33  ;;  %vm1041_vm6 = vcmp.eq.s32.totalorder %v9771_v5, %v9988_v37 }
  0xb7   :  { %8344 = vmatprep.subr.msk.bf16.mxu0 %vm9963_vm9, %v9591_v9  ;;  %vm8395_vm8 = vmpackc.low %vm1042_vm7, %vm1041_vm6  ;;  %vm1052_vm6 = vcmp.eq.s32.totalorder %v9837_v19, %v9988_v37 }
  0xb9   :  { %7545 = vmatmul.mubr.f32.gmra.mrb[10].mxu0 %v9977_v35 }
  0xba   :  { %8346 = vmatpush3.bf16.msk.msra.mxu0 %vm9963_vm9, %v9591_v9  ;;  %7547 = vmatprep.mubr.f32.mxu0 %v9983_v36  ;;  %vm1043_vm9 = vcmp.eq.s32.totalorder %v9794_v10, %v9988_v37 }
  0xbb   :  { %8348 = vmatprep.subr.msk.bf16.mxu0 %vm9994_vm12, %v9591_v9  ;;  %vm8399_vm11 = vmpackc.low %vm1044_vm10, %vm1043_vm9  ;;  %vm1470_vm9 = vcmp.eq.s32.totalorder %v9762_v2, %v6536_v43 }
  0xbd   :  { %7548 = vmatmul.mubr.f32.gmra.mrb[12].mxu0 %v10008_v39 }
  0xbe   :  { %8350 = vmatpush3.bf16.msk.msra.mxu0 %vm9994_vm12, %v9591_v9  ;;  %7550 = vmatprep.mubr.f32.mxu0 %v10014_v40  ;;  %vm1045_vm12 = vcmp.eq.s32.totalorder %v9804_v12, %v9988_v37 }
  0xbf   :  { %8352 = vmatprep.subr.msk.bf16.mxu0 %vm8351_vm15, %v9591_v9  ;;  %vm8403_vm14 = vmpackc.low %vm1046_vm13, %vm1045_vm12  ;;  %vm1472_vm12 = vcmp.eq.s32.totalorder %v9768_v4, %v6536_v43 }
  0xc1   :  { %7551 = vmatmul.mubr.f32.gmra.mrb[14].mxu0 %v10034_v41 }
  0xc2   :  { %8354 = vmatpush3.bf16.msk.msra.mxu0 %vm8351_vm15, %v9591_v9  ;;  %7641 = vmatprep.mubr.f32.mxu0 %v9782_v8  ;;  %vm1047_vm15 = vcmp.eq.s32.totalorder %v9814_v14, %v9988_v37 }
  0xc3   :  { %8388 = vmatprep.subr.msk.bf16.mxu0 %vm8387_vm4, %v9591_v9  ;;  %vm8407_vm1 = vmpackc.low %vm1048_vm0, %vm1047_vm15  ;;  %vm1474_vm15 = vcmp.eq.s32.totalorder %v9774_v6, %v6536_v43 }
  0xc5   :  { %7642 = vmatmul.mubr.f32.vlgmr.msra.gmra.mrb[16].mxu0 %v9864_v21 }
  0xc6   :  { %8390 = vmatpush3.bf16.msk.msra.mxu0 %vm8387_vm4, %v9591_v9  ;;  %7644 = vmatprep.mubr.f32.mxu0 %v9869_v22  ;;  %vm8411_vm4 = vmpackc.low %vm1050_vm3, %vm1049_vm2  ;;  %vm1476_vm2 = vcmp.eq.s32.totalorder %v9797_v11, %v6536_v43 }
  0xc7   :  { %8392 = vmatprep.subr.msk.bf16.mxu0 %vm10041_vm5, %v9591_v9 }
  0xc9   :  { %7645 = vmatmul.mubr.f32.gmra.mrb[18].mxu0 %v9879_v23 }
  0xca   :  { %8394 = vmatpush3.bf16.msk.msra.mxu0 %vm10041_vm5, %v9591_v9  ;;  %7647 = vmatprep.mubr.f32.mxu0 %v9885_v24  ;;  %vm1051_vm5 = vcmp.eq.s32.totalorder %v9834_v18, %v9988_v37 }
  0xcb   :  { %8396 = vmatprep.subr.msk.bf16.mxu0 %vm8395_vm8, %v9591_v9  ;;  %vm8415_vm7 = vmpackc.low %vm1052_vm6, %vm1051_vm5  ;;  %vm1478_vm5 = vcmp.eq.s32.totalorder %v9807_v13, %v6536_v43 }
  0xcd   :  { %7648 = vmatmul.mubr.f32.gmra.mrb[20].mxu0 %v9901_v26 }
  0xce   :  { %8398 = vmatpush3.bf16.msk.msra.mxu0 %vm8395_vm8, %v9591_v9  ;;  %7650 = vmatprep.mubr.f32.mxu0 %v9907_v27  ;;  %vm1469_vm8 = vcmp.eq.s32.totalorder %v9759_v1, %v6536_v43 }
  0xcf   :  { %8400 = vmatprep.subr.msk.bf16.mxu0 %vm8399_vm11, %v9591_v9  ;;  %vm8451_vm10 = vmpackc.low %vm1470_vm9, %vm1469_vm8  ;;  %vm1480_vm8 = vcmp.eq.s32.totalorder %v9817_v15, %v6536_v43 }
  0xd1   :  { %7651 = vmatmul.mubr.f32.gmra.mrb[22].mxu0 %v9925_v29 }
  0xd2   :  { %8402 = vmatpush3.bf16.msk.msra.mxu0 %vm8399_vm11, %v9591_v9  ;;  %7653 = vmatprep.mubr.f32.mxu0 %v9931_v30  ;;  %vm1471_vm11 = vcmp.eq.s32.totalorder %v9765_v3, %v6536_v43 }
  0xd3   :  { %8404 = vmatprep.subr.msk.bf16.mxu0 %vm8403_vm14, %v9591_v9  ;;  %vm8455_vm13 = vmpackc.low %vm1472_vm12, %vm1471_vm11  ;;  %vm1482_vm11 = vcmp.eq.s32.totalorder %v9827_v17, %v6536_v43 }
  0xd5   :  { %7654 = vmatmul.mubr.f32.gmra.mrb[24].mxu0 %v9951_v32 }
  0xd6   :  { %8406 = vmatpush3.bf16.msk.msra.mxu0 %vm8403_vm14, %v9591_v9  ;;  %7656 = vmatprep.mubr.f32.mxu0 %v9957_v33  ;;  %vm1473_vm14 = vcmp.eq.s32.totalorder %v9771_v5, %v6536_v43 }
  0xd7   :  { %8408 = vmatprep.subr.msk.bf16.mxu0 %vm8407_vm1, %v9591_v9  ;;  %vm8459_vm0 = vmpackc.low %vm1474_vm15, %vm1473_vm14  ;;  %vm1484_vm14 = vcmp.eq.s32.totalorder %v9837_v19, %v6536_v43 }
  0xd9   :  { %7657 = vmatmul.mubr.f32.gmra.mrb[26].mxu0 %v9977_v35 }
  0xda   :  { %8410 = vmatpush3.bf16.msk.msra.mxu0 %vm8407_vm1, %v9591_v9  ;;  %7659 = vmatprep.mubr.f32.mxu0 %v9983_v36  ;;  %vm1475_vm1 = vcmp.eq.s32.totalorder %v9794_v10, %v6536_v43 }
  0xdb   :  { %8412 = vmatprep.subr.msk.bf16.mxu0 %vm8411_vm4, %v9591_v9  ;;  %vm8463_vm3 = vmpackc.low %vm1476_vm2, %vm1475_vm1  ;;  %vm390_vm1 = vcmp.eq.s32.totalorder %v9762_v2, %v10173_v50 }
  0xdd   :  { %7660 = vmatmul.mubr.f32.gmra.mrb[28].mxu0 %v10008_v39 }
  0xde   :  { %8414 = vmatpush3.bf16.msk.msra.mxu0 %vm8411_vm4, %v9591_v9  ;;  %7662 = vmatprep.mubr.f32.mxu0 %v10014_v40  ;;  %vm1477_vm4 = vcmp.eq.s32.totalorder %v9804_v12, %v6536_v43 }
  0xdf   :  { %8416 = vmatprep.subr.msk.bf16.mxu0 %vm8415_vm7, %v9591_v9  ;;  %vm8467_vm6 = vmpackc.low %vm1478_vm5, %vm1477_vm4  ;;  %vm392_vm4 = vcmp.eq.s32.totalorder %v9768_v4, %v10173_v50 }
  0xe1   :  { %7663 = vmatmul.mubr.f32.gmra.mrb[30].mxu0 %v10034_v41 }
  0xe2   :  { %8418 = vmatpush3.bf16.msk.msra.mxu0 %vm8415_vm7, %v9591_v9  ;;  %7753 = vmatprep.mubr.f32.mxu0 %v9782_v8  ;;  %vm1479_vm7 = vcmp.eq.s32.totalorder %v9814_v14, %v6536_v43 }
  0xe3   :  { %8452 = vmatprep.subr.msk.bf16.mxu0 %vm8451_vm10, %v9591_v9  ;;  %vm8471_vm9 = vmpackc.low %vm1480_vm8, %vm1479_vm7  ;;  %vm393_vm7 = vcmp.eq.s32.totalorder %v9771_v5, %v10173_v50  ;;  %vm394_vm8 = vcmp.eq.s32.totalorder %v9774_v6, %v10173_v50 }
  0xe5   :  { %7754 = vmatmul.mubr.f32.vlgmr.msra.gmra.mrb[32].mxu0 %v9864_v21 }
  0xe6   :  { %8454 = vmatpush3.bf16.msk.msra.mxu0 %vm8451_vm10, %v9591_v9  ;;  %7756 = vmatprep.mubr.f32.mxu0 %v9869_v22  ;;  %vm1481_vm10 = vcmp.eq.s32.totalorder %v9824_v16, %v6536_v43 }
  0xe7   :  { %8456 = vmatprep.subr.msk.bf16.mxu0 %vm8455_vm13, %v9591_v9  ;;  %vm8475_vm12 = vmpackc.low %vm1482_vm11, %vm1481_vm10  ;;  %vm395_vm10 = vcmp.eq.s32.totalorder %v9794_v10, %v10173_v50  ;;  %vm396_vm11 = vcmp.eq.s32.totalorder %v9797_v11, %v10173_v50 }
  0xe9   :  { %7757 = vmatmul.mubr.f32.gmra.mrb[34].mxu0 %v9879_v23 }
  0xea   :  { %8458 = vmatpush3.bf16.msk.msra.mxu0 %vm8455_vm13, %v9591_v9  ;;  %7759 = vmatprep.mubr.f32.mxu0 %v9885_v24  ;;  %vm1483_vm13 = vcmp.eq.s32.totalorder %v9834_v18, %v6536_v43  ;;  %v9365_v43 = vld [vmem:[%s11701_s1 + $0x40] sm:$0xff] }
  0xeb   :  { %8460 = vmatprep.subr.msk.bf16.mxu0 %vm8459_vm0, %v9591_v9  ;;  %vm8479_vm15 = vmpackc.low %vm1484_vm14, %vm1483_vm13  ;;  %vm397_vm13 = vcmp.eq.s32.totalorder %v9804_v12, %v10173_v50  ;;  %vm398_vm14 = vcmp.eq.s32.totalorder %v9807_v13, %v10173_v50 }
  0xed   :  { %7760 = vmatmul.mubr.f32.gmra.mrb[36].mxu0 %v9901_v26 }
  0xee   :  { %8462 = vmatpush3.bf16.msk.msra.mxu0 %vm8459_vm0, %v9591_v9  ;;  %7762 = vmatprep.mubr.f32.mxu0 %v9907_v27  ;;  %vm389_vm0 = vcmp.eq.s32.totalorder %v9759_v1, %v10173_v50 }
  0xef   :  { %8464 = vmatprep.subr.msk.bf16.mxu0 %vm8463_vm3, %v9591_v9  ;;  %vm8291_vm2 = vmpackc.low %vm390_vm1, %vm389_vm0  ;;  %vm399_vm0 = vcmp.eq.s32.totalorder %v9814_v14, %v10173_v50  ;;  %vm400_vm1 = vcmp.eq.s32.totalorder %v9817_v15, %v10173_v50 }
  0xf0   :  { %8292 = vmatprep.subr.msk.bf16.mxu1 %vm8291_vm2, %v9591_v9 }
  0xf1   :  { %7763 = vmatmul.mubr.f32.gmra.mrb[38].mxu0 %v9925_v29  ;;  %8294 = vmatpush3.bf16.msk.msra.mxu1 %vm8291_vm2, %v9591_v9  ;;  %vm8311_vm2 = vmpackc.low %vm400_vm1, %vm399_vm0  ;;  %vm825_vm0 = vcmp.eq.s32.totalorder %v9771_v5, %v6434_v63  ;;  %vm826_vm1 = vcmp.eq.s32.totalorder %v9774_v6, %v6434_v63 }
  0xf2   :  { %8466 = vmatpush3.bf16.msk.msra.mxu0 %vm8463_vm3, %v9591_v9  ;;  %7765 = vmatprep.mubr.f32.mxu0 %v9931_v30  ;;  %vm391_vm3 = vcmp.eq.s32.totalorder %v9765_v3, %v10173_v50 }
  0xf3   :  { %8468 = vmatprep.subr.msk.bf16.mxu0 %vm8467_vm6, %v9591_v9  ;;  %vm8295_vm5 = vmpackc.low %vm392_vm4, %vm391_vm3  ;;  %vm401_vm3 = vcmp.eq.s32.totalorder %v9824_v16, %v10173_v50  ;;  %vm402_vm4 = vcmp.eq.s32.totalorder %v9827_v17, %v10173_v50 }
  0xf4   :  { %8296 = vmatprep.subr.msk.bf16.mxu1 %vm8295_vm5, %v9591_v9 }
  0xf5   :  { %7766 = vmatmul.mubr.f32.gmra.mrb[40].mxu0 %v9951_v32  ;;  %8298 = vmatpush3.bf16.msk.msra.mxu1 %vm8295_vm5, %v9591_v9  ;;  %vm8315_vm5 = vmpackc.low %vm402_vm4, %vm401_vm3  ;;  %vm827_vm3 = vcmp.eq.s32.totalorder %v9794_v10, %v6434_v63  ;;  %vm828_vm4 = vcmp.eq.s32.totalorder %v9797_v11, %v6434_v63 }
  0xf6   :  { %8470 = vmatpush3.bf16.msk.msra.mxu0 %vm8467_vm6, %v9591_v9  ;;  %7768 = vmatprep.mubr.f32.mxu0 %v9957_v33  ;;  %vm1935_vm6 = vcmask 261120  }
  0xf7   :  { %8472 = vmatprep.subr.msk.bf16.mxu0 %vm8471_vm9, %v9591_v9 }
  0xf9   :  { %7769 = vmatmul.mubr.f32.gmra.mrb[42].mxu0 %v9977_v35 }
  0xfa   :  { %8474 = vmatpush3.bf16.msk.msra.mxu0 %vm8471_vm9, %v9591_v9  ;;  %7771 = vmatprep.mubr.f32.mxu0 %v9983_v36  ;;  %vm8299_vm9 = vmpackc.low %vm394_vm8, %vm393_vm7  ;;  %vm403_vm7 = vcmp.eq.s32.totalorder %v9834_v18, %v10173_v50  ;;  %vm404_vm8 = vcmp.eq.s32.totalorder %v9837_v19, %v10173_v50 }
  0xfb   :  { %8476 = vmatprep.subr.msk.bf16.mxu0 %vm8475_vm12, %v9591_v9  ;;  %8300 = vmatprep.subr.msk.bf16.mxu1 %vm8299_vm9, %v9591_v9 }
  0xfc   :  { %8302 = vmatpush3.bf16.msk.msra.mxu1 %vm8299_vm9, %v9591_v9  ;;  %vm8319_vm9 = vmpackc.low %vm404_vm8, %vm403_vm7  ;;  %vm829_vm7 = vcmp.eq.s32.totalorder %v9804_v12, %v6434_v63  ;;  %vm830_vm8 = vcmp.eq.s32.totalorder %v9807_v13, %v6434_v63 }
  0xfd   :  { %7772 = vmatmul.mubr.f32.gmra.mrb[44].mxu0 %v10008_v39 }
  0xfe   :  { %8478 = vmatpush3.bf16.msk.msra.mxu0 %vm8475_vm12, %v9591_v9  ;;  %7774 = vmatprep.mubr.f32.mxu0 %v10014_v40  ;;  %vm8303_vm12 = vmpackc.low %vm396_vm11, %vm395_vm10  ;;  %vm821_vm10 = vcmp.eq.s32.totalorder %v9759_v1, %v6434_v63  ;;  %vm822_vm11 = vcmp.eq.s32.totalorder %v9762_v2, %v6434_v63 }
  0xff   :  { %8480 = vmatprep.subr.msk.bf16.mxu0 %vm8479_vm15, %v9591_v9  ;;  %8304 = vmatprep.subr.msk.bf16.mxu1 %vm8303_vm12, %v9591_v9 }
 0x100   :  { %8306 = vmatpush3.bf16.msk.msra.mxu1 %vm8303_vm12, %v9591_v9  ;;  %vm8355_vm12 = vmpackc.low %vm822_vm11, %vm821_vm10  ;;  %vm831_vm10 = vcmp.eq.s32.totalorder %v9814_v14, %v6434_v63  ;;  %vm832_vm11 = vcmp.eq.s32.totalorder %v9817_v15, %v6434_v63 }
 0x101   :  { %7775 = vmatmul.mubr.f32.gmra.mrb[46].mxu0 %v10034_v41 }
 0x102   :  { %8482 = vmatpush3.bf16.msk.msra.mxu0 %vm8479_vm15, %v9591_v9  ;;  %7865 = vmatprep.mubr.f32.mxu0 %v9782_v8  ;;  %vm8307_vm15 = vmpackc.low %vm398_vm14, %vm397_vm13  ;;  %v1909_v8 = vld [vmem:[%s11702_s2 + $0x70] sm:$0xff]  ;;  %vm823_vm13 = vcmp.eq.s32.totalorder %v9765_v3, %v6434_v63  ;;  %vm824_vm14 = vcmp.eq.s32.totalorder %v9768_v4, %v6434_v63 }
 0x103   :  { %8516 = vmatprep.subr.bf16.mxu0 %v8515_v46  ;;  %8308 = vmatprep.subr.msk.bf16.mxu1 %vm8307_vm15, %v9591_v9 }
 0x104   :  { %8310 = vmatpush3.bf16.msk.msra.mxu1 %vm8307_vm15, %v9591_v9  ;;  %vm8359_vm15 = vmpackc.low %vm824_vm14, %vm823_vm13  ;;  %vm833_vm13 = vcmp.eq.s32.totalorder %v9824_v16, %v6434_v63  ;;  %vm834_vm14 = vcmp.eq.s32.totalorder %v9827_v17, %v6434_v63 }
 0x105   :  { %7866 = vmatmul.mubr.f32.vlgmr.msra.gmra.mrb[48].mxu0 %v9864_v21  ;;  %8312 = vmatprep.subr.msk.bf16.mxu1 %vm8311_vm2, %v9591_v9 }
 0x106   :  { %7868 = vmatprep.mubr.f32.mxu0 %v9869_v22  ;;  %8518 = vmatpush3.bf16.msra.mxu0 %v8515_v46 }
 0x107   :  { %8520 = vmatprep.subr.bf16.mxu0 %v8519_v49 }
 0x108   :  { %8314 = vmatpush3.bf16.msk.msra.mxu1 %vm8311_vm2, %v9591_v9  ;;  %vm8363_vm2 = vmpackc.low %vm826_vm1, %vm825_vm0  ;;  %vm835_vm0 = vcmp.eq.s32.totalorder %v9834_v18, %v6434_v63  ;;  %vm836_vm1 = vcmp.eq.s32.totalorder %v9837_v19, %v6434_v63 }
 0x109   :  { %7869 = vmatmul.mubr.f32.gmra.mrb[50].mxu0 %v9879_v23  ;;  %8316 = vmatprep.subr.msk.bf16.mxu1 %vm8315_vm5, %v9591_v9 }
 0x10a   :  { %7871 = vmatprep.mubr.f32.mxu0 %v9885_v24  ;;  %8522 = vmatpush3.bf16.msra.mxu0 %v8519_v49  ;;  %v9368_v49 = vld [vmem:[%s11701_s1 + $0x58] sm:$0xff] }
 0x10c   :  { %8318 = vmatpush3.bf16.msk.msra.mxu1 %vm8315_vm5, %v9591_v9  ;;  %vm8367_vm5 = vmpackc.low %vm828_vm4, %vm827_vm3  ;;  %vm1253_vm3 = vcmp.eq.s32.totalorder %v9759_v1, %v6502_v28  ;;  %vm1254_vm4 = vcmp.eq.s32.totalorder %v9762_v2, %v6502_v28 }
 0x10d   :  { %7872 = vmatmul.mubr.f32.gmra.mrb[52].mxu0 %v9901_v26  ;;  %8320 = vmatprep.subr.msk.bf16.mxu1 %vm8319_vm9, %v9591_v9 }
 0x10e   :  { %7874 = vmatprep.mubr.f32.mxu0 %v9907_v27 }
 0x110   :  { %8322 = vmatpush3.bf16.msk.msra.mxu1 %vm8319_vm9, %v9591_v9  ;;  %vm8371_vm9 = vmpackc.low %vm830_vm8, %vm829_vm7  ;;  %vm1255_vm7 = vcmp.eq.s32.totalorder %v9765_v3, %v6502_v28  ;;  %vm1256_vm8 = vcmp.eq.s32.totalorder %v9768_v4, %v6502_v28 }
 0x111   :  { %7875 = vmatmul.mubr.f32.gmra.mrb[54].mxu0 %v9925_v29  ;;  %8356 = vmatprep.subr.msk.bf16.mxu1 %vm8355_vm12, %v9591_v9 }
 0x112   :  { %7877 = vmatprep.mubr.f32.mxu0 %v9931_v30 }
 0x113   :  { %7586 = vmatmul.mubr.f32.vlgmr.msra.gmra.mrb[0].mxu1 %v9864_v21 }
 0x114   :  { %8358 = vmatpush3.bf16.msk.msra.mxu1 %vm8355_vm12, %v9591_v9  ;;  %7588 = vmatprep.mubr.f32.mxu1 %v9869_v22  ;;  %vm8375_vm12 = vmpackc.low %vm832_vm11, %vm831_vm10  ;;  %vm1257_vm10 = vcmp.eq.s32.totalorder %v9771_v5, %v6502_v28  ;;  %vm1258_vm11 = vcmp.eq.s32.totalorder %v9774_v6, %v6502_v28 }
 0x115   :  { %7878 = vmatmul.mubr.f32.gmra.mrb[56].mxu0 %v9951_v32  ;;  %8360 = vmatprep.subr.msk.bf16.mxu1 %vm8359_vm15, %v9591_v9 }
 0x116   :  { %7880 = vmatprep.mubr.f32.mxu0 %v9957_v33 }
 0x117   :  { %7589 = vmatmul.mubr.f32.gmra.mrb[2].mxu1 %v9879_v23 }
 0x118   :  { %8362 = vmatpush3.bf16.msk.msra.mxu1 %vm8359_vm15, %v9591_v9  ;;  %7591 = vmatprep.mubr.f32.mxu1 %v9885_v24  ;;  %vm8379_vm15 = vmpackc.low %vm834_vm14, %vm833_vm13  ;;  %vm1259_vm13 = vcmp.eq.s32.totalorder %v9794_v10, %v6502_v28  ;;  %vm1260_vm14 = vcmp.eq.s32.totalorder %v9797_v11, %v6502_v28 }
 0x119   :  { %7881 = vmatmul.mubr.f32.gmra.mrb[58].mxu0 %v9977_v35  ;;  %8364 = vmatprep.subr.msk.bf16.mxu1 %vm8363_vm2, %v9591_v9 }
 0x11a   :  { %7883 = vmatprep.mubr.f32.mxu0 %v9983_v36 }
 0x11b   :  { %7592 = vmatmul.mubr.f32.gmra.mrb[4].mxu1 %v9901_v26 }
 0x11c   :  { %7594 = vmatprep.mubr.f32.mxu1 %v9907_v27  ;;  %8366 = vmatpush3.bf16.msk.msra.mxu1 %vm8363_vm2, %v9591_v9  ;;  %vm8383_vm2 = vmpackc.low %vm836_vm1, %vm835_vm0  ;;  %vm1261_vm0 = vcmp.eq.s32.totalorder %v9804_v12, %v6502_v28  ;;  %vm1262_vm1 = vcmp.eq.s32.totalorder %v9807_v13, %v6502_v28 }
 0x11d   :  { %7884 = vmatmul.mubr.f32.gmra.mrb[60].mxu0 %v10008_v39  ;;  %8368 = vmatprep.subr.msk.bf16.mxu1 %vm8367_vm5, %v9591_v9 }
 0x11e   :  { %7886 = vmatprep.mubr.f32.mxu0 %v10014_v40 }
 0x11f   :  { %7595 = vmatmul.mubr.f32.gmra.mrb[6].mxu1 %v9925_v29 }
 0x120   :  { %7597 = vmatprep.mubr.f32.mxu1 %v9931_v30  ;;  %8370 = vmatpush3.bf16.msk.msra.mxu1 %vm8367_vm5, %v9591_v9  ;;  %vm8419_vm5 = vmpackc.low %vm1254_vm4, %vm1253_vm3  ;;  %vm1263_vm3 = vcmp.eq.s32.totalorder %v9814_v14, %v6502_v28  ;;  %vm1264_vm4 = vcmp.eq.s32.totalorder %v9817_v15, %v6502_v28 }
 0x121   :  { %7887 = vmatmul.mubr.f32.gmra.mrb[62].mxu0 %v10034_v41  ;;  %8372 = vmatprep.subr.msk.bf16.mxu1 %vm8371_vm9, %v9591_v9 }
 0x122   :  { %7953 = vmatprep.mubr.msk.f32.mxu0 %vm1935_vm6, %v10194_v51 }
 0x123   :  { %7598 = vmatmul.mubr.f32.gmra.mrb[8].mxu1 %v9951_v32 }
 0x124   :  { %7600 = vmatprep.mubr.f32.mxu1 %v9957_v33  ;;  %8374 = vmatpush3.bf16.msk.msra.mxu1 %vm8371_vm9, %v9591_v9  ;;  %vm8423_vm9 = vmpackc.low %vm1256_vm8, %vm1255_vm7  ;;  %vm1265_vm7 = vcmp.eq.s32.totalorder %v9824_v16, %v6502_v28  ;;  %vm1266_vm8 = vcmp.eq.s32.totalorder %v9827_v17, %v6502_v28 }
 0x125   :  { %7954 = vmatmul.mubr.msk.f32.vlgmr.msra.gmra.mrb[64].mxu0 %vm1935_vm6, %v1896_v52  ;;  %8376 = vmatprep.subr.msk.bf16.mxu1 %vm8375_vm12, %v9591_v9  ;;  %v9369_v52 = vld [vmem:[%s11701_s1 + $0x60] sm:$0xff] }
 0x126   :  { %7956 = vmatprep.mubr.msk.f32.mxu0 %vm1935_vm6, %v1897_v53 }
 0x127   :  { %7601 = vmatmul.mubr.f32.gmra.mrb[10].mxu1 %v9977_v35 }
 0x128   :  { %7603 = vmatprep.mubr.f32.mxu1 %v9983_v36  ;;  %8378 = vmatpush3.bf16.msk.msra.mxu1 %vm8375_vm12, %v9591_v9  ;;  %vm8427_vm12 = vmpackc.low %vm1258_vm11, %vm1257_vm10  ;;  %vm1267_vm10 = vcmp.eq.s32.totalorder %v9834_v18, %v6502_v28  ;;  %vm1268_vm11 = vcmp.eq.s32.totalorder %v9837_v19, %v6502_v28 }
 0x129   :  { %7957 = vmatmul.mubr.msk.f32.gmra.mrb[66].mxu0 %vm1935_vm6, %v1898_v54  ;;  %8380 = vmatprep.subr.msk.bf16.mxu1 %vm8379_vm15, %v9591_v9 }
 0x12a   :  { %7959 = vmatprep.mubr.msk.f32.mxu0 %vm1935_vm6, %v1899_v55 }
 0x12b   :  { %7604 = vmatmul.mubr.f32.gmra.mrb[12].mxu1 %v10008_v39 }
 0x12c   :  { %7606 = vmatprep.mubr.f32.mxu1 %v10014_v40  ;;  %8382 = vmatpush3.bf16.msk.msra.mxu1 %vm8379_vm15, %v9591_v9  ;;  %vm8431_vm15 = vmpackc.low %vm1260_vm14, %vm1259_vm13  ;;  %vm366_vm13 = vcmask 523264   ;;  %vm1685_vm14 = vcmp.eq.s32.totalorder %v9759_v1, %v10405_v31 }
 0x12d   :  { %7960 = vmatmul.mubr.msk.f32.gmra.mrb[68].mxu0 %vm1935_vm6, %v1900_v56  ;;  %8384 = vmatprep.subr.msk.bf16.mxu1 %vm8383_vm2, %v9591_v9 }
 0x12e   :  { %7962 = vmatprep.mubr.msk.f32.mxu0 %vm1935_vm6, %v1901_v57 }
 0x12f   :  { %7607 = vmatmul.mubr.f32.gmra.mrb[14].mxu1 %v10034_v41 }
 0x130   :  { %7697 = vmatprep.mubr.f32.mxu1 %v10349_v25  ;;  %8386 = vmatpush3.bf16.msk.msra.mxu1 %vm8383_vm2, %v9591_v9  ;;  %vm8435_vm2 = vmpackc.low %vm1262_vm1, %vm1261_vm0  ;;  %vm1687_vm1 = vcmp.eq.s32.totalorder %v9765_v3, %v10405_v31 }
 0x131   :  { %7963 = vmatmul.mubr.msk.f32.gmra.mrb[70].mxu0 %vm1935_vm6, %v1902_v58  ;;  %8420 = vmatprep.subr.msk.bf16.mxu1 %vm8419_vm5, %v9591_v9 }
 0x132   :  { %7965 = vmatprep.mubr.msk.f32.mxu0 %vm1935_vm6, %v1903_v59 }
 0x133   :  { %7698 = vmatmul.mubr.f32.vlgmr.msra.gmra.mrb[16].mxu1 %v9864_v21 }
 0x134   :  { %8422 = vmatpush3.bf16.msk.msra.mxu1 %vm8419_vm5, %v9591_v9  ;;  %7700 = vmatprep.mubr.f32.mxu1 %v9869_v22  ;;  %vm8439_vm5 = vmpackc.low %vm1264_vm4, %vm1263_vm3  ;;  %vm1689_vm4 = vcmp.eq.s32.totalorder %v9771_v5, %v10405_v31 }
 0x135   :  { %7966 = vmatmul.mubr.msk.f32.gmra.mrb[72].mxu0 %vm1935_vm6, %v1904_v60  ;;  %8424 = vmatprep.subr.msk.bf16.mxu1 %vm8423_vm9, %v9591_v9 }
 0x136   :  { %7968 = vmatprep.mubr.msk.f32.mxu0 %vm1935_vm6, %v1905_v61 }
 0x137   :  { %7701 = vmatmul.mubr.f32.gmra.mrb[18].mxu1 %v9879_v23 }
 0x138   :  { %8426 = vmatpush3.bf16.msk.msra.mxu1 %vm8423_vm9, %v9591_v9  ;;  %7703 = vmatprep.mubr.f32.mxu1 %v9885_v24  ;;  %vm8443_vm9 = vmpackc.low %vm1266_vm8, %vm1265_vm7  ;;  %vm1691_vm8 = vcmp.eq.s32.totalorder %v9794_v10, %v10405_v31 }
 0x139   :  { %7969 = vmatmul.mubr.msk.f32.gmra.mrb[74].mxu0 %vm1935_vm6, %v1906_v62  ;;  %8428 = vmatprep.subr.msk.bf16.mxu1 %vm8427_vm12, %v9591_v9 }
 0x13a   :  { %7971 = vmatprep.mubr.msk.f32.mxu0 %vm1935_vm6, %v1907_v0 }
 0x13b   :  { %7704 = vmatmul.mubr.f32.gmra.mrb[20].mxu1 %v9901_v26 }
 0x13c   :  { %8430 = vmatpush3.bf16.msk.msra.mxu1 %vm8427_vm12, %v9591_v9  ;;  %7706 = vmatprep.mubr.f32.mxu1 %v9907_v27  ;;  %vm8447_vm12 = vmpackc.low %vm1268_vm11, %vm1267_vm10  ;;  %vm1693_vm11 = vcmp.eq.s32.totalorder %v9804_v12, %v10405_v31 }
 0x13d   :  { %7972 = vmatmul.mubr.msk.f32.gmra.mrb[76].mxu0 %vm1935_vm6, %v1908_v7  ;;  %8432 = vmatprep.subr.msk.bf16.mxu1 %vm8431_vm15, %v9591_v9 }
 0x13e   :  { %7974 = vmatprep.mubr.msk.f32.mxu0 %vm1935_vm6, %v1909_v8 }
 0x13f   :  { %7707 = vmatmul.mubr.f32.gmra.mrb[22].mxu1 %v9925_v29 }
 0x140   :  { %8434 = vmatpush3.bf16.msk.msra.mxu1 %vm8431_vm15, %v9591_v9  ;;  %7709 = vmatprep.mubr.f32.mxu1 %v9931_v30  ;;  %vm1686_vm15 = vcmp.eq.s32.totalorder %v9762_v2, %v10405_v31 }
 0x141   :  { %7975 = vmatmul.mubr.msk.f32.gmra.mrb[78].mxu0 %vm1935_vm6, %v1910_v20  ;;  %8436 = vmatprep.subr.msk.bf16.mxu1 %vm8435_vm2, %v9591_v9  ;;  %vm8483_vm0 = vmpackc.low %vm1686_vm15, %vm1685_vm14  ;;  %vm1695_vm15 = vcmp.eq.s32.totalorder %v9814_v14, %v10405_v31 }
 0x142   :  { %8017 = vmatprep.mubr.msk.f32.mxu0 %vm1935_vm6, %v10194_v51 }
 0x143   :  { %7710 = vmatmul.mubr.f32.gmra.mrb[24].mxu1 %v9951_v32 }
 0x144   :  { %8438 = vmatpush3.bf16.msk.msra.mxu1 %vm8435_vm2, %v9591_v9  ;;  %7712 = vmatprep.mubr.f32.mxu1 %v9957_v33  ;;  %vm1688_vm2 = vcmp.eq.s32.totalorder %v9768_v4, %v10405_v31 }
 0x145   :  { %8440 = vmatprep.subr.msk.bf16.mxu1 %vm8439_vm5, %v9591_v9  ;;  %vm8487_vm3 = vmpackc.low %vm1688_vm2, %vm1687_vm1  ;;  %vm1697_vm2 = vcmp.eq.s32.totalorder %v9824_v16, %v10405_v31 }
 0x147   :  { %7713 = vmatmul.mubr.f32.gmra.mrb[26].mxu1 %v9977_v35 }
 0x148   :  { %8442 = vmatpush3.bf16.msk.msra.mxu1 %vm8439_vm5, %v9591_v9  ;;  %7715 = vmatprep.mubr.f32.mxu1 %v9983_v36  ;;  %vm1690_vm5 = vcmp.eq.s32.totalorder %v9774_v6, %v10405_v31 }
 0x149   :  { %8444 = vmatprep.subr.msk.bf16.mxu1 %vm8443_vm9, %v9591_v9  ;;  %vm8491_vm7 = vmpackc.low %vm1690_vm5, %vm1689_vm4  ;;  %vm1699_vm5 = vcmp.eq.s32.totalorder %v9834_v18, %v10405_v31  ;;  %v9358_v18 = vld [vmem:[%s11701_s1 + $0x8] sm:$0xff] }
 0x14b   :  { %7716 = vmatmul.mubr.f32.gmra.mrb[28].mxu1 %v10008_v39 }
 0x14c   :  { %8446 = vmatpush3.bf16.msk.msra.mxu1 %vm8443_vm9, %v9591_v9  ;;  %7718 = vmatprep.mubr.f32.mxu1 %v10014_v40  ;;  %vm1692_vm9 = vcmp.eq.s32.totalorder %v9797_v11, %v10405_v31 }
 0x14d   :  { %8448 = vmatprep.subr.msk.bf16.mxu1 %vm8447_vm12, %v9591_v9  ;;  %vm8495_vm10 = vmpackc.low %vm1692_vm9, %vm1691_vm8 }
 0x14e   :  { %vm8580_vm9 = vmpackc.low %vm366_vm13, %vm366_vm13 }
 0x14f   :  { %7719 = vmatmul.mubr.f32.gmra.mrb[30].mxu1 %v10034_v41 }
 0x150   :  { %8450 = vmatpush3.bf16.msk.msra.mxu1 %vm8447_vm12, %v9591_v9  ;;  %7809 = vmatprep.mubr.f32.mxu1 %v10349_v25  ;;  %vm1694_vm12 = vcmp.eq.s32.totalorder %v9807_v13, %v10405_v31 }
 0x151   :  { %8484 = vmatprep.subr.msk.bf16.mxu1 %vm8483_vm0, %v9591_v9  ;;  %vm8499_vm14 = vmpackc.low %vm1694_vm12, %vm1693_vm11 }
 0x153   :  { %7810 = vmatmul.mubr.f32.vlgmr.msra.gmra.mrb[32].mxu1 %v9864_v21 }
 0x154   :  { %8486 = vmatpush3.bf16.msk.msra.mxu1 %vm8483_vm0, %v9591_v9  ;;  %7812 = vmatprep.mubr.f32.mxu1 %v9869_v22  ;;  %vm1696_vm0 = vcmp.eq.s32.totalorder %v9817_v15, %v10405_v31 }
 0x155   :  { %8488 = vmatprep.subr.msk.bf16.mxu1 %vm8487_vm3, %v9591_v9  ;;  %vm8503_vm1 = vmpackc.low %vm1696_vm0, %vm1695_vm15 }
 0x157   :  { %7813 = vmatmul.mubr.f32.gmra.mrb[34].mxu1 %v9879_v23 }
 0x158   :  { %8490 = vmatpush3.bf16.msk.msra.mxu1 %vm8487_vm3, %v9591_v9  ;;  %7815 = vmatprep.mubr.f32.mxu1 %v9885_v24  ;;  %vm1698_vm3 = vcmp.eq.s32.totalorder %v9827_v17, %v10405_v31  ;;  %v9359_v24 = vld [vmem:[%s11701_s1 + $0x10] sm:$0xff] }
 0x159   :  { %8492 = vmatprep.subr.msk.bf16.mxu1 %vm8491_vm7, %v9591_v9  ;;  %vm8507_vm4 = vmpackc.low %vm1698_vm3, %vm1697_vm2 }
 0x15b   :  { %7816 = vmatmul.mubr.f32.gmra.mrb[36].mxu1 %v9901_v26 }
 0x15c   :  { %8494 = vmatpush3.bf16.msk.msra.mxu1 %vm8491_vm7, %v9591_v9  ;;  %7818 = vmatprep.mubr.f32.mxu1 %v9907_v27  ;;  %vm1700_vm7 = vcmp.eq.s32.totalorder %v9837_v19, %v10405_v31 }
 0x15d   :  { %8496 = vmatprep.subr.msk.bf16.mxu1 %vm8495_vm10, %v9591_v9  ;;  %vm8511_vm8 = vmpackc.low %vm1700_vm7, %vm1699_vm5 }
 0x15f   :  { %7819 = vmatmul.mubr.f32.gmra.mrb[38].mxu1 %v9925_v29  ;;  %v9361_v29 = vld [vmem:[%s11701_s1 + $0x20] sm:$0xff] }
 0x160   :  { %8498 = vmatpush3.bf16.msk.msra.mxu1 %vm8495_vm10, %v9591_v9  ;;  %7821 = vmatprep.mubr.f32.mxu1 %v9931_v30 }
 0x161   :  { %8500 = vmatprep.subr.msk.bf16.mxu1 %vm8499_vm14, %v9591_v9 }
 0x163   :  { %7822 = vmatmul.mubr.f32.gmra.mrb[40].mxu1 %v9951_v32  ;;  %v9362_v32 = vld [vmem:[%s11701_s1 + $0x28] sm:$0xff] }
 0x164   :  { %7824 = vmatprep.mubr.f32.mxu1 %v9957_v33  ;;  %8502 = vmatpush3.bf16.msk.msra.mxu1 %vm8499_vm14, %v9591_v9 }
 0x165   :  { %8504 = vmatprep.subr.msk.bf16.mxu1 %vm8503_vm1, %v9591_v9 }
 0x167   :  { %7825 = vmatmul.mubr.f32.gmra.mrb[42].mxu1 %v9977_v35  ;;  %v9363_v35 = vld [vmem:[%s11701_s1 + $0x30] sm:$0xff] }
 0x168   :  { %7827 = vmatprep.mubr.f32.mxu1 %v9983_v36  ;;  %8506 = vmatpush3.bf16.msk.msra.mxu1 %vm8503_vm1, %v9591_v9 }
 0x169   :  { %8508 = vmatprep.subr.msk.bf16.mxu1 %vm8507_vm4, %v9591_v9 }
 0x16b   :  { %7828 = vmatmul.mubr.f32.gmra.mrb[44].mxu1 %v10008_v39 }
 0x16c   :  { %7830 = vmatprep.mubr.f32.mxu1 %v10014_v40  ;;  %8510 = vmatpush3.bf16.msk.msra.mxu1 %vm8507_vm4, %v9591_v9 }
 0x16d   :  { %8512 = vmatprep.subr.msk.bf16.mxu1 %vm8511_vm8, %v9591_v9 }
 0x16f   :  { %7831 = vmatmul.mubr.f32.gmra.mrb[46].mxu1 %v10034_v41 }
 0x170   :  { %7921 = vmatprep.mubr.f32.mxu1 %v10349_v25  ;;  %8514 = vmatpush3.bf16.msk.msra.mxu1 %vm8511_vm8, %v9591_v9  ;;  %v9360_v9 = vld [vmem:[%s11701_s1 + $0x18] sm:$0xff] }
 0x173   :  { %7922 = vmatmul.mubr.f32.vlgmr.msra.gmra.mrb[48].mxu1 %v9358_v18 }
 0x174   :  { %7924 = vmatprep.mubr.f32.mxu1 %v9359_v24 }
 0x177   :  { %7925 = vmatmul.mubr.f32.gmra.mrb[50].mxu1 %v9360_v9 }
 0x178   :  { %v7531_v34 = vpop.f32.mrb[0].mxu0  ;;  %7927 = vmatprep.mubr.f32.mxu1 %v9361_v29 }
 0x179   :  { %368 = vst.msk [vmem:[#allocation2 + $0x8] sm:$0xff] %vm366_vm13, %v7531_v34  ;;  %v287_v37 = vpop.f32.mrb[1].mxu0 }
 0x17a   :  { %367 = vst.msk [vmem:[#allocation2] sm:$0xff] %vm366_vm13, %v287_v37 }
 0x17b   :  { %7928 = vmatmul.mubr.f32.gmra.mrb[52].mxu1 %v9362_v32 }
 0x17c   :  { %v7534_v1 = vpop.f32.mrb[2].mxu0  ;;  %7930 = vmatprep.mubr.f32.mxu1 %v9363_v35 }
 0x17d   :  { %370 = vst.msk [vmem:[#allocation2 + $0x18] sm:$0xff] %vm366_vm13, %v7534_v1  ;;  %v297_v2 = vpop.f32.mrb[3].mxu0 }
 0x17e   :  { %369 = vst.msk [vmem:[#allocation2 + $0x10] sm:$0xff] %vm366_vm13, %v297_v2 }
 0x17f   :  { %7931 = vmatmul.mubr.f32.gmra.mrb[54].mxu1 %v9364_v38 }
 0x180   :  { %v7537_v3 = vpop.f32.mrb[4].mxu0  ;;  %7933 = vmatprep.mubr.f32.mxu1 %v9365_v43 }
 0x181   :  { %372 = vst.msk [vmem:[#allocation2 + $0x28] sm:$0xff] %vm366_vm13, %v7537_v3  ;;  %v307_v4 = vpop.f32.mrb[5].mxu0 }
 0x182   :  { %371 = vst.msk [vmem:[#allocation2 + $0x20] sm:$0xff] %vm366_vm13, %v307_v4 }
 0x183   :  { %7934 = vmatmul.mubr.f32.gmra.mrb[56].mxu1 %v9366_v45 }
 0x184   :  { %v7540_v5 = vpop.f32.mrb[6].mxu0  ;;  %7936 = vmatprep.mubr.f32.mxu1 %v9367_v47 }
 0x185   :  { %374 = vst.msk [vmem:[#allocation2 + $0x38] sm:$0xff] %vm366_vm13, %v7540_v5  ;;  %v317_v6 = vpop.f32.mrb[7].mxu0  ;;  %v1921_v29 = vld [vmem:[#allocation2 + $0x10] sm:$0xff] }
 0x186   :  { %373 = vst.msk [vmem:[#allocation2 + $0x30] sm:$0xff] %vm366_vm13, %v317_v6 }
 0x187   :  { %7937 = vmatmul.mubr.f32.gmra.mrb[58].mxu1 %v9368_v49 }
 0x188   :  { %v7543_v21 = vpop.f32.mrb[8].mxu0  ;;  %7939 = vmatprep.mubr.f32.mxu1 %v9369_v52  ;;  %v1924_v32 = vld [vmem:[#allocation2 + $0x28] sm:$0xff] }
 0x189   :  { %376 = vst.msk [vmem:[#allocation2 + $0x48] sm:$0xff] %vm366_vm13, %v7543_v21  ;;  %v327_v10 = vpop.f32.mrb[9].mxu0 }
 0x18a   :  { %375 = vst.msk [vmem:[#allocation2 + $0x40] sm:$0xff] %vm366_vm13, %v327_v10 }
 0x18b   :  { %7940 = vmatmul.mubr.f32.gmra.mrb[60].mxu1 %v10008_v39 }
 0x18c   :  { %v7546_v11 = vpop.f32.mrb[10].mxu0  ;;  %7942 = vmatprep.mubr.f32.mxu1 %v10014_v40 }
 0x18d   :  { %378 = vst.msk [vmem:[#allocation2 + $0x58] sm:$0xff] %vm366_vm13, %v7546_v11  ;;  %v337_v22 = vpop.f32.mrb[11].mxu0  ;;  %v1925_v49 = vld [vmem:[#allocation2 + $0x30] sm:$0xff] }
 0x18e   :  { %377 = vst.msk [vmem:[#allocation2 + $0x50] sm:$0xff] %vm366_vm13, %v337_v22 }
 0x18f   :  { %7943 = vmatmul.mubr.f32.gmra.mrb[62].mxu1 %v10034_v41 }
 0x190   :  { %v7549_v12 = vpop.f32.mrb[12].mxu0  ;;  %7985 = vmatprep.mubr.msk.f32.mxu1 %vm1935_vm6, %v10194_v51 }
 0x191   :  { %380 = vst.msk [vmem:[#allocation2 + $0x68] sm:$0xff] %vm366_vm13, %v7549_v12  ;;  %v347_v13 = vpop.f32.mrb[13].mxu0  ;;  %v1920_v12 = vld [vmem:[#allocation2 + $0x8] sm:$0xff] }
 0x192   :  { %379 = vst.msk [vmem:[#allocation2 + $0x60] sm:$0xff] %vm366_vm13, %v347_v13 }
 0x194   :  { %v7552_v14 = vpop.f32.mrb[14].mxu0 }
 0x195   :  { %382 = vst.msk [vmem:[#allocation2 + $0x78] sm:$0xff] %vm366_vm13, %v7552_v14  ;;  %v357_v15 = vpop.f32.mrb[15].mxu0 }
 0x196   :  { %381 = vst.msk [vmem:[#allocation2 + $0x70] sm:$0xff] %vm366_vm13, %v357_v15  ;;  %v1919_v15 = vld [vmem:[#allocation2] sm:$0xff] }
 0x198   :  { %v7643_v16 = vpop.f32.mrb[16].mxu0 }
 0x199   :  { %800 = vst.msk [vmem:[#allocation2 + $0x108] sm:$0xff] %vm366_vm13, %v7643_v16  ;;  %v719_v17 = vpop.f32.mrb[17].mxu0 }
 0x19a   :  { %799 = vst.msk [vmem:[#allocation2 + $0x100] sm:$0xff] %vm366_vm13, %v719_v17 }
 0x19c   :  { %v7646_v23 = vpop.f32.mrb[18].mxu0 }
 0x19d   :  { %802 = vst.msk [vmem:[#allocation2 + $0x118] sm:$0xff] %vm366_vm13, %v7646_v23  ;;  %v729_v19 = vpop.f32.mrb[19].mxu0 }
 0x19e   :  { %801 = vst.msk [vmem:[#allocation2 + $0x110] sm:$0xff] %vm366_vm13, %v729_v19  ;;  %v1922_v19 = vld [vmem:[#allocation2 + $0x18] sm:$0xff] }
 0x1a0   :  { %v7649_v26 = vpop.f32.mrb[20].mxu0 }
 0x1a1   :  { %804 = vst.msk [vmem:[#allocation2 + $0x128] sm:$0xff] %vm366_vm13, %v7649_v26  ;;  %v739_v27 = vpop.f32.mrb[21].mxu0 }
 0x1a2   :  { %803 = vst.msk [vmem:[#allocation2 + $0x120] sm:$0xff] %vm366_vm13, %v739_v27 }
 0x1a4   :  { %v7652_v30 = vpop.f32.mrb[22].mxu0 }
 0x1a5   :  { %806 = vst.msk [vmem:[#allocation2 + $0x138] sm:$0xff] %vm366_vm13, %v7652_v30  ;;  %v749_v33 = vpop.f32.mrb[23].mxu0 }
 0x1a6   :  { %805 = vst.msk [vmem:[#allocation2 + $0x130] sm:$0xff] %vm366_vm13, %v749_v33 }
 0x1a8   :  { %v7655_v36 = vpop.f32.mrb[24].mxu0 }
 0x1a9   :  { %808 = vst.msk [vmem:[#allocation2 + $0x148] sm:$0xff] %vm366_vm13, %v7655_v36  ;;  %v759_v42 = vpop.f32.mrb[25].mxu0  ;;  %v1923_v36 = vld [vmem:[#allocation2 + $0x20] sm:$0xff] }
 0x1aa   :  { %807 = vst.msk [vmem:[#allocation2 + $0x140] sm:$0xff] %vm366_vm13, %v759_v42 }
 0x1ac   :  { %v7658_v44 = vpop.f32.mrb[26].mxu0 }
 0x1ad   :  { %810 = vst.msk [vmem:[#allocation2 + $0x158] sm:$0xff] %vm366_vm13, %v7658_v44  ;;  %v769_v46 = vpop.f32.mrb[27].mxu0 }
 0x1ae   :  { %809 = vst.msk [vmem:[#allocation2 + $0x150] sm:$0xff] %vm366_vm13, %v769_v46  ;;  %v1926_v46 = vld [vmem:[#allocation2 + $0x38] sm:$0xff] }
 0x1b0   :  { %v7661_v48 = vpop.f32.mrb[28].mxu0 }
 0x1b1   :  { %812 = vst.msk [vmem:[#allocation2 + $0x168] sm:$0xff] %vm366_vm13, %v7661_v48  ;;  %v779_v50 = vpop.f32.mrb[29].mxu0 }
 0x1b2   :  { %811 = vst.msk [vmem:[#allocation2 + $0x160] sm:$0xff] %vm366_vm13, %v779_v50 }
 0x1b4   :  { %v7664_v53 = vpop.f32.mrb[30].mxu0 }
 0x1b5   :  { %814 = vst.msk [vmem:[#allocation2 + $0x178] sm:$0xff] %vm366_vm13, %v7664_v53  ;;  %v789_v54 = vpop.f32.mrb[31].mxu0 }
 0x1b6   :  { %813 = vst.msk [vmem:[#allocation2 + $0x170] sm:$0xff] %vm366_vm13, %v789_v54 }
 0x1b8   :  { %v7755_v55 = vpop.f32.mrb[32].mxu0 }
 0x1b9   :  { %1232 = vst.msk [vmem:[#allocation2 + $0x208] sm:$0xff] %vm366_vm13, %v7755_v55  ;;  %v1151_v56 = vpop.f32.mrb[33].mxu0 }
 0x1ba   :  { %1231 = vst.msk [vmem:[#allocation2 + $0x200] sm:$0xff] %vm366_vm13, %v1151_v56 }
 0x1bc   :  { %v7758_v57 = vpop.f32.mrb[34].mxu0 }
 0x1bd   :  { %1234 = vst.msk [vmem:[#allocation2 + $0x218] sm:$0xff] %vm366_vm13, %v7758_v57  ;;  %v1161_v39 = vpop.f32.mrb[35].mxu0 }
 0x1be   :  { %1233 = vst.msk [vmem:[#allocation2 + $0x210] sm:$0xff] %vm366_vm13, %v1161_v39  ;;  %v1928_v39 = vld [vmem:[#allocation2 + $0x48] sm:$0xff] }
 0x1c0   :  { %v7761_v40 = vpop.f32.mrb[36].mxu0 }
 0x1c1   :  { %1236 = vst.msk [vmem:[#allocation2 + $0x228] sm:$0xff] %vm366_vm13, %v7761_v40  ;;  %v1171_v58 = vpop.f32.mrb[37].mxu0 }
 0x1c2   :  { %1235 = vst.msk [vmem:[#allocation2 + $0x220] sm:$0xff] %vm366_vm13, %v1171_v58 }
 0x1c4   :  { %v7764_v41 = vpop.f32.mrb[38].mxu0 }
 0x1c5   :  { %1238 = vst.msk [vmem:[#allocation2 + $0x238] sm:$0xff] %vm366_vm13, %v7764_v41  ;;  %v1181_v59 = vpop.f32.mrb[39].mxu0 }
 0x1c6   :  { %1237 = vst.msk [vmem:[#allocation2 + $0x230] sm:$0xff] %vm366_vm13, %v1181_v59  ;;  %v1927_v59 = vld [vmem:[#allocation2 + $0x40] sm:$0xff] }
 0x1c8   :  { %v7767_v51 = vpop.f32.mrb[40].mxu0 }
 0x1c9   :  { %1240 = vst.msk [vmem:[#allocation2 + $0x248] sm:$0xff] %vm366_vm13, %v7767_v51  ;;  %v1191_v60 = vpop.f32.mrb[41].mxu0 }
 0x1ca   :  { %1239 = vst.msk [vmem:[#allocation2 + $0x240] sm:$0xff] %vm366_vm13, %v1191_v60 }
 0x1cc   :  { %v7770_v61 = vpop.f32.mrb[42].mxu0 }
 0x1cd   :  { %1242 = vst.msk [vmem:[#allocation2 + $0x258] sm:$0xff] %vm366_vm13, %v7770_v61  ;;  %v1201_v62 = vpop.f32.mrb[43].mxu0 }
 0x1ce   :  { %1241 = vst.msk [vmem:[#allocation2 + $0x250] sm:$0xff] %vm366_vm13, %v1201_v62 }
 0x1d0   :  { %v7773_v63 = vpop.f32.mrb[44].mxu0 }
 0x1d1   :  { %1244 = vst.msk [vmem:[#allocation2 + $0x268] sm:$0xff] %vm366_vm13, %v7773_v63  ;;  %v1211_v0 = vpop.f32.mrb[45].mxu0 }
 0x1d2   :  { %1243 = vst.msk [vmem:[#allocation2 + $0x260] sm:$0xff] %vm366_vm13, %v1211_v0 }
 0x1d4   :  { %v7776_v7 = vpop.f32.mrb[46].mxu0 }
 0x1d5   :  { %1246 = vst.msk [vmem:[#allocation2 + $0x278] sm:$0xff] %vm366_vm13, %v7776_v7  ;;  %v1221_v8 = vpop.f32.mrb[47].mxu0  ;;  %v1930_v7 = vld [vmem:[#allocation2 + $0x58] sm:$0xff] }
 0x1d6   :  { %1245 = vst.msk [vmem:[#allocation2 + $0x270] sm:$0xff] %vm366_vm13, %v1221_v8 }
 0x1d8   :  { %v7867_v20 = vpop.f32.mrb[48].mxu0 }
 0x1d9   :  { %1664 = vst.msk [vmem:[#allocation2 + $0x308] sm:$0xff] %vm366_vm13, %v7867_v20  ;;  %v1583_v25 = vpop.f32.mrb[49].mxu0 }
 0x1da   :  { %1663 = vst.msk [vmem:[#allocation2 + $0x300] sm:$0xff] %vm366_vm13, %v1583_v25 }
 0x1dc   :  { %v7870_v28 = vpop.f32.mrb[50].mxu0 }
 0x1dd   :  { %1666 = vst.msk [vmem:[#allocation2 + $0x318] sm:$0xff] %vm366_vm13, %v7870_v28  ;;  %v1593_v31 = vpop.f32.mrb[51].mxu0  ;;  %v1929_v28 = vld [vmem:[#allocation2 + $0x50] sm:$0xff] }
 0x1de   :  { %1665 = vst.msk [vmem:[#allocation2 + $0x310] sm:$0xff] %vm366_vm13, %v1593_v31 }
 0x1e0   :  { %v7873_v34 = vpop.f32.mrb[52].mxu0 }
 0x1e1   :  { %1668 = vst.msk [vmem:[#allocation2 + $0x328] sm:$0xff] %vm366_vm13, %v7873_v34  ;;  %v1603_v37 = vpop.f32.mrb[53].mxu0 }
 0x1e2   :  { %1667 = vst.msk [vmem:[#allocation2 + $0x320] sm:$0xff] %vm366_vm13, %v1603_v37 }
 0x1e4   :  { %v7876_v1 = vpop.f32.mrb[54].mxu0 }
 0x1e5   :  { %1670 = vst.msk [vmem:[#allocation2 + $0x338] sm:$0xff] %vm366_vm13, %v7876_v1  ;;  %v1613_v2 = vpop.f32.mrb[55].mxu0 }
 0x1e6   :  { %1669 = vst.msk [vmem:[#allocation2 + $0x330] sm:$0xff] %vm366_vm13, %v1613_v2  ;;  %v7587_v20 = vpop.f32.mrb[0].mxu1 }
 0x1e7   :  { %584 = vst.msk [vmem:[#allocation2 + $0x88] sm:$0xff] %vm366_vm13, %v7587_v20  ;;  %v503_v34 = vpop.f32.mrb[1].mxu1 }
 0x1e8   :  { %v7879_v3 = vpop.f32.mrb[56].mxu0  ;;  %583 = vst.msk [vmem:[#allocation2 + $0x80] sm:$0xff] %vm366_vm13, %v503_v34 }
 0x1e9   :  { %1672 = vst.msk [vmem:[#allocation2 + $0x348] sm:$0xff] %vm366_vm13, %v7879_v3  ;;  %v1623_v4 = vpop.f32.mrb[57].mxu0 }
 0x1ea   :  { %1671 = vst.msk [vmem:[#allocation2 + $0x340] sm:$0xff] %vm366_vm13, %v1623_v4 }
 0x1ec   :  { %v7882_v5 = vpop.f32.mrb[58].mxu0 }
 0x1ed   :  { %1674 = vst.msk [vmem:[#allocation2 + $0x358] sm:$0xff] %vm366_vm13, %v7882_v5  ;;  %v1633_v6 = vpop.f32.mrb[59].mxu0 }
 0x1ee   :  { %1673 = vst.msk [vmem:[#allocation2 + $0x350] sm:$0xff] %vm366_vm13, %v1633_v6  ;;  %v1932_v6 = vld [vmem:[#allocation2 + $0x68] sm:$0xff] }
 0x1f0   :  { %v7885_v21 = vpop.f32.mrb[60].mxu0 }
 0x1f1   :  { %1676 = vst.msk [vmem:[#allocation2 + $0x368] sm:$0xff] %vm366_vm13, %v7885_v21  ;;  %v1643_v10 = vpop.f32.mrb[61].mxu0 }
 0x1f2   :  { %1675 = vst.msk [vmem:[#allocation2 + $0x360] sm:$0xff] %vm366_vm13, %v1643_v10  ;;  %v7590_v10 = vpop.f32.mrb[2].mxu1 }
 0x1f3   :  { %586 = vst.msk [vmem:[#allocation2 + $0x98] sm:$0xff] %vm366_vm13, %v7590_v10 }
 0x1f4   :  { %v7888_v11 = vpop.f32.mrb[62].mxu0 }
 0x1f5   :  { %1678 = vst.msk [vmem:[#allocation2 + $0x378] sm:$0xff] %vm366_vm13, %v7888_v11  ;;  %v1653_v22 = vpop.f32.mrb[63].mxu0 }
 0x1f6   :  { %1677 = vst.msk [vmem:[#allocation2 + $0x370] sm:$0xff] %vm366_vm13, %v1653_v22 }
 0x1f8   :  { %v7955_v13 = vpop.f32.mrb[64].mxu0 }
 0x1f9   :  { %v2130_v14 = vadd.f32 %v7955_v13, %v1920_v12  ;;  %v2050_v16 = vpop.f32.mrb[65].mxu0  ;;  %v513_v13 = vpop.f32.mrb[3].mxu1 }
 0x1fa   :  { %v2129_v17 = vadd.f32 %v2050_v16, %v1919_v15  ;;  %v1931_v15 = vld [vmem:[#allocation2 + $0x60] sm:$0xff]  ;;  %585 = vst.msk [vmem:[#allocation2 + $0x90] sm:$0xff] %vm366_vm13, %v513_v13 }
 0x1fb   :  { %v6620_v23 = vmul.f32 -1.442695, %v2130_v14 }
 0x1fc   :  { %v6619_v18 = vmul.f32 -1.442695, %v2129_v17  ;;  %v7958_v24 = vpop.f32.mrb[66].mxu0 }
 0x1fd   :  { %8765 = vpow2.f32 %v6620_v23  ;;  %v2132_v26 = vadd.f32 %v7958_v24, %v1922_v19  ;;  %v2060_v9 = vpop.f32.mrb[67].mxu0  ;;  %v7593_v24 = vpop.f32.mrb[4].mxu1 }
 0x1fe   :  { %8767 = vpow2.f32 %v6619_v18  ;;  %v2131_v30 = vadd.f32 %v2060_v9, %v1921_v29  ;;  %v1934_v18 = vld [vmem:[#allocation2 + $0x78] sm:$0xff]  ;;  %588 = vst.msk [vmem:[#allocation2 + $0xa8] sm:$0xff] %vm366_vm13, %v7593_v24  ;;  %v523_v29 = vpop.f32.mrb[5].mxu1 }
 0x1ff   :  { %v6622_v27 = vmul.f32 -1.442695, %v2132_v26  ;;  %587 = vst.msk [vmem:[#allocation2 + $0xa0] sm:$0xff] %vm366_vm13, %v523_v29 }
 0x200   :  { %v7961_v33 = vpop.f32.mrb[68].mxu0  ;;  %v6621_v44 = vmul.f32 -1.442695, %v2131_v30 }
 0x201   :  { %8769 = vpow2.f32 %v6622_v27  ;;  %v2134_v35 = vadd.f32 %v7961_v33, %v1924_v32  ;;  %v2070_v38 = vpop.f32.mrb[69].mxu0  ;;  %v1933_v33 = vld [vmem:[#allocation2 + $0x70] sm:$0xff] }
 0x202   :  { %v2133_v42 = vadd.f32 %v2070_v38, %v1923_v36 }
 0x203   :  { %v6624_v43 = vmul.f32 -1.442695, %v2134_v35 }
 0x204   :  { %v6623_v45 = vmul.f32 -1.442695, %v2133_v42  ;;  %v7964_v47 = vpop.f32.mrb[70].mxu0 }
 0x205   :  { %8771 = vpow2.f32 %v6624_v43  ;;  %v2136_v48 = vadd.f32 %v7964_v47, %v1926_v46  ;;  %v2080_v50 = vpop.f32.mrb[71].mxu0  ;;  %v7596_v43 = vpop.f32.mrb[6].mxu1 }
 0x206   :  { %8773 = vpow2.f32 %v6623_v45  ;;  %v2135_v52 = vadd.f32 %v2080_v50, %v1925_v49  ;;  %590 = vst.msk [vmem:[#allocation2 + $0xb8] sm:$0xff] %vm366_vm13, %v7596_v43  ;;  %v533_v45 = vpop.f32.mrb[7].mxu1 }
 0x207   :  { %v8766_v53 = vpop.eup %8765  ;;  %v6626_v54 = vmul.f32 -1.442695, %v2136_v48  ;;  %8775 = vpow2.f32 %v6621_v44  ;;  %589 = vst.msk [vmem:[#allocation2 + $0xb0] sm:$0xff] %vm366_vm13, %v533_v45  ;;  %v1916_v48 = vld [vmem:[#allocation5 + $0x8] sm:$0xff]  ;;  %v7599_v50 = vpop.f32.mrb[8].mxu1 }
 0x208   :  { %v8768_v55 = vpop.eup %8767  ;;  %v2182_v56 = vadd.f32 1.0, %v8766_v53  ;;  %v6625_v57 = vmul.f32 -1.442695, %v2135_v52  ;;  %v7967_v40 = vpop.f32.mrb[72].mxu0  ;;  %v1915_v53 = vld [vmem:[#allocation5] sm:$0xff]  ;;  %592 = vst.msk [vmem:[#allocation2 + $0xc8] sm:$0xff] %vm366_vm13, %v7599_v50 }
 0x209   :  { %v2181_v58 = vadd.f32 1.0, %v8768_v55  ;;  %8777 = vpow2.f32 %v6626_v54  ;;  %v2138_v41 = vadd.f32 %v7967_v40, %v1928_v39  ;;  %v2090_v51 = vpop.f32.mrb[73].mxu0  ;;  %v543_v54 = vpop.f32.mrb[9].mxu1  ;;  %v10640_v50 = vld [vmem:[%s11702_s2 + $0x20] sm:$0xff] }
 0x20a   :  { %v2137_v60 = vadd.f32 %v2090_v51, %v1927_v59  ;;  %8779 = vrcp.f32 %v2182_v56  ;;  %591 = vst.msk [vmem:[#allocation2 + $0xc0] sm:$0xff] %vm366_vm13, %v543_v54  ;;  %v7602_v51 = vpop.f32.mrb[10].mxu1 }
 0x20b   :  { %v8770_v61 = vpop.eup %8769  ;;  %v6628_v62 = vmul.f32 -1.442695, %v2138_v41  ;;  %8781 = vpow2.f32 %v6625_v57  ;;  %v1918_v57 = vld [vmem:[#allocation5 + $0x18] sm:$0xff]  ;;  %594 = vst.msk [vmem:[#allocation2 + $0xd8] sm:$0xff] %vm366_vm13, %v7602_v51  ;;  %v10688_v51 = vld [vmem:[%s11702_s2 + $0x50] sm:$0xff] }
 0x20c   :  { %v2184_v63 = vadd.f32 1.0, %v8770_v61  ;;  %v6627_v0 = vmul.f32 -1.442695, %v2137_v60  ;;  %v7970_v8 = vpop.f32.mrb[74].mxu0  ;;  %8783 = vrcp.f32 %v2181_v58 }
 0x20d   :  { %v2140_v25 = vadd.f32 %v7970_v8, %v1930_v7  ;;  %v2100_v31 = vpop.f32.mrb[75].mxu0  ;;  %8785 = vpow2.f32 %v6628_v62  ;;  %v1917_v62 = vld [vmem:[#allocation5 + $0x10] sm:$0xff] }
 0x20e   :  { %v2139_v37 = vadd.f32 %v2100_v31, %v1929_v28  ;;  %8787 = vrcp.f32 %v2184_v63 }
 0x20f   :  { %v8772_v1 = vpop.eup %8771  ;;  %v6630_v2 = vmul.f32 -1.442695, %v2140_v25  ;;  %8789 = vpow2.f32 %v6627_v0  ;;  %v553_v0 = vpop.f32.mrb[11].mxu1 }
 0x210   :  { %v8774_v3 = vpop.eup %8773  ;;  %v2186_v4 = vadd.f32 1.0, %v8772_v1  ;;  %v6629_v5 = vmul.f32 -1.442695, %v2139_v37  ;;  %v7973_v21 = vpop.f32.mrb[76].mxu0  ;;  %593 = vst.msk [vmem:[#allocation2 + $0xd0] sm:$0xff] %vm366_vm13, %v553_v0 }
 0x211   :  { %v2185_v11 = vadd.f32 1.0, %v8774_v3  ;;  %8791 = vpow2.f32 %v6630_v2  ;;  %v2142_v22 = vadd.f32 %v7973_v21, %v1932_v6  ;;  %v2110_v12 = vpop.f32.mrb[77].mxu0  ;;  %v8776_v14 = vpop.eup %8775 }
 0x212   :  { %8793 = vrcp.f32 %v2186_v4  ;;  %v2141_v17 = vadd.f32 %v2110_v12, %v1931_v15  ;;  %v2183_v32 = vadd.f32 1.0, %v8776_v14  ;;  %v7605_v2 = vpop.f32.mrb[12].mxu1 }
 0x213   :  { %v8778_v16 = vpop.eup %8777  ;;  %8795 = vrcp.f32 %v2185_v11  ;;  %596 = vst.msk [vmem:[#allocation2 + $0xe8] sm:$0xff] %vm366_vm13, %v7605_v2  ;;  %v563_v6 = vpop.f32.mrb[13].mxu1  ;;  %v10737_v2 = vld [vmem:[%s11702_s2] sm:$0xff] }
 0x214   :  { %v2188_v23 = vadd.f32 1.0, %v8778_v16  ;;  %8797 = vpow2.f32 %v6629_v5  ;;  %v7976_v19 = vpop.f32.mrb[78].mxu0  ;;  %v8780_v26 = vpop.eup %8779  ;;  %595 = vst.msk [vmem:[#allocation2 + $0xe0] sm:$0xff] %vm366_vm13, %v563_v6 }
 0x215   :  { %8799 = vtanh.f32 %v2142_v22  ;;  %v2144_v9 = vadd.f32 %v7976_v19, %v1934_v18  ;;  %v2120_v27 = vpop.f32.mrb[79].mxu0  ;;  %v8782_v30 = vpop.eup %8781 }
 0x216   :  { %8801 = vrcp.f32 %v2188_v23  ;;  %v8784_v35 = vpop.eup %8783  ;;  %v2187_v36 = vadd.f32 1.0, %v8782_v30  ;;  %v2143_v38 = vadd.f32 %v2120_v27, %v1933_v33  ;;  %v7608_v11 = vpop.f32.mrb[14].mxu1 }
 0x217   :  { %8803 = vtanh.f32 %v2141_v17  ;;  %v8786_v42 = vpop.eup %8785  ;;  %598 = vst.msk [vmem:[#allocation2 + $0xf8] sm:$0xff] %vm366_vm13, %v7608_v11  ;;  %v573_v22 = vpop.f32.mrb[15].mxu1 }
 0x218   :  { %8805 = vtanh.f32 %v2144_v9  ;;  %v8788_v44 = vpop.eup %8787  ;;  %v2190_v40 = vadd.f32 1.0, %v8786_v42  ;;  %597 = vst.msk [vmem:[#allocation2 + $0xf0] sm:$0xff] %vm366_vm13, %v573_v22  ;;  %v7699_v13 = vpop.f32.mrb[16].mxu1 }
 0x219   :  { %8807 = vrcp.f32 %v2187_v36  ;;  %v8790_v46 = vpop.eup %8789  ;;  %1016 = vst.msk [vmem:[#allocation2 + $0x188] sm:$0xff] %vm366_vm13, %v7699_v13  ;;  %v935_v15 = vpop.f32.mrb[17].mxu1 }
 0x21a   :  { %8809 = vrcp.f32 %v2183_v32  ;;  %v2189_v63 = vadd.f32 1.0, %v8790_v46  ;;  %1015 = vst.msk [vmem:[#allocation2 + $0x180] sm:$0xff] %vm366_vm13, %v935_v15  ;;  %v7702_v24 = vpop.f32.mrb[18].mxu1  ;;  %v10624_v46 = vld [vmem:[%s11702_s2 + $0x10] sm:$0xff] }
 0x21b   :  { %v8792_v47 = vpop.eup %8791  ;;  %8811 = vtanh.f32 %v2143_v38  ;;  %1018 = vst.msk [vmem:[#allocation2 + $0x198] sm:$0xff] %vm366_vm13, %v7702_v24  ;;  %v945_v9 = vpop.f32.mrb[19].mxu1 }
 0x21c   :  { %v8794_v49 = vpop.eup %8793  ;;  %8813 = vrcp.f32 %v2190_v40  ;;  %v2192_v37 = vadd.f32 1.0, %v8792_v47  ;;  %1017 = vst.msk [vmem:[#allocation2 + $0x190] sm:$0xff] %vm366_vm13, %v945_v9  ;;  %v10672_v40 = vld [vmem:[%s11702_s2 + $0x40] sm:$0xff] }
 0x21d   :  { %v8796_v52 = vpop.eup %8795  ;;  %v2222_v56 = vmul.f32 %v8794_v49, %v1916_v48  ;;  %v10633_v48 = vld [vmem:[%s11702_s2 + $0x18] sm:$0xff] }
 0x21e   :  { %v8798_v55 = vpop.eup %8797  ;;  %v2221_v41 = vmul.f32 %v8796_v52, %v1915_v53  ;;  %v10649_v53 = vld [vmem:[%s11702_s2 + $0x28] sm:$0xff] }
 0x21f   :  { %v8800_v39 = vpop.eup %8799  ;;  %v2191_v4 = vadd.f32 1.0, %v8798_v55  ;;  %v10656_v55 = vld [vmem:[%s11702_s2 + $0x30] sm:$0xff] }
 0x220   :  { %v8802_v58 = vpop.eup %8801  ;;  %v2226_v59 = vmul.f32 %v8800_v39, %v8780_v26 }
 0x221   :  { %v8804_v60 = vpop.eup %8803  ;;  %v2224_v61 = vmul.f32 %v8802_v58, %v1918_v57  ;;  %v10665_v57 = vld [vmem:[%s11702_s2 + $0x38] sm:$0xff] }
 0x222   :  { %v8806_v7 = vpop.eup %8805  ;;  %v10589_v8 = vadd.f32 %v2226_v59, %v2222_v56  ;;  %v2225_v20 = vmul.f32 %v8804_v60, %v8784_v35  ;;  %v7705_v35 = vpop.f32.mrb[20].mxu1 }
 0x223   :  { %v8808_v25 = vpop.eup %8807  ;;  %v2228_v28 = vmul.f32 %v8806_v7, %v8788_v44  ;;  %1020 = vst.msk [vmem:[#allocation2 + $0x1a8] sm:$0xff] %vm366_vm13, %v7705_v35  ;;  %v955_v36 = vpop.f32.mrb[21].mxu1  ;;  %v10617_v44 = vld [vmem:[%s11702_s2 + $0x8] sm:$0xff] }
 0x224   :  { %v8810_v31 = vpop.eup %8809  ;;  %v2223_v34 = vmul.f32 %v8808_v25, %v1917_v62  ;;  %8815 = vtanh.f32 %v10589_v8  ;;  %v10593_v1 = vadd.f32 %v2225_v20, %v2221_v41  ;;  %1019 = vst.msk [vmem:[#allocation2 + $0x1a0] sm:$0xff] %vm366_vm13, %v955_v36  ;;  %v7708_v42 = vpop.f32.mrb[22].mxu1  ;;  %v10681_v41 = vld [vmem:[%s11702_s2 + $0x48] sm:$0xff]  ;;  %v10720_v25 = vld [vmem:[%s11702_s2 + $0x70] sm:$0xff] }
 0x225   :  { %v8812_v3 = vpop.eup %8811  ;;  %8817 = vrcp.f32 %v2189_v63  ;;  %v10595_v5 = vadd.f32 %v2228_v28, %v2224_v61  ;;  %1022 = vst.msk [vmem:[#allocation2 + $0x1b8] sm:$0xff] %vm366_vm13, %v7708_v42  ;;  %v965_v43 = vpop.f32.mrb[23].mxu1  ;;  %v10697_v61 = vld [vmem:[%s11702_s2 + $0x58] sm:$0xff]  ;;  %v10704_v63 = vld [vmem:[%s11702_s2 + $0x60] sm:$0xff]  ;;  %v10713_v7 = vld [vmem:[%s11702_s2 + $0x68] sm:$0xff] }
 0x226   :  { %8819 = vtanh.f32 %v10593_v1  ;;  %v2227_v21 = vmul.f32 %v8812_v3, %v8810_v31  ;;  %v8814_v12 = vpop.eup %8813  ;;  %1021 = vst.msk [vmem:[#allocation2 + $0x1b0] sm:$0xff] %vm366_vm13, %v965_v43  ;;  %v7711_v45 = vpop.f32.mrb[24].mxu1  ;;  %v10729_v31 = vld [vmem:[%s11702_s2 + $0x78] sm:$0xff]  ;;  %v2242_v36 = vld [vmem:[#allocation2 + $0x88] sm:$0xff]  ;;  %v2241_v43 = vld [vmem:[#allocation2 + $0x80] sm:$0xff] }
 0x227   :  { %8821 = vtanh.f32 %v10595_v5  ;;  %1024 = vst.msk [vmem:[#allocation2 + $0x1c8] sm:$0xff] %vm366_vm13, %v7711_v45  ;;  %v975_v47 = vpop.f32.mrb[25].mxu1 }
 0x228   :  { %8823 = vrcp.f32 %v2192_v37  ;;  %v10601_v10 = vadd.f32 %v2227_v21, %v2223_v34  ;;  %1023 = vst.msk [vmem:[#allocation2 + $0x1c0] sm:$0xff] %vm366_vm13, %v975_v47  ;;  %v7714_v49 = vpop.f32.mrb[26].mxu1 }
 0x229   :  { %8825 = vrcp.f32 %v2191_v4  ;;  %1026 = vst.msk [vmem:[#allocation2 + $0x1d8] sm:$0xff] %vm366_vm13, %v7714_v49  ;;  %v985_v52 = vpop.f32.mrb[27].mxu1 }
 0x22a   :  { %8827 = vtanh.f32 %v10601_v10  ;;  %1025 = vst.msk [vmem:[#allocation2 + $0x1d0] sm:$0xff] %vm366_vm13, %v985_v52  ;;  %v7717_v54 = vpop.f32.mrb[28].mxu1 }
 0x22b   :  { %1028 = vst.msk [vmem:[#allocation2 + $0x1e8] sm:$0xff] %vm366_vm13, %v7717_v54  ;;  %v995_v56 = vpop.f32.mrb[29].mxu1  ;;  %v2244_v54 = vld [vmem:[#allocation2 + $0x98] sm:$0xff] }
 0x22c   :  { %1027 = vst.msk [vmem:[#allocation2 + $0x1e0] sm:$0xff] %vm366_vm13, %v995_v56  ;;  %v7720_v39 = vpop.f32.mrb[30].mxu1 }
 0x22d   :  { %1030 = vst.msk [vmem:[#allocation2 + $0x1f8] sm:$0xff] %vm366_vm13, %v7720_v39  ;;  %v1005_v58 = vpop.f32.mrb[31].mxu1 }
 0x22e   :  { %v8816_v14 = vpop.eup %8815  ;;  %1029 = vst.msk [vmem:[#allocation2 + $0x1f0] sm:$0xff] %vm366_vm13, %v1005_v58  ;;  %v7811_v59 = vpop.f32.mrb[32].mxu1 }
 0x22f   :  { %v8818_v16 = vpop.eup %8817  ;;  %v2238_v17 = vmul.f32 %v8816_v14, %v8814_v12  ;;  %1448 = vst.msk [vmem:[#allocation2 + $0x288] sm:$0xff] %vm366_vm13, %v7811_v59  ;;  %v1367_v60 = vpop.f32.mrb[33].mxu1 }
 0x230   :  { %v8820_v23 = vpop.eup %8819  ;;  %1447 = vst.msk [vmem:[#allocation2 + $0x280] sm:$0xff] %vm366_vm13, %v1367_v60  ;;  %v7814_v62 = vpop.f32.mrb[34].mxu1  ;;  %v2243_v60 = vld [vmem:[#allocation2 + $0x90] sm:$0xff] }
 0x231   :  { %v8822_v18 = vpop.eup %8821  ;;  %v2237_v19 = vmul.f32 %v8820_v23, %v8818_v16  ;;  %1450 = vst.msk [vmem:[#allocation2 + $0x298] sm:$0xff] %vm366_vm13, %v7814_v62  ;;  %v1377_v0 = vpop.f32.mrb[35].mxu1 }
 0x232   :  { %v8824_v26 = vpop.eup %8823  ;;  %1449 = vst.msk [vmem:[#allocation2 + $0x290] sm:$0xff] %vm366_vm13, %v1377_v0  ;;  %v7817_v20 = vpop.f32.mrb[36].mxu1  ;;  %v2246_v0 = vld [vmem:[#allocation2 + $0xa8] sm:$0xff] }
 0x233   :  { %v8826_v27 = vpop.eup %8825  ;;  %v8523_v29 = vpack.c.bf16 %v2238_v17, %v2237_v19  ;;  %v2240_v30 = vmul.f32 %v8824_v26, %v8822_v18  ;;  %1452 = vst.msk [vmem:[#allocation2 + $0x2a8] sm:$0xff] %vm366_vm13, %v7817_v20  ;;  %v1387_v28 = vpop.f32.mrb[37].mxu1 }
 0x234   :  { %v8828_v32 = vpop.eup %8827  ;;  %1451 = vst.msk [vmem:[#allocation2 + $0x2a0] sm:$0xff] %vm366_vm13, %v1387_v28  ;;  %v7820_v34 = vpop.f32.mrb[38].mxu1 }
 0x235   :  { %8524 = vmatprep.subr.bf16.mxu1 %v8523_v29  ;;  %v2239_v33 = vmul.f32 %v8828_v32, %v8826_v27  ;;  %1454 = vst.msk [vmem:[#allocation2 + $0x2b8] sm:$0xff] %vm366_vm13, %v7820_v34  ;;  %v1397_v37 = vpop.f32.mrb[39].mxu1  ;;  %v2245_v34 = vld [vmem:[#allocation2 + $0xa0] sm:$0xff] }
 0x236   :  { %8526 = vmatpush3.bf16.msra.mxu1 %v8523_v29  ;;  %1453 = vst.msk [vmem:[#allocation2 + $0x2b0] sm:$0xff] %vm366_vm13, %v1397_v37  ;;  %v7823_v3 = vpop.f32.mrb[40].mxu1 }
 0x237   :  { %v8527_v38 = vpack.c.bf16 %v2240_v30, %v2239_v33  ;;  %1456 = vst.msk [vmem:[#allocation2 + $0x2c8] sm:$0xff] %vm366_vm13, %v7823_v3  ;;  %v1407_v4 = vpop.f32.mrb[41].mxu1 }
 0x238   :  { %1455 = vst.msk [vmem:[#allocation2 + $0x2c0] sm:$0xff] %vm366_vm13, %v1407_v4 }
 0x239   :  { %8528 = vmatprep.subr.bf16.mxu1 %v8527_v38 }
 0x23a   :  { %8530 = vmatpush3.bf16.msra.mxu1 %v8527_v38  ;;  %v7826_v6 = vpop.f32.mrb[42].mxu1 }
 0x23b   :  { %1458 = vst.msk [vmem:[#allocation2 + $0x2d8] sm:$0xff] %vm366_vm13, %v7826_v6  ;;  %v1417_v21 = vpop.f32.mrb[43].mxu1 }
 0x23c   :  { %1457 = vst.msk [vmem:[#allocation2 + $0x2d0] sm:$0xff] %vm366_vm13, %v1417_v21 }
 0x23d   :  { %7986 = vmatmul.mubr.msk.f32.vlgmr.msra.gmra.mrb[64].mxu1 %vm1935_vm6, %v10617_v44 }
 0x23e   :  { %7988 = vmatprep.mubr.msk.f32.mxu1 %vm1935_vm6, %v10624_v46  ;;  %v7829_v11 = vpop.f32.mrb[44].mxu1 }
 0x23f   :  { %1460 = vst.msk [vmem:[#allocation2 + $0x2e8] sm:$0xff] %vm366_vm13, %v7829_v11  ;;  %v1427_v22 = vpop.f32.mrb[45].mxu1  ;;  %v2248_v11 = vld [vmem:[#allocation2 + $0xb8] sm:$0xff] }
 0x240   :  { %1459 = vst.msk [vmem:[#allocation2 + $0x2e0] sm:$0xff] %vm366_vm13, %v1427_v22 }
 0x241   :  { %7989 = vmatmul.mubr.msk.f32.gmra.mrb[66].mxu1 %vm1935_vm6, %v10633_v48 }
 0x242   :  { %7991 = vmatprep.mubr.msk.f32.mxu1 %vm1935_vm6, %v10640_v50  ;;  %v7832_v12 = vpop.f32.mrb[46].mxu1 }
 0x243   :  { %1462 = vst.msk [vmem:[#allocation2 + $0x2f8] sm:$0xff] %vm366_vm13, %v7832_v12  ;;  %v1437_v13 = vpop.f32.mrb[47].mxu1 }
 0x244   :  { %1461 = vst.msk [vmem:[#allocation2 + $0x2f0] sm:$0xff] %vm366_vm13, %v1437_v13  ;;  %v2247_v13 = vld [vmem:[#allocation2 + $0xb0] sm:$0xff] }
 0x245   :  { %7992 = vmatmul.mubr.msk.f32.gmra.mrb[68].mxu1 %vm1935_vm6, %v10649_v53 }
 0x246   :  { %7994 = vmatprep.mubr.msk.f32.mxu1 %vm1935_vm6, %v10656_v55  ;;  %v7923_v14 = vpop.f32.mrb[48].mxu1 }
 0x247   :  { %1880 = vst.msk [vmem:[#allocation2 + $0x388] sm:$0xff] %vm366_vm13, %v7923_v14  ;;  %v1799_v15 = vpop.f32.mrb[49].mxu1 }
 0x248   :  { %1879 = vst.msk [vmem:[#allocation2 + $0x380] sm:$0xff] %vm366_vm13, %v1799_v15 }
 0x249   :  { %7995 = vmatmul.mubr.msk.f32.gmra.mrb[70].mxu1 %vm1935_vm6, %v10665_v57 }
 0x24a   :  { %7997 = vmatprep.mubr.msk.f32.mxu1 %vm1935_vm6, %v10672_v40  ;;  %v7926_v16 = vpop.f32.mrb[50].mxu1 }
 0x24b   :  { %1882 = vst.msk [vmem:[#allocation2 + $0x398] sm:$0xff] %vm366_vm13, %v7926_v16  ;;  %v1809_v17 = vpop.f32.mrb[51].mxu1 }
 0x24c   :  { %1881 = vst.msk [vmem:[#allocation2 + $0x390] sm:$0xff] %vm366_vm13, %v1809_v17 }
 0x24d   :  { %7998 = vmatmul.mubr.msk.f32.gmra.mrb[72].mxu1 %vm1935_vm6, %v10681_v41 }
 0x24e   :  { %8000 = vmatprep.mubr.msk.f32.mxu1 %vm1935_vm6, %v10688_v51  ;;  %v7929_v23 = vpop.f32.mrb[52].mxu1 }
 0x24f   :  { %1884 = vst.msk [vmem:[#allocation2 + $0x3a8] sm:$0xff] %vm366_vm13, %v7929_v23  ;;  %v1819_v18 = vpop.f32.mrb[53].mxu1 }
 0x250   :  { %1883 = vst.msk [vmem:[#allocation2 + $0x3a0] sm:$0xff] %vm366_vm13, %v1819_v18 }
 0x251   :  { %8001 = vmatmul.mubr.msk.f32.gmra.mrb[74].mxu1 %vm1935_vm6, %v10697_v61 }
 0x252   :  { %8003 = vmatprep.mubr.msk.f32.mxu1 %vm1935_vm6, %v10704_v63  ;;  %v7932_v19 = vpop.f32.mrb[54].mxu1 }
 0x253   :  { %1886 = vst.msk [vmem:[#allocation2 + $0x3b8] sm:$0xff] %vm366_vm13, %v7932_v19  ;;  %v1829_v24 = vpop.f32.mrb[55].mxu1 }
 0x254   :  { %1885 = vst.msk [vmem:[#allocation2 + $0x3b0] sm:$0xff] %vm366_vm13, %v1829_v24  ;;  %v2250_v24 = vld [vmem:[#allocation2 + $0xc8] sm:$0xff] }
 0x255   :  { %8004 = vmatmul.mubr.msk.f32.gmra.mrb[76].mxu1 %vm1935_vm6, %v10713_v7 }
 0x256   :  { %8006 = vmatprep.mubr.msk.f32.mxu1 %vm1935_vm6, %v10720_v25  ;;  %v7935_v26 = vpop.f32.mrb[56].mxu1 }
 0x257   :  { %1888 = vst.msk [vmem:[#allocation2 + $0x3c8] sm:$0xff] %vm366_vm13, %v7935_v26  ;;  %v1839_v9 = vpop.f32.mrb[57].mxu1 }
 0x258   :  { %1887 = vst.msk [vmem:[#allocation2 + $0x3c0] sm:$0xff] %vm366_vm13, %v1839_v9 }
 0x259   :  { %8007 = vmatmul.mubr.msk.f32.gmra.mrb[78].mxu1 %vm1935_vm6, %v10729_v31 }
 0x25a   :  { %8049 = vmatprep.mubr.msk.f32.mxu1 %vm1935_vm6, %v10737_v2  ;;  %v7938_v27 = vpop.f32.mrb[58].mxu1 }
 0x25b   :  { %1890 = vst.msk [vmem:[#allocation2 + $0x3d8] sm:$0xff] %vm366_vm13, %v7938_v27  ;;  %v1849_v29 = vpop.f32.mrb[59].mxu1 }
 0x25c   :  { %1889 = vst.msk [vmem:[#allocation2 + $0x3d0] sm:$0xff] %vm366_vm13, %v1849_v29  ;;  %v2249_v29 = vld [vmem:[#allocation2 + $0xc0] sm:$0xff] }
 0x25e   :  { %v7941_v30 = vpop.f32.mrb[60].mxu1 }
 0x25f   :  { %1892 = vst.msk [vmem:[#allocation2 + $0x3e8] sm:$0xff] %vm366_vm13, %v7941_v30  ;;  %v1859_v32 = vpop.f32.mrb[61].mxu1 }
 0x260   :  { %1891 = vst.msk [vmem:[#allocation2 + $0x3e0] sm:$0xff] %vm366_vm13, %v1859_v32 }
 0x262   :  { %v7944_v33 = vpop.f32.mrb[62].mxu1 }
 0x263   :  { %1894 = vst.msk [vmem:[#allocation2 + $0x3f8] sm:$0xff] %vm366_vm13, %v7944_v33  ;;  %v1869_v35 = vpop.f32.mrb[63].mxu1 }
 0x264   :  { %1893 = vst.msk [vmem:[#allocation2 + $0x3f0] sm:$0xff] %vm366_vm13, %v1869_v35 }
 0x310   :  { %v7987_v38 = vpop.f32.mrb[64].mxu1 }
 0x311   :  { %v2403_v42 = vadd.f32 %v7987_v38, %v2242_v36  ;;  %v2323_v45 = vpop.f32.mrb[65].mxu1 }
 0x312   :  { %v2402_v47 = vadd.f32 %v2323_v45, %v2241_v43 }
 0x313   :  { %v6648_v49 = vmul.f32 -1.442695, %v2403_v42  ;;  %v2252_v42 = vld [vmem:[#allocation2 + $0xd8] sm:$0xff] }
 0x314   :  { %v6647_v52 = vmul.f32 -1.442695, %v2402_v47  ;;  %v7990_v56 = vpop.f32.mrb[66].mxu1  ;;  %v2251_v47 = vld [vmem:[#allocation2 + $0xd0] sm:$0xff] }
 0x315   :  { %8829 = vpow2.f32 %v6648_v49  ;;  %v2405_v39 = vadd.f32 %v7990_v56, %v2244_v54  ;;  %v2333_v58 = vpop.f32.mrb[67].mxu1 }
 0x316   :  { %8831 = vpow2.f32 %v6647_v52  ;;  %v2404_v62 = vadd.f32 %v2333_v58, %v2243_v60  ;;  %v2254_v60 = vld [vmem:[#allocation2 + $0xe8] sm:$0xff] }
 0x317   :  { %v6650_v59 = vmul.f32 -1.442695, %v2405_v39 }
 0x318   :  { %v7993_v20 = vpop.f32.mrb[68].mxu1  ;;  %v6649_v6 = vmul.f32 -1.442695, %v2404_v62 }
 0x319   :  { %8833 = vpow2.f32 %v6650_v59  ;;  %v2407_v28 = vadd.f32 %v7993_v20, %v2246_v0  ;;  %v2343_v37 = vpop.f32.mrb[69].mxu1 }
 0x31a   :  { %v2406_v3 = vadd.f32 %v2343_v37, %v2245_v34  ;;  %v2253_v37 = vld [vmem:[#allocation2 + $0xe0] sm:$0xff] }
 0x31b   :  { %v6652_v4 = vmul.f32 -1.442695, %v2407_v28 }
 0x31c   :  { %v6651_v21 = vmul.f32 -1.442695, %v2406_v3  ;;  %v7996_v22 = vpop.f32.mrb[70].mxu1 }
 0x31d   :  { %8835 = vpow2.f32 %v6652_v4  ;;  %v2409_v12 = vadd.f32 %v7996_v22, %v2248_v11  ;;  %v2353_v14 = vpop.f32.mrb[71].mxu1 }
 0x31e   :  { %8837 = vpow2.f32 %v6651_v21  ;;  %v2408_v15 = vadd.f32 %v2353_v14, %v2247_v13  ;;  %v2256_v21 = vld [vmem:[#allocation2 + $0xf8] sm:$0xff] }
 0x31f   :  { %v8830_v16 = vpop.eup %8829  ;;  %v6654_v17 = vmul.f32 -1.442695, %v2409_v12  ;;  %8839 = vpow2.f32 %v6649_v6 }
 0x320   :  { %v8832_v23 = vpop.eup %8831  ;;  %v2455_v18 = vadd.f32 1.0, %v8830_v16  ;;  %v6653_v19 = vmul.f32 -1.442695, %v2408_v15  ;;  %v7999_v26 = vpop.f32.mrb[72].mxu1  ;;  %v2255_v16 = vld [vmem:[#allocation2 + $0xf0] sm:$0xff] }
 0x321   :  { %v2454_v9 = vadd.f32 1.0, %v8832_v23  ;;  %8841 = vpow2.f32 %v6654_v17  ;;  %v2411_v27 = vadd.f32 %v7999_v26, %v2250_v24  ;;  %v2363_v30 = vpop.f32.mrb[73].mxu1 }
 0x322   :  { %v2410_v32 = vadd.f32 %v2363_v30, %v2249_v29  ;;  %8843 = vrcp.f32 %v2455_v18 }
 0x323   :  { %v8834_v33 = vpop.eup %8833  ;;  %v6656_v35 = vmul.f32 -1.442695, %v2411_v27  ;;  %8845 = vpow2.f32 %v6653_v19 }
 0x324   :  { %v2457_v36 = vadd.f32 1.0, %v8834_v33  ;;  %v6655_v38 = vmul.f32 -1.442695, %v2410_v32  ;;  %v8002_v43 = vpop.f32.mrb[74].mxu1  ;;  %8847 = vrcp.f32 %v2454_v9 }
 0x325   :  { %v2413_v45 = vadd.f32 %v8002_v43, %v2252_v42  ;;  %v2373_v49 = vpop.f32.mrb[75].mxu1  ;;  %8849 = vpow2.f32 %v6656_v35 }
 0x326   :  { %v2412_v52 = vadd.f32 %v2373_v49, %v2251_v47  ;;  %8851 = vrcp.f32 %v2457_v36 }
 0x327   :  { %v8836_v54 = vpop.eup %8835  ;;  %v6658_v56 = vmul.f32 -1.442695, %v2413_v45  ;;  %8853 = vpow2.f32 %v6655_v38 }
 0x328   :  { %v8838_v39 = vpop.eup %8837  ;;  %v2459_v58 = vadd.f32 1.0, %v8836_v54  ;;  %v6657_v59 = vmul.f32 -1.442695, %v2412_v52  ;;  %v8005_v62 = vpop.f32.mrb[76].mxu1 }
 0x329   :  { %v2458_v0 = vadd.f32 1.0, %v8838_v39  ;;  %8855 = vpow2.f32 %v6658_v56  ;;  %v2415_v20 = vadd.f32 %v8005_v62, %v2254_v60  ;;  %v2383_v28 = vpop.f32.mrb[77].mxu1  ;;  %v8840_v34 = vpop.eup %8839 }
 0x32a   :  { %8857 = vrcp.f32 %v2459_v58  ;;  %v2414_v4 = vadd.f32 %v2383_v28, %v2253_v37  ;;  %v2456_v15 = vadd.f32 1.0, %v8840_v34 }
 0x32b   :  { %v8842_v3 = vpop.eup %8841  ;;  %8859 = vrcp.f32 %v2458_v0 }
 0x32c   :  { %v2461_v6 = vadd.f32 1.0, %v8842_v3  ;;  %8861 = vpow2.f32 %v6657_v59  ;;  %v8008_v11 = vpop.f32.mrb[78].mxu1  ;;  %v8844_v22 = vpop.eup %8843 }
 0x32d   :  { %8863 = vtanh.f32 %v2415_v20  ;;  %v2417_v12 = vadd.f32 %v8008_v11, %v2256_v21  ;;  %v2393_v13 = vpop.f32.mrb[79].mxu1  ;;  %v8846_v14 = vpop.eup %8845 }
 0x32e   :  { %8865 = vrcp.f32 %v2461_v6  ;;  %v8848_v17 = vpop.eup %8847  ;;  %v2460_v23 = vadd.f32 1.0, %v8846_v14  ;;  %v2416_v18 = vadd.f32 %v2393_v13, %v2255_v16  ;;  %v2515_v16 = vld [vmem:[#allocation2 + $0x108] sm:$0xff] }
 0x32f   :  { %8867 = vtanh.f32 %v2414_v4  ;;  %v8850_v19 = vpop.eup %8849 }
 0x330   :  { %8869 = vtanh.f32 %v2417_v12  ;;  %v8852_v24 = vpop.eup %8851  ;;  %v2463_v35 = vadd.f32 1.0, %v8850_v19 }
 0x331   :  { %8871 = vrcp.f32 %v2460_v23  ;;  %v8854_v26 = vpop.eup %8853 }
 0x332   :  { %8873 = vrcp.f32 %v2456_v15  ;;  %v2462_v47 = vadd.f32 1.0, %v8854_v26 }
 0x333   :  { %v8856_v9 = vpop.eup %8855  ;;  %8875 = vtanh.f32 %v2416_v18  ;;  %v2514_v18 = vld [vmem:[#allocation2 + $0x100] sm:$0xff] }
 0x334   :  { %v8858_v27 = vpop.eup %8857  ;;  %8877 = vrcp.f32 %v2463_v35  ;;  %v2465_v59 = vadd.f32 1.0, %v8856_v9  ;;  %v2516_v35 = vld [vmem:[#allocation2 + $0x110] sm:$0xff] }
 0x335   :  { %v8860_v29 = vpop.eup %8859  ;;  %v2495_v32 = vmul.f32 %v8858_v27, %v10589_v8  ;;  %v2517_v27 = vld [vmem:[#allocation2 + $0x118] sm:$0xff] }
 0x336   :  { %v8862_v30 = vpop.eup %8861  ;;  %v2494_v38 = vmul.f32 %v8860_v29, %v10593_v1 }
 0x337   :  { %v8864_v33 = vpop.eup %8863  ;;  %v2464_v62 = vadd.f32 1.0, %v8862_v30 }
 0x338   :  { %v8866_v36 = vpop.eup %8865  ;;  %v2499_v42 = vmul.f32 %v8864_v33, %v8844_v22 }
 0x339   :  { %v8868_v43 = vpop.eup %8867  ;;  %v2497_v45 = vmul.f32 %v8866_v36, %v10595_v5 }
 0x33a   :  { %v8870_v49 = vpop.eup %8869  ;;  %v10769_v52 = vadd.f32 %v2499_v42, %v2495_v32  ;;  %v2498_v54 = vmul.f32 %v8868_v43, %v8848_v17 }
 0x33b   :  { %v8872_v56 = vpop.eup %8871  ;;  %v2501_v39 = vmul.f32 %v8870_v49, %v8852_v24 }
 0x33c   :  { %v8874_v58 = vpop.eup %8873  ;;  %v2496_v8 = vmul.f32 %v8872_v56, %v10601_v10  ;;  %8879 = vtanh.f32 %v10769_v52  ;;  %v10773_v60 = vadd.f32 %v2498_v54, %v2494_v38  ;;  %v2519_v38 = vld [vmem:[#allocation2 + $0x128] sm:$0xff] }
 0x33d   :  { %v8876_v1 = vpop.eup %8875  ;;  %8881 = vrcp.f32 %v2462_v47  ;;  %v10775_v5 = vadd.f32 %v2501_v39, %v2497_v45  ;;  %v2518_v45 = vld [vmem:[#allocation2 + $0x120] sm:$0xff] }
 0x33e   :  { %8883 = vtanh.f32 %v10773_v60  ;;  %v2500_v0 = vmul.f32 %v8876_v1, %v8874_v58  ;;  %v8878_v10 = vpop.eup %8877  ;;  %v2521_v58 = vld [vmem:[#allocation2 + $0x138] sm:$0xff]  ;;  %v2520_v1 = vld [vmem:[#allocation2 + $0x130] sm:$0xff] }
 0x33f   :  { %8885 = vtanh.f32 %v10775_v5 }
 0x340   :  { %8887 = vrcp.f32 %v2465_v59  ;;  %v10779_v20 = vadd.f32 %v2500_v0, %v2496_v8 }
 0x341   :  { %8889 = vrcp.f32 %v2464_v62 }
 0x342   :  { %8891 = vtanh.f32 %v10779_v20 }
 0x346   :  { %v8880_v28 = vpop.eup %8879 }
 0x347   :  { %v8882_v34 = vpop.eup %8881  ;;  %v2511_v37 = vmul.f32 %v8880_v28, %v8878_v10 }
 0x348   :  { %v8884_v3 = vpop.eup %8883 }
 0x349   :  { %v8886_v4 = vpop.eup %8885  ;;  %v2510_v6 = vmul.f32 %v8884_v3, %v8882_v34 }
 0x34a   :  { %v8888_v21 = vpop.eup %8887 }
 0x34b   :  { %v8890_v11 = vpop.eup %8889  ;;  %v8531_v22 = vpack.c.bf16 %v2511_v37, %v2510_v6  ;;  %v2513_v12 = vmul.f32 %v8888_v21, %v8886_v4  ;;  %v2523_v4 = vld [vmem:[#allocation2 + $0x148] sm:$0xff] }
 0x34c   :  { %v8892_v13 = vpop.eup %8891 }
 0x34d   :  { %8532 = vmatprep.subr.bf16.mxu0 %v8531_v22  ;;  %v2512_v14 = vmul.f32 %v8892_v13, %v8890_v11 }
 0x34e   :  { %8534 = vmatpush3.bf16.msra.mxu0 %v8531_v22  ;;  %v2522_v22 = vld [vmem:[#allocation2 + $0x140] sm:$0xff] }
 0x34f   :  { %v8535_v15 = vpack.c.bf16 %v2513_v12, %v2512_v14 }
 0x351   :  { %8536 = vmatprep.subr.bf16.mxu0 %v8535_v15 }
 0x352   :  { %8538 = vmatpush3.bf16.msra.mxu0 %v8535_v15 }
 0x355   :  { %8018 = vmatmul.mubr.msk.f32.vlgmr.msra.gmra.mrb[80].mxu0 %vm1935_vm6, %v10617_v44 }
 0x356   :  { %8020 = vmatprep.mubr.msk.f32.mxu0 %vm1935_vm6, %v10624_v46 }
 0x359   :  { %8021 = vmatmul.mubr.msk.f32.gmra.mrb[82].mxu0 %vm1935_vm6, %v10633_v48 }
 0x35a   :  { %8023 = vmatprep.mubr.msk.f32.mxu0 %vm1935_vm6, %v10640_v50 }
 0x35d   :  { %8024 = vmatmul.mubr.msk.f32.gmra.mrb[84].mxu0 %vm1935_vm6, %v10649_v53 }
 0x35e   :  { %8026 = vmatprep.mubr.msk.f32.mxu0 %vm1935_vm6, %v10656_v55 }
 0x361   :  { %8027 = vmatmul.mubr.msk.f32.gmra.mrb[86].mxu0 %vm1935_vm6, %v10665_v57 }
 0x362   :  { %8029 = vmatprep.mubr.msk.f32.mxu0 %vm1935_vm6, %v10672_v40 }
 0x365   :  { %8030 = vmatmul.mubr.msk.f32.gmra.mrb[88].mxu0 %vm1935_vm6, %v10681_v41 }
 0x366   :  { %8032 = vmatprep.mubr.msk.f32.mxu0 %vm1935_vm6, %v10688_v51 }
 0x369   :  { %8033 = vmatmul.mubr.msk.f32.gmra.mrb[90].mxu0 %vm1935_vm6, %v10697_v61 }
 0x36a   :  { %8035 = vmatprep.mubr.msk.f32.mxu0 %vm1935_vm6, %v10704_v63 }
 0x36d   :  { %8036 = vmatmul.mubr.msk.f32.gmra.mrb[92].mxu0 %vm1935_vm6, %v10713_v7 }
 0x36e   :  { %8038 = vmatprep.mubr.msk.f32.mxu0 %vm1935_vm6, %v10720_v25 }
 0x371   :  { %8039 = vmatmul.mubr.msk.f32.gmra.mrb[94].mxu0 %vm1935_vm6, %v10729_v31 }
 0x372   :  { %8081 = vmatprep.mubr.msk.f32.mxu0 %vm1935_vm6, %v10737_v2 }
 0x428   :  { %v8019_v17 = vpop.f32.mrb[80].mxu0 }
 0x429   :  { %v2676_v23 = vadd.f32 %v8019_v17, %v2515_v16  ;;  %v2596_v19 = vpop.f32.mrb[81].mxu0 }
 0x42a   :  { %v2675_v24 = vadd.f32 %v2596_v19, %v2514_v18 }
 0x42b   :  { %v6676_v26 = vmul.f32 -1.442695, %v2676_v23  ;;  %v2525_v23 = vld [vmem:[#allocation2 + $0x158] sm:$0xff] }
 0x42c   :  { %v6675_v9 = vmul.f32 -1.442695, %v2675_v24  ;;  %v8022_v29 = vpop.f32.mrb[82].mxu0  ;;  %v2524_v24 = vld [vmem:[#allocation2 + $0x150] sm:$0xff] }
 0x42d   :  { %8893 = vpow2.f32 %v6676_v26  ;;  %v2678_v30 = vadd.f32 %v8022_v29, %v2517_v27  ;;  %v2606_v32 = vpop.f32.mrb[83].mxu0 }
 0x42e   :  { %8895 = vpow2.f32 %v6675_v9  ;;  %v2677_v36 = vadd.f32 %v2606_v32, %v2516_v35  ;;  %v2527_v35 = vld [vmem:[#allocation2 + $0x168] sm:$0xff] }
 0x42f   :  { %v6678_v33 = vmul.f32 -1.442695, %v2678_v30 }
 0x430   :  { %v8025_v42 = vpop.f32.mrb[84].mxu0  ;;  %v6677_v56 = vmul.f32 -1.442695, %v2677_v36 }
 0x431   :  { %8897 = vpow2.f32 %v6678_v33  ;;  %v2680_v43 = vadd.f32 %v8025_v42, %v2519_v38  ;;  %v2616_v47 = vpop.f32.mrb[85].mxu0 }
 0x432   :  { %v2679_v49 = vadd.f32 %v2616_v47, %v2518_v45  ;;  %v2526_v47 = vld [vmem:[#allocation2 + $0x160] sm:$0xff] }
 0x433   :  { %v6680_v54 = vmul.f32 -1.442695, %v2680_v43 }
 0x434   :  { %v6679_v39 = vmul.f32 -1.442695, %v2679_v49  ;;  %v8028_v8 = vpop.f32.mrb[86].mxu0 }
 0x435   :  { %8899 = vpow2.f32 %v6680_v54  ;;  %v2682_v59 = vadd.f32 %v8028_v8, %v2521_v58  ;;  %v2626_v62 = vpop.f32.mrb[87].mxu0 }
 0x436   :  { %8901 = vpow2.f32 %v6679_v39  ;;  %v2681_v0 = vadd.f32 %v2626_v62, %v2520_v1  ;;  %v2529_v39 = vld [vmem:[#allocation2 + $0x178] sm:$0xff] }
 0x437   :  { %v8894_v10 = vpop.eup %8893  ;;  %v6682_v28 = vmul.f32 -1.442695, %v2682_v59  ;;  %8903 = vpow2.f32 %v6677_v56 }
 0x438   :  { %v8896_v34 = vpop.eup %8895  ;;  %v2728_v37 = vadd.f32 1.0, %v8894_v10  ;;  %v6681_v3 = vmul.f32 -1.442695, %v2681_v0  ;;  %v8031_v6 = vpop.f32.mrb[88].mxu0  ;;  %v2528_v10 = vld [vmem:[#allocation2 + $0x170] sm:$0xff] }
 0x439   :  { %v2727_v21 = vadd.f32 1.0, %v8896_v34  ;;  %8905 = vpow2.f32 %v6682_v28  ;;  %v2684_v11 = vadd.f32 %v8031_v6, %v2523_v4  ;;  %v2636_v12 = vpop.f32.mrb[89].mxu0 }
 0x43a   :  { %v2683_v13 = vadd.f32 %v2636_v12, %v2522_v22  ;;  %8907 = vrcp.f32 %v2728_v37 }
 0x43b   :  { %v8898_v14 = vpop.eup %8897  ;;  %v6684_v15 = vmul.f32 -1.442695, %v2684_v11  ;;  %8909 = vpow2.f32 %v6681_v3 }
 0x43c   :  { %v2730_v16 = vadd.f32 1.0, %v8898_v14  ;;  %v6683_v17 = vmul.f32 -1.442695, %v2683_v13  ;;  %v8034_v18 = vpop.f32.mrb[90].mxu0  ;;  %8911 = vrcp.f32 %v2727_v21 }
 0x43d   :  { %v2686_v19 = vadd.f32 %v8034_v18, %v2525_v23  ;;  %v2646_v26 = vpop.f32.mrb[91].mxu0  ;;  %8913 = vpow2.f32 %v6684_v15 }
 0x43e   :  { %v2685_v9 = vadd.f32 %v2646_v26, %v2524_v24  ;;  %8915 = vrcp.f32 %v2730_v16 }
 0x43f   :  { %v8900_v27 = vpop.eup %8899  ;;  %v6686_v29 = vmul.f32 -1.442695, %v2686_v19  ;;  %8917 = vpow2.f32 %v6683_v17 }
 0x440   :  { %v8902_v30 = vpop.eup %8901  ;;  %v2732_v32 = vadd.f32 1.0, %v8900_v27  ;;  %v6685_v33 = vmul.f32 -1.442695, %v2685_v9  ;;  %v8037_v36 = vpop.f32.mrb[92].mxu0 }
 0x441   :  { %v2731_v38 = vadd.f32 1.0, %v8902_v30  ;;  %8919 = vpow2.f32 %v6686_v29  ;;  %v2688_v42 = vadd.f32 %v8037_v36, %v2527_v35  ;;  %v2656_v43 = vpop.f32.mrb[93].mxu0  ;;  %v8904_v45 = vpop.eup %8903 }
 0x442   :  { %8921 = vrcp.f32 %v2732_v32  ;;  %v2687_v54 = vadd.f32 %v2656_v43, %v2526_v47  ;;  %v2729_v0 = vadd.f32 1.0, %v8904_v45 }
 0x443   :  { %v8906_v49 = vpop.eup %8905  ;;  %8923 = vrcp.f32 %v2731_v38 }
 0x444   :  { %v2734_v56 = vadd.f32 1.0, %v8906_v49  ;;  %8925 = vpow2.f32 %v6685_v33  ;;  %v8040_v58 = vpop.f32.mrb[94].mxu0  ;;  %v8908_v8 = vpop.eup %8907 }
 0x445   :  { %8927 = vtanh.f32 %v2688_v42  ;;  %v2690_v59 = vadd.f32 %v8040_v58, %v2529_v39  ;;  %v2666_v1 = vpop.f32.mrb[95].mxu0  ;;  %v8910_v62 = vpop.eup %8909 }
 0x446   :  { %8929 = vrcp.f32 %v2734_v56  ;;  %v8912_v28 = vpop.eup %8911  ;;  %v2733_v34 = vadd.f32 1.0, %v8910_v62  ;;  %v2689_v37 = vadd.f32 %v2666_v1, %v2528_v10  ;;  %v2792_v10 = vld [vmem:[#allocation2 + $0x1a8] sm:$0xff] }
 0x447   :  { %8931 = vtanh.f32 %v2687_v54  ;;  %v8914_v3 = vpop.eup %8913 }
 0x448   :  { %8933 = vtanh.f32 %v2690_v59  ;;  %v8916_v4 = vpop.eup %8915  ;;  %v2736_v15 = vadd.f32 1.0, %v8914_v3 }
 0x449   :  { %8935 = vrcp.f32 %v2733_v34  ;;  %v8918_v6 = vpop.eup %8917  ;;  %v2791_v34 = vld [vmem:[#allocation2 + $0x1a0] sm:$0xff] }
 0x44a   :  { %8937 = vrcp.f32 %v2729_v0  ;;  %v2735_v24 = vadd.f32 1.0, %v8918_v6 }
 0x44b   :  { %v8920_v21 = vpop.eup %8919  ;;  %8939 = vtanh.f32 %v2689_v37 }
 0x44c   :  { %v8922_v11 = vpop.eup %8921  ;;  %8941 = vrcp.f32 %v2736_v15  ;;  %v2738_v33 = vadd.f32 1.0, %v8920_v21 }
 0x44d   :  { %v8924_v22 = vpop.eup %8923  ;;  %v2768_v13 = vmul.f32 %v8922_v11, %v10769_v52  ;;  %v2794_v11 = vld [vmem:[#allocation2 + $0x1b8] sm:$0xff] }
 0x44e   :  { %v8926_v12 = vpop.eup %8925  ;;  %v2767_v17 = vmul.f32 %v8924_v22, %v10773_v60 }
 0x44f   :  { %v8928_v14 = vpop.eup %8927  ;;  %v2737_v36 = vadd.f32 1.0, %v8926_v12 }
 0x450   :  { %v8930_v16 = vpop.eup %8929  ;;  %v2772_v23 = vmul.f32 %v8928_v14, %v8908_v8 }
 0x451   :  { %v8932_v18 = vpop.eup %8931  ;;  %v2770_v19 = vmul.f32 %v8930_v16, %v10775_v5 }
 0x452   :  { %v8934_v26 = vpop.eup %8933  ;;  %v10817_v9 = vadd.f32 %v2772_v23, %v2768_v13  ;;  %v2771_v27 = vmul.f32 %v8932_v18, %v8912_v28  ;;  %v2793_v13 = vld [vmem:[#allocation2 + $0x1b0] sm:$0xff] }
 0x453   :  { %v8936_v29 = vpop.eup %8935  ;;  %v2774_v30 = vmul.f32 %v8934_v26, %v8916_v4 }
 0x454   :  { %v8938_v32 = vpop.eup %8937  ;;  %v2769_v52 = vmul.f32 %v8936_v29, %v10779_v20  ;;  %8943 = vtanh.f32 %v10817_v9  ;;  %v10821_v35 = vadd.f32 %v2771_v27, %v2767_v17 }
 0x455   :  { %v8940_v60 = vpop.eup %8939  ;;  %8945 = vrcp.f32 %v2735_v24  ;;  %v10823_v5 = vadd.f32 %v2774_v30, %v2770_v19  ;;  %v2796_v24 = vld [vmem:[#allocation2 + $0x1c8] sm:$0xff]  ;;  %v2795_v30 = vld [vmem:[#allocation2 + $0x1c0] sm:$0xff] }
 0x456   :  { %8947 = vtanh.f32 %v10821_v35  ;;  %v2773_v38 = vmul.f32 %v8940_v60, %v8938_v32  ;;  %v8942_v20 = vpop.eup %8941 }
 0x457   :  { %8949 = vtanh.f32 %v10823_v5 }
 0x458   :  { %8951 = vrcp.f32 %v2738_v33  ;;  %v10827_v42 = vadd.f32 %v2773_v38, %v2769_v52 }
 0x459   :  { %8953 = vrcp.f32 %v2737_v36 }
 0x45a   :  { %8955 = vtanh.f32 %v10827_v42 }
 0x45e   :  { %v8944_v43 = vpop.eup %8943 }
 0x45f   :  { %v8946_v45 = vpop.eup %8945  ;;  %v2784_v47 = vmul.f32 %v8944_v43, %v8942_v20  ;;  %v2798_v20 = vld [vmem:[#allocation2 + $0x1d8] sm:$0xff] }
 0x460   :  { %v8948_v49 = vpop.eup %8947 }
 0x461   :  { %v8950_v54 = vpop.eup %8949  ;;  %v2783_v56 = vmul.f32 %v8948_v49, %v8946_v45 }
 0x462   :  { %v8952_v39 = vpop.eup %8951 }
 0x463   :  { %v8954_v58 = vpop.eup %8953  ;;  %v8539_v8 = vpack.c.bf16 %v2784_v47, %v2783_v56  ;;  %v2786_v59 = vmul.f32 %v8952_v39, %v8950_v54  ;;  %v2797_v47 = vld [vmem:[#allocation2 + $0x1d0] sm:$0xff] }
 0x464   :  { %v8956_v1 = vpop.eup %8955 }
 0x465   :  { %8540 = vmatprep.subr.bf16.mxu1 %v8539_v8  ;;  %v2785_v62 = vmul.f32 %v8956_v1, %v8954_v58  ;;  %v2800_v1 = vld [vmem:[#allocation2 + $0x1e8] sm:$0xff] }
 0x466   :  { %8542 = vmatpush3.bf16.msra.mxu1 %v8539_v8 }
 0x467   :  { %v8543_v0 = vpack.c.bf16 %v2786_v59, %v2785_v62 }
 0x469   :  { %8544 = vmatprep.subr.bf16.mxu1 %v8543_v0 }
 0x46a   :  { %8546 = vmatpush3.bf16.msra.mxu1 %v8543_v0 }
 0x46d   :  { %8050 = vmatmul.mubr.msk.f32.vlgmr.msra.gmra.mrb[80].mxu1 %vm1935_vm6, %v10617_v44  ;;  %v2788_v44 = vld [vmem:[#allocation2 + $0x188] sm:$0xff] }
 0x46e   :  { %8052 = vmatprep.mubr.msk.f32.mxu1 %vm1935_vm6, %v10624_v46 }
 0x471   :  { %8053 = vmatmul.mubr.msk.f32.gmra.mrb[82].mxu1 %vm1935_vm6, %v10633_v48 }
 0x472   :  { %8055 = vmatprep.mubr.msk.f32.mxu1 %vm1935_vm6, %v10640_v50  ;;  %v2787_v50 = vld [vmem:[#allocation2 + $0x180] sm:$0xff] }
 0x475   :  { %8056 = vmatmul.mubr.msk.f32.gmra.mrb[84].mxu1 %vm1935_vm6, %v10649_v53 }
 0x476   :  { %8058 = vmatprep.mubr.msk.f32.mxu1 %vm1935_vm6, %v10656_v55 }
 0x479   :  { %8059 = vmatmul.mubr.msk.f32.gmra.mrb[86].mxu1 %vm1935_vm6, %v10665_v57 }
 0x47a   :  { %8061 = vmatprep.mubr.msk.f32.mxu1 %vm1935_vm6, %v10672_v40 }
 0x47d   :  { %8062 = vmatmul.mubr.msk.f32.gmra.mrb[88].mxu1 %vm1935_vm6, %v10681_v41  ;;  %v2790_v41 = vld [vmem:[#allocation2 + $0x198] sm:$0xff] }
 0x47e   :  { %8064 = vmatprep.mubr.msk.f32.mxu1 %vm1935_vm6, %v10688_v51 }
 0x481   :  { %8065 = vmatmul.mubr.msk.f32.gmra.mrb[90].mxu1 %vm1935_vm6, %v10697_v61 }
 0x482   :  { %8067 = vmatprep.mubr.msk.f32.mxu1 %vm1935_vm6, %v10704_v63 }
 0x485   :  { %8068 = vmatmul.mubr.msk.f32.gmra.mrb[92].mxu1 %vm1935_vm6, %v10713_v7 }
 0x486   :  { %8070 = vmatprep.mubr.msk.f32.mxu1 %vm1935_vm6, %v10720_v25  ;;  %v2789_v25 = vld [vmem:[#allocation2 + $0x190] sm:$0xff] }
 0x489   :  { %8071 = vmatmul.mubr.msk.f32.gmra.mrb[94].mxu1 %vm1935_vm6, %v10729_v31 }
 0x48a   :  { %8113 = vmatprep.mubr.msk.f32.mxu1 %vm1935_vm6, %v10737_v2 }
 0x540   :  { %v8051_v46 = vpop.f32.mrb[80].mxu1 }
 0x541   :  { %v2949_v48 = vadd.f32 %v8051_v46, %v2788_v44  ;;  %v2869_v53 = vpop.f32.mrb[81].mxu1 }
 0x542   :  { %v2948_v55 = vadd.f32 %v2869_v53, %v2787_v50  ;;  %v2799_v50 = vld [vmem:[#allocation2 + $0x1e0] sm:$0xff] }
 0x543   :  { %v6704_v57 = vmul.f32 -1.442695, %v2949_v48 }
 0x544   :  { %v6703_v40 = vmul.f32 -1.442695, %v2948_v55  ;;  %v8054_v51 = vpop.f32.mrb[82].mxu1 }
 0x545   :  { %8957 = vpow2.f32 %v6704_v57  ;;  %v2951_v61 = vadd.f32 %v8054_v51, %v2790_v41  ;;  %v2879_v63 = vpop.f32.mrb[83].mxu1 }
 0x546   :  { %8959 = vpow2.f32 %v6703_v40  ;;  %v2950_v31 = vadd.f32 %v2879_v63, %v2789_v25  ;;  %v2802_v40 = vld [vmem:[#allocation2 + $0x1f8] sm:$0xff] }
 0x547   :  { %v6706_v7 = vmul.f32 -1.442695, %v2951_v61 }
 0x548   :  { %v8057_v28 = vpop.f32.mrb[84].mxu1  ;;  %v6705_v6 = vmul.f32 -1.442695, %v2950_v31  ;;  %v2801_v31 = vld [vmem:[#allocation2 + $0x1f0] sm:$0xff] }
 0x549   :  { %8961 = vpow2.f32 %v6706_v7  ;;  %v2953_v2 = vadd.f32 %v8057_v28, %v2792_v10  ;;  %v2889_v37 = vpop.f32.mrb[85].mxu1 }
 0x54a   :  { %v2952_v3 = vadd.f32 %v2889_v37, %v2791_v34 }
 0x54b   :  { %v6708_v4 = vmul.f32 -1.442695, %v2953_v2 }
 0x54c   :  { %v6707_v21 = vmul.f32 -1.442695, %v2952_v3  ;;  %v8060_v22 = vpop.f32.mrb[86].mxu1 }
 0x54d   :  { %8963 = vpow2.f32 %v6708_v4  ;;  %v2955_v12 = vadd.f32 %v8060_v22, %v2794_v11  ;;  %v2899_v14 = vpop.f32.mrb[87].mxu1 }
 0x54e   :  { %8965 = vpow2.f32 %v6707_v21  ;;  %v2954_v15 = vadd.f32 %v2899_v14, %v2793_v13 }
 0x54f   :  { %v8958_v16 = vpop.eup %8957  ;;  %v6710_v17 = vmul.f32 -1.442695, %v2955_v12  ;;  %8967 = vpow2.f32 %v6705_v6 }
 0x550   :  { %v8960_v23 = vpop.eup %8959  ;;  %v3001_v18 = vadd.f32 1.0, %v8958_v16  ;;  %v6709_v19 = vmul.f32 -1.442695, %v2954_v15  ;;  %v8063_v26 = vpop.f32.mrb[88].mxu1 }
 0x551   :  { %v3000_v27 = vadd.f32 1.0, %v8960_v23  ;;  %8969 = vpow2.f32 %v6710_v17  ;;  %v2957_v29 = vadd.f32 %v8063_v26, %v2796_v24  ;;  %v2909_v32 = vpop.f32.mrb[89].mxu1 }
 0x552   :  { %v2956_v52 = vadd.f32 %v2909_v32, %v2795_v30  ;;  %8971 = vrcp.f32 %v3001_v18 }
 0x553   :  { %v8962_v33 = vpop.eup %8961  ;;  %v6712_v60 = vmul.f32 -1.442695, %v2957_v29  ;;  %8973 = vpow2.f32 %v6709_v19 }
 0x554   :  { %v3003_v36 = vadd.f32 1.0, %v8962_v33  ;;  %v6711_v38 = vmul.f32 -1.442695, %v2956_v52  ;;  %v8066_v43 = vpop.f32.mrb[90].mxu1  ;;  %8975 = vrcp.f32 %v3000_v27 }
 0x555   :  { %v2959_v45 = vadd.f32 %v8066_v43, %v2798_v20  ;;  %v2919_v49 = vpop.f32.mrb[91].mxu1  ;;  %8977 = vpow2.f32 %v6712_v60 }
 0x556   :  { %v2958_v54 = vadd.f32 %v2919_v49, %v2797_v47  ;;  %8979 = vrcp.f32 %v3003_v36 }
 0x557   :  { %v8964_v56 = vpop.eup %8963  ;;  %v6714_v39 = vmul.f32 -1.442695, %v2959_v45  ;;  %8981 = vpow2.f32 %v6711_v38 }
 0x558   :  { %v8966_v58 = vpop.eup %8965  ;;  %v3005_v8 = vadd.f32 1.0, %v8964_v56  ;;  %v6713_v59 = vmul.f32 -1.442695, %v2958_v54  ;;  %v8069_v62 = vpop.f32.mrb[92].mxu1 }
 0x559   :  { %v3004_v0 = vadd.f32 1.0, %v8966_v58  ;;  %8983 = vpow2.f32 %v6714_v39  ;;  %v2961_v44 = vadd.f32 %v8069_v62, %v2800_v1  ;;  %v2929_v46 = vpop.f32.mrb[93].mxu1  ;;  %v8968_v48 = vpop.eup %8967  ;;  %v10881_v62 = vld [vmem:[%s11702_s2 + $0x8] sm:$0xff] }
 0x55a   :  { %8985 = vrcp.f32 %v3005_v8  ;;  %v2960_v55 = vadd.f32 %v2929_v46, %v2799_v50  ;;  %v3002_v25 = vadd.f32 1.0, %v8968_v48  ;;  %v10902_v46 = vld [vmem:[%s11702_s2 + $0x20] sm:$0xff]  ;;  %v10909_v48 = vld [vmem:[%s11702_s2 + $0x28] sm:$0xff]  ;;  %v10916_v50 = vld [vmem:[%s11702_s2 + $0x30] sm:$0xff] }
 0x55b   :  { %v8970_v53 = vpop.eup %8969  ;;  %8987 = vrcp.f32 %v3004_v0  ;;  %v10888_v0 = vld [vmem:[%s11702_s2 + $0x10] sm:$0xff] }
 0x55c   :  { %v3007_v57 = vadd.f32 1.0, %v8970_v53  ;;  %8989 = vpow2.f32 %v6713_v59  ;;  %v8072_v41 = vpop.f32.mrb[94].mxu1  ;;  %v8972_v51 = vpop.eup %8971  ;;  %v10923_v53 = vld [vmem:[%s11702_s2 + $0x38] sm:$0xff] }
 0x55d   :  { %8991 = vtanh.f32 %v2961_v44  ;;  %v2963_v61 = vadd.f32 %v8072_v41, %v2802_v40  ;;  %v2939_v63 = vpop.f32.mrb[95].mxu1  ;;  %v8974_v7 = vpop.eup %8973  ;;  %v10895_v44 = vld [vmem:[%s11702_s2 + $0x18] sm:$0xff]  ;;  %v10944_v40 = vld [vmem:[%s11702_s2 + $0x50] sm:$0xff] }
 0x55e   :  { %8993 = vrcp.f32 %v3007_v57  ;;  %v8976_v10 = vpop.eup %8975  ;;  %v3006_v28 = vadd.f32 1.0, %v8974_v7  ;;  %v2962_v2 = vadd.f32 %v2939_v63, %v2801_v31  ;;  %v10937_v57 = vld [vmem:[%s11702_s2 + $0x48] sm:$0xff]  ;;  %v10951_v41 = vld [vmem:[%s11702_s2 + $0x58] sm:$0xff]  ;;  %v10972_v63 = vld [vmem:[%s11702_s2 + $0x70] sm:$0xff] }
 0x55f   :  { %8995 = vtanh.f32 %v2960_v55  ;;  %v8978_v34 = vpop.eup %8977  ;;  %v10930_v55 = vld [vmem:[%s11702_s2 + $0x40] sm:$0xff]  ;;  %v10979_v7 = vld [vmem:[%s11702_s2 + $0x78] sm:$0xff]  ;;  %v3061_v31 = vld [vmem:[#allocation2 + $0x208] sm:$0xff] }
 0x560   :  { %8997 = vtanh.f32 %v2963_v61  ;;  %v8980_v37 = vpop.eup %8979  ;;  %v3009_v13 = vadd.f32 1.0, %v8978_v34  ;;  %v10965_v61 = vld [vmem:[%s11702_s2 + $0x68] sm:$0xff] }
 0x561   :  { %8999 = vrcp.f32 %v3006_v28  ;;  %v8982_v3 = vpop.eup %8981 }
 0x562   :  { %9001 = vrcp.f32 %v3002_v25  ;;  %v3008_v18 = vadd.f32 1.0, %v8982_v3  ;;  %v10986_v25 = vld [vmem:[%s11702_s2] sm:$0xff] }
 0x563   :  { %v8984_v4 = vpop.eup %8983  ;;  %9003 = vtanh.f32 %v2962_v2  ;;  %v3060_v2 = vld [vmem:[#allocation2 + $0x200] sm:$0xff] }
 0x564   :  { %v8986_v6 = vpop.eup %8985  ;;  %9005 = vrcp.f32 %v3009_v13  ;;  %v3011_v32 = vadd.f32 1.0, %v8984_v4  ;;  %v3062_v13 = vld [vmem:[#allocation2 + $0x210] sm:$0xff] }
 0x565   :  { %v8988_v21 = vpop.eup %8987  ;;  %v3041_v22 = vmul.f32 %v8986_v6, %v10817_v9  ;;  %v3063_v6 = vld [vmem:[#allocation2 + $0x218] sm:$0xff] }
 0x566   :  { %v8990_v11 = vpop.eup %8989  ;;  %v3040_v15 = vmul.f32 %v8988_v21, %v10821_v35 }
 0x567   :  { %v8992_v12 = vpop.eup %8991  ;;  %v3010_v33 = vadd.f32 1.0, %v8990_v11 }
 0x568   :  { %v8994_v14 = vpop.eup %8993  ;;  %v3045_v16 = vmul.f32 %v8992_v12, %v8972_v51  ;;  %v10958_v51 = vld [vmem:[%s11702_s2 + $0x60] sm:$0xff] }
 0x569   :  { %v8996_v17 = vpop.eup %8995  ;;  %v3043_v23 = vmul.f32 %v8994_v14, %v10823_v5 }
 0x56a   :  { %v8998_v19 = vpop.eup %8997  ;;  %v10865_v24 = vadd.f32 %v3045_v16, %v3041_v22  ;;  %v3044_v26 = vmul.f32 %v8996_v17, %v8976_v10 }
 0x56b   :  { %v9000_v27 = vpop.eup %8999  ;;  %v3047_v29 = vmul.f32 %v8998_v19, %v8980_v37 }
 0x56c   :  { %v9002_v30 = vpop.eup %9001  ;;  %v3042_v9 = vmul.f32 %v9000_v27, %v10827_v42  ;;  %9007 = vtanh.f32 %v10865_v24  ;;  %v10869_v52 = vadd.f32 %v3044_v26, %v3040_v15  ;;  %v3065_v15 = vld [vmem:[#allocation2 + $0x228] sm:$0xff] }
 0x56d   :  { %v9004_v35 = vpop.eup %9003  ;;  %9009 = vrcp.f32 %v3008_v18  ;;  %v10871_v5 = vadd.f32 %v3047_v29, %v3043_v23  ;;  %v3064_v23 = vld [vmem:[#allocation2 + $0x220] sm:$0xff] }
 0x56e   :  { %9011 = vtanh.f32 %v10869_v52  ;;  %v3046_v60 = vmul.f32 %v9004_v35, %v9002_v30  ;;  %v9006_v42 = vpop.eup %9005  ;;  %v3067_v30 = vld [vmem:[#allocation2 + $0x238] sm:$0xff]  ;;  %v3066_v35 = vld [vmem:[#allocation2 + $0x230] sm:$0xff] }
 0x56f   :  { %9013 = vtanh.f32 %v10871_v5 }
 0x570   :  { %9015 = vrcp.f32 %v3011_v32  ;;  %v10875_v36 = vadd.f32 %v3046_v60, %v3042_v9 }
 0x571   :  { %9017 = vrcp.f32 %v3010_v33 }
 0x572   :  { %9019 = vtanh.f32 %v10875_v36 }
 0x576   :  { %v9008_v38 = vpop.eup %9007 }
 0x577   :  { %v9010_v20 = vpop.eup %9009  ;;  %v3057_v43 = vmul.f32 %v9008_v38, %v9006_v42 }
 0x578   :  { %v9012_v45 = vpop.eup %9011 }
 0x579   :  { %v9014_v47 = vpop.eup %9013  ;;  %v3056_v49 = vmul.f32 %v9012_v45, %v9010_v20 }
 0x57a   :  { %v9016_v54 = vpop.eup %9015 }
 0x57b   :  { %v9018_v56 = vpop.eup %9017  ;;  %v8547_v39 = vpack.c.bf16 %v3057_v43, %v3056_v49  ;;  %v3059_v58 = vmul.f32 %v9016_v54, %v9014_v47  ;;  %v3069_v47 = vld [vmem:[#allocation2 + $0x248] sm:$0xff] }
 0x57c   :  { %v9020_v8 = vpop.eup %9019 }
 0x57d   :  { %8548 = vmatprep.subr.bf16.mxu0 %v8547_v39  ;;  %v3058_v59 = vmul.f32 %v9020_v8, %v9018_v56 }
 0x57e   :  { %8550 = vmatpush3.bf16.msra.mxu0 %v8547_v39  ;;  %v3068_v39 = vld [vmem:[#allocation2 + $0x240] sm:$0xff] }
 0x57f   :  { %v8551_v1 = vpack.c.bf16 %v3059_v58, %v3058_v59 }
 0x581   :  { %8552 = vmatprep.subr.bf16.mxu0 %v8551_v1 }
 0x582   :  { %8554 = vmatpush3.bf16.msra.mxu0 %v8551_v1 }
 0x585   :  { %8082 = vmatmul.mubr.msk.f32.vlgmr.msra.gmra.mrb[96].mxu0 %vm1935_vm6, %v10881_v62 }
 0x586   :  { %8084 = vmatprep.mubr.msk.f32.mxu0 %vm1935_vm6, %v10888_v0 }
 0x589   :  { %8085 = vmatmul.mubr.msk.f32.gmra.mrb[98].mxu0 %vm1935_vm6, %v10895_v44 }
 0x58a   :  { %8087 = vmatprep.mubr.msk.f32.mxu0 %vm1935_vm6, %v10902_v46 }
 0x58d   :  { %8088 = vmatmul.mubr.msk.f32.gmra.mrb[100].mxu0 %vm1935_vm6, %v10909_v48 }
 0x58e   :  { %8090 = vmatprep.mubr.msk.f32.mxu0 %vm1935_vm6, %v10916_v50 }
 0x591   :  { %8091 = vmatmul.mubr.msk.f32.gmra.mrb[102].mxu0 %vm1935_vm6, %v10923_v53 }
 0x592   :  { %8093 = vmatprep.mubr.msk.f32.mxu0 %vm1935_vm6, %v10930_v55 }
 0x595   :  { %8094 = vmatmul.mubr.msk.f32.gmra.mrb[104].mxu0 %vm1935_vm6, %v10937_v57 }
 0x596   :  { %8096 = vmatprep.mubr.msk.f32.mxu0 %vm1935_vm6, %v10944_v40 }
 0x599   :  { %8097 = vmatmul.mubr.msk.f32.gmra.mrb[106].mxu0 %vm1935_vm6, %v10951_v41 }
 0x59a   :  { %8099 = vmatprep.mubr.msk.f32.mxu0 %vm1935_vm6, %v10958_v51 }
 0x59d   :  { %8100 = vmatmul.mubr.msk.f32.gmra.mrb[108].mxu0 %vm1935_vm6, %v10965_v61 }
 0x59e   :  { %8102 = vmatprep.mubr.msk.f32.mxu0 %vm1935_vm6, %v10972_v63 }
 0x5a1   :  { %8103 = vmatmul.mubr.msk.f32.gmra.mrb[110].mxu0 %vm1935_vm6, %v10979_v7 }
 0x5a2   :  { %8145 = vmatprep.mubr.msk.f32.mxu0 %vm1935_vm6, %v10986_v25 }
 0x658   :  { %v8083_v10 = vpop.f32.mrb[96].mxu0 }
 0x659   :  { %v3222_v28 = vadd.f32 %v8083_v10, %v3061_v31  ;;  %v3142_v34 = vpop.f32.mrb[97].mxu0 }
 0x65a   :  { %v3221_v37 = vadd.f32 %v3142_v34, %v3060_v2 }
 0x65b   :  { %v6732_v3 = vmul.f32 -1.442695, %v3222_v28  ;;  %v3071_v28 = vld [vmem:[#allocation2 + $0x258] sm:$0xff] }
 0x65c   :  { %v6731_v4 = vmul.f32 -1.442695, %v3221_v37  ;;  %v8086_v21 = vpop.f32.mrb[98].mxu0  ;;  %v3070_v37 = vld [vmem:[#allocation2 + $0x250] sm:$0xff] }
 0x65d   :  { %9021 = vpow2.f32 %v6732_v3  ;;  %v3224_v11 = vadd.f32 %v8086_v21, %v3063_v6  ;;  %v3152_v22 = vpop.f32.mrb[99].mxu0 }
 0x65e   :  { %9023 = vpow2.f32 %v6731_v4  ;;  %v3223_v14 = vadd.f32 %v3152_v22, %v3062_v13  ;;  %v3073_v13 = vld [vmem:[#allocation2 + $0x268] sm:$0xff] }
 0x65f   :  { %v6734_v12 = vmul.f32 -1.442695, %v3224_v11 }
 0x660   :  { %v8089_v16 = vpop.f32.mrb[100].mxu0  ;;  %v6733_v27 = vmul.f32 -1.442695, %v3223_v14 }
 0x661   :  { %9025 = vpow2.f32 %v6734_v12  ;;  %v3226_v17 = vadd.f32 %v8089_v16, %v3065_v15  ;;  %v3162_v18 = vpop.f32.mrb[101].mxu0 }
 0x662   :  { %v3225_v19 = vadd.f32 %v3162_v18, %v3064_v23  ;;  %v3072_v18 = vld [vmem:[#allocation2 + $0x260] sm:$0xff] }
 0x663   :  { %v6736_v26 = vmul.f32 -1.442695, %v3226_v17 }
 0x664   :  { %v6735_v29 = vmul.f32 -1.442695, %v3225_v19  ;;  %v8092_v9 = vpop.f32.mrb[102].mxu0 }
 0x665   :  { %9027 = vpow2.f32 %v6736_v26  ;;  %v3228_v32 = vadd.f32 %v8092_v9, %v3067_v30  ;;  %v3172_v33 = vpop.f32.mrb[103].mxu0 }
 0x666   :  { %9029 = vpow2.f32 %v6735_v29  ;;  %v3227_v60 = vadd.f32 %v3172_v33, %v3066_v35  ;;  %v3075_v29 = vld [vmem:[#allocation2 + $0x278] sm:$0xff] }
 0x667   :  { %v9022_v42 = vpop.eup %9021  ;;  %v6738_v38 = vmul.f32 -1.442695, %v3228_v32  ;;  %9031 = vpow2.f32 %v6733_v27 }
 0x668   :  { %v9024_v20 = vpop.eup %9023  ;;  %v3274_v43 = vadd.f32 1.0, %v9022_v42  ;;  %v6737_v45 = vmul.f32 -1.442695, %v3227_v60  ;;  %v8095_v49 = vpop.f32.mrb[104].mxu0  ;;  %v3074_v42 = vld [vmem:[#allocation2 + $0x270] sm:$0xff] }
 0x669   :  { %v3273_v54 = vadd.f32 1.0, %v9024_v20  ;;  %9033 = vpow2.f32 %v6738_v38  ;;  %v3230_v56 = vadd.f32 %v8095_v49, %v3069_v47  ;;  %v3182_v58 = vpop.f32.mrb[105].mxu0 }
 0x66a   :  { %v3229_v8 = vadd.f32 %v3182_v58, %v3068_v39  ;;  %9035 = vrcp.f32 %v3274_v43 }
 0x66b   :  { %v9026_v59 = vpop.eup %9025  ;;  %v6740_v1 = vmul.f32 -1.442695, %v3230_v56  ;;  %9037 = vpow2.f32 %v6737_v45 }
 0x66c   :  { %v3276_v31 = vadd.f32 1.0, %v9026_v59  ;;  %v6739_v10 = vmul.f32 -1.442695, %v3229_v8  ;;  %v8098_v2 = vpop.f32.mrb[106].mxu0  ;;  %9039 = vrcp.f32 %v3273_v54 }
 0x66d   :  { %v3232_v34 = vadd.f32 %v8098_v2, %v3071_v28  ;;  %v3192_v3 = vpop.f32.mrb[107].mxu0  ;;  %9041 = vpow2.f32 %v6740_v1 }
 0x66e   :  { %v3231_v4 = vadd.f32 %v3192_v3, %v3070_v37  ;;  %9043 = vrcp.f32 %v3276_v31 }
 0x66f   :  { %v9028_v6 = vpop.eup %9027  ;;  %v6742_v21 = vmul.f32 -1.442695, %v3232_v34  ;;  %9045 = vpow2.f32 %v6739_v10 }
 0x670   :  { %v9030_v11 = vpop.eup %9029  ;;  %v3278_v22 = vadd.f32 1.0, %v9028_v6  ;;  %v6741_v12 = vmul.f32 -1.442695, %v3231_v4  ;;  %v8101_v14 = vpop.f32.mrb[108].mxu0 }
 0x671   :  { %v3277_v15 = vadd.f32 1.0, %v9030_v11  ;;  %9047 = vpow2.f32 %v6742_v21  ;;  %v3234_v16 = vadd.f32 %v8101_v14, %v3073_v13  ;;  %v3202_v17 = vpop.f32.mrb[109].mxu0  ;;  %v9032_v23 = vpop.eup %9031 }
 0x672   :  { %9049 = vrcp.f32 %v3278_v22  ;;  %v3233_v26 = vadd.f32 %v3202_v17, %v3072_v18  ;;  %v3275_v60 = vadd.f32 1.0, %v9032_v23 }
 0x673   :  { %v9034_v19 = vpop.eup %9033  ;;  %9051 = vrcp.f32 %v3277_v15 }
 0x674   :  { %v3280_v27 = vadd.f32 1.0, %v9034_v19  ;;  %9053 = vpow2.f32 %v6741_v12  ;;  %v8104_v30 = vpop.f32.mrb[110].mxu0  ;;  %v9036_v9 = vpop.eup %9035 }
 0x675   :  { %9055 = vtanh.f32 %v3234_v16  ;;  %v3236_v32 = vadd.f32 %v8104_v30, %v3075_v29  ;;  %v3212_v35 = vpop.f32.mrb[111].mxu0  ;;  %v9038_v33 = vpop.eup %9037 }
 0x676   :  { %9057 = vrcp.f32 %v3280_v27  ;;  %v9040_v38 = vpop.eup %9039  ;;  %v3279_v20 = vadd.f32 1.0, %v9038_v33  ;;  %v3235_v43 = vadd.f32 %v3212_v35, %v3074_v42  ;;  %v3334_v42 = vld [vmem:[#allocation2 + $0x288] sm:$0xff] }
 0x677   :  { %9059 = vtanh.f32 %v3233_v26  ;;  %v9042_v45 = vpop.eup %9041 }
 0x678   :  { %9061 = vtanh.f32 %v3236_v32  ;;  %v9044_v47 = vpop.eup %9043  ;;  %v3282_v1 = vadd.f32 1.0, %v9042_v45 }
 0x679   :  { %9063 = vrcp.f32 %v3279_v20  ;;  %v9046_v49 = vpop.eup %9045 }
 0x67a   :  { %9065 = vrcp.f32 %v3275_v60  ;;  %v3281_v37 = vadd.f32 1.0, %v9046_v49 }
 0x67b   :  { %v9048_v54 = vpop.eup %9047  ;;  %9067 = vtanh.f32 %v3235_v43  ;;  %v3333_v43 = vld [vmem:[#allocation2 + $0x280] sm:$0xff] }
 0x67c   :  { %v9050_v56 = vpop.eup %9049  ;;  %9069 = vrcp.f32 %v3282_v1  ;;  %v3284_v12 = vadd.f32 1.0, %v9048_v54  ;;  %v3335_v1 = vld [vmem:[#allocation2 + $0x290] sm:$0xff] }
 0x67d   :  { %v9052_v39 = vpop.eup %9051  ;;  %v3314_v8 = vmul.f32 %v9050_v56, %v10865_v24  ;;  %v3336_v56 = vld [vmem:[#allocation2 + $0x298] sm:$0xff] }
 0x67e   :  { %v9054_v58 = vpop.eup %9053  ;;  %v3313_v10 = vmul.f32 %v9052_v39, %v10869_v52 }
 0x67f   :  { %v9056_v59 = vpop.eup %9055  ;;  %v3283_v14 = vadd.f32 1.0, %v9054_v58 }
 0x680   :  { %v9058_v31 = vpop.eup %9057  ;;  %v3318_v28 = vmul.f32 %v9056_v59, %v9036_v9 }
 0x681   :  { %v9060_v2 = vpop.eup %9059  ;;  %v3316_v34 = vmul.f32 %v9058_v31, %v10871_v5 }
 0x682   :  { %v9062_v3 = vpop.eup %9061  ;;  %v10993_v4 = vadd.f32 %v3318_v28, %v3314_v8  ;;  %v3317_v6 = vmul.f32 %v9060_v2, %v9040_v38  ;;  %v3337_v2 = vld [vmem:[#allocation2 + $0x2a0] sm:$0xff] }
 0x683   :  { %v9064_v21 = vpop.eup %9063  ;;  %v3320_v11 = vmul.f32 %v9062_v3, %v9044_v47 }
 0x684   :  { %v9066_v22 = vpop.eup %9065  ;;  %v3315_v24 = vmul.f32 %v9064_v21, %v10875_v36  ;;  %9071 = vtanh.f32 %v10993_v4  ;;  %v10997_v13 = vadd.f32 %v3317_v6, %v3313_v10  ;;  %v3338_v10 = vld [vmem:[#allocation2 + $0x2a8] sm:$0xff] }
 0x685   :  { %v9068_v52 = vpop.eup %9067  ;;  %9073 = vrcp.f32 %v3281_v37  ;;  %v10999_v5 = vadd.f32 %v3320_v11, %v3316_v34  ;;  %v3340_v11 = vld [vmem:[#allocation2 + $0x2b8] sm:$0xff] }
 0x686   :  { %9075 = vtanh.f32 %v10997_v13  ;;  %v3319_v15 = vmul.f32 %v9068_v52, %v9066_v22  ;;  %v9070_v36 = vpop.eup %9069 }
 0x687   :  { %9077 = vtanh.f32 %v10999_v5 }
 0x688   :  { %9079 = vrcp.f32 %v3284_v12  ;;  %v11003_v16 = vadd.f32 %v3319_v15, %v3315_v24  ;;  %v3339_v12 = vld [vmem:[#allocation2 + $0x2b0] sm:$0xff] }
 0x689   :  { %9081 = vrcp.f32 %v3283_v14 }
 0x68a   :  { %9083 = vtanh.f32 %v11003_v16 }
 0x68e   :  { %v9072_v17 = vpop.eup %9071 }
 0x68f   :  { %v9074_v23 = vpop.eup %9073  ;;  %v3330_v18 = vmul.f32 %v9072_v17, %v9070_v36 }
 0x690   :  { %v9076_v19 = vpop.eup %9075 }
 0x691   :  { %v9078_v26 = vpop.eup %9077  ;;  %v3329_v27 = vmul.f32 %v9076_v19, %v9074_v23  ;;  %v3342_v19 = vld [vmem:[#allocation2 + $0x2c8] sm:$0xff] }
 0x692   :  { %v9080_v29 = vpop.eup %9079 }
 0x693   :  { %v9082_v30 = vpop.eup %9081  ;;  %v8555_v9 = vpack.c.bf16 %v3330_v18, %v3329_v27  ;;  %v3332_v32 = vmul.f32 %v9080_v29, %v9078_v26 }
 0x694   :  { %v9084_v35 = vpop.eup %9083 }
 0x695   :  { %8556 = vmatprep.subr.bf16.mxu1 %v8555_v9  ;;  %v3331_v33 = vmul.f32 %v9084_v35, %v9082_v30  ;;  %v3341_v30 = vld [vmem:[#allocation2 + $0x2c0] sm:$0xff] }
 0x696   :  { %8558 = vmatpush3.bf16.msra.mxu1 %v8555_v9 }
 0x697   :  { %v8559_v60 = vpack.c.bf16 %v3332_v32, %v3331_v33 }
 0x699   :  { %8560 = vmatprep.subr.bf16.mxu1 %v8559_v60 }
 0x69a   :  { %8562 = vmatpush3.bf16.msra.mxu1 %v8559_v60 }
 0x69d   :  { %8114 = vmatmul.mubr.msk.f32.vlgmr.msra.gmra.mrb[96].mxu1 %vm1935_vm6, %v10881_v62 }
 0x69e   :  { %8116 = vmatprep.mubr.msk.f32.mxu1 %vm1935_vm6, %v10888_v0 }
 0x6a1   :  { %8117 = vmatmul.mubr.msk.f32.gmra.mrb[98].mxu1 %vm1935_vm6, %v10895_v44 }
 0x6a2   :  { %8119 = vmatprep.mubr.msk.f32.mxu1 %vm1935_vm6, %v10902_v46 }
 0x6a5   :  { %8120 = vmatmul.mubr.msk.f32.gmra.mrb[100].mxu1 %vm1935_vm6, %v10909_v48 }
 0x6a6   :  { %8122 = vmatprep.mubr.msk.f32.mxu1 %vm1935_vm6, %v10916_v50 }
 0x6a9   :  { %8123 = vmatmul.mubr.msk.f32.gmra.mrb[102].mxu1 %vm1935_vm6, %v10923_v53 }
 0x6aa   :  { %8125 = vmatprep.mubr.msk.f32.mxu1 %vm1935_vm6, %v10930_v55 }
 0x6ad   :  { %8126 = vmatmul.mubr.msk.f32.gmra.mrb[104].mxu1 %vm1935_vm6, %v10937_v57 }
 0x6ae   :  { %8128 = vmatprep.mubr.msk.f32.mxu1 %vm1935_vm6, %v10944_v40 }
 0x6b1   :  { %8129 = vmatmul.mubr.msk.f32.gmra.mrb[106].mxu1 %vm1935_vm6, %v10951_v41 }
 0x6b2   :  { %8131 = vmatprep.mubr.msk.f32.mxu1 %vm1935_vm6, %v10958_v51 }
 0x6b5   :  { %8132 = vmatmul.mubr.msk.f32.gmra.mrb[108].mxu1 %vm1935_vm6, %v10965_v61 }
 0x6b6   :  { %8134 = vmatprep.mubr.msk.f32.mxu1 %vm1935_vm6, %v10972_v63 }
 0x6b9   :  { %8135 = vmatmul.mubr.msk.f32.gmra.mrb[110].mxu1 %vm1935_vm6, %v10979_v7 }
 0x6ba   :  { %8177 = vmatprep.mubr.msk.f32.mxu1 %vm1935_vm6, %v10986_v25 }
 0x770   :  { %v8115_v38 = vpop.f32.mrb[96].mxu1 }
 0x771   :  { %v3495_v20 = vadd.f32 %v8115_v38, %v3334_v42  ;;  %v3415_v45 = vpop.f32.mrb[97].mxu1  ;;  %v3344_v38 = vld [vmem:[#allocation2 + $0x2d8] sm:$0xff] }
 0x772   :  { %v3494_v47 = vadd.f32 %v3415_v45, %v3333_v43  ;;  %v3343_v45 = vld [vmem:[#allocation2 + $0x2d0] sm:$0xff] }
 0x773   :  { %v6760_v49 = vmul.f32 -1.442695, %v3495_v20 }
 0x774   :  { %v6759_v54 = vmul.f32 -1.442695, %v3494_v47  ;;  %v8118_v39 = vpop.f32.mrb[98].mxu1 }
 0x775   :  { %9085 = vpow2.f32 %v6760_v49  ;;  %v3497_v58 = vadd.f32 %v8118_v39, %v3336_v56  ;;  %v3425_v8 = vpop.f32.mrb[99].mxu1 }
 0x776   :  { %9087 = vpow2.f32 %v6759_v54  ;;  %v3496_v31 = vadd.f32 %v3425_v8, %v3335_v1 }
 0x777   :  { %v6762_v59 = vmul.f32 -1.442695, %v3497_v58 }
 0x778   :  { %v8121_v28 = vpop.f32.mrb[100].mxu1  ;;  %v6761_v6 = vmul.f32 -1.442695, %v3496_v31 }
 0x779   :  { %9089 = vpow2.f32 %v6762_v59  ;;  %v3499_v25 = vadd.f32 %v8121_v28, %v3338_v10  ;;  %v3435_v34 = vpop.f32.mrb[101].mxu1  ;;  %v3346_v59 = vld [vmem:[#allocation2 + $0x2e8] sm:$0xff] }
 0x77a   :  { %v3498_v37 = vadd.f32 %v3435_v34, %v3337_v2  ;;  %v3345_v2 = vld [vmem:[#allocation2 + $0x2e0] sm:$0xff] }
 0x77b   :  { %v6764_v3 = vmul.f32 -1.442695, %v3499_v25 }
 0x77c   :  { %v6763_v21 = vmul.f32 -1.442695, %v3498_v37  ;;  %v8124_v22 = vpop.f32.mrb[102].mxu1 }
 0x77d   :  { %9091 = vpow2.f32 %v6764_v3  ;;  %v3501_v24 = vadd.f32 %v8124_v22, %v3340_v11  ;;  %v3445_v52 = vpop.f32.mrb[103].mxu1 }
 0x77e   :  { %9093 = vpow2.f32 %v6763_v21  ;;  %v3500_v14 = vadd.f32 %v3445_v52, %v3339_v12 }
 0x77f   :  { %v9086_v15 = vpop.eup %9085  ;;  %v6766_v36 = vmul.f32 -1.442695, %v3501_v24  ;;  %9095 = vpow2.f32 %v6761_v6  ;;  %v3348_v6 = vld [vmem:[#allocation2 + $0x2f8] sm:$0xff] }
 0x780   :  { %v9088_v17 = vpop.eup %9087  ;;  %v3547_v23 = vadd.f32 1.0, %v9086_v15  ;;  %v6765_v18 = vmul.f32 -1.442695, %v3500_v14  ;;  %v8127_v26 = vpop.f32.mrb[104].mxu1  ;;  %v3347_v14 = vld [vmem:[#allocation2 + $0x2f0] sm:$0xff] }
 0x781   :  { %v3546_v27 = vadd.f32 1.0, %v9088_v17  ;;  %9097 = vpow2.f32 %v6766_v36  ;;  %v3503_v29 = vadd.f32 %v8127_v26, %v3342_v19  ;;  %v3455_v9 = vpop.f32.mrb[105].mxu1 }
 0x782   :  { %v3502_v32 = vadd.f32 %v3455_v9, %v3341_v30  ;;  %9099 = vrcp.f32 %v3547_v23 }
 0x783   :  { %v9090_v35 = vpop.eup %9089  ;;  %v6768_v33 = vmul.f32 -1.442695, %v3503_v29  ;;  %9101 = vpow2.f32 %v6765_v18 }
 0x784   :  { %v3549_v60 = vadd.f32 1.0, %v9090_v35  ;;  %v6767_v42 = vmul.f32 -1.442695, %v3502_v32  ;;  %v8130_v20 = vpop.f32.mrb[106].mxu1  ;;  %9103 = vrcp.f32 %v3546_v27 }
 0x785   :  { %v3505_v43 = vadd.f32 %v8130_v20, %v3344_v38  ;;  %v3465_v47 = vpop.f32.mrb[107].mxu1  ;;  %9105 = vpow2.f32 %v6768_v33 }
 0x786   :  { %v3504_v49 = vadd.f32 %v3465_v47, %v3343_v45  ;;  %9107 = vrcp.f32 %v3549_v60 }
 0x787   :  { %v9092_v54 = vpop.eup %9091  ;;  %v6770_v56 = vmul.f32 -1.442695, %v3505_v43  ;;  %9109 = vpow2.f32 %v6767_v42 }
 0x788   :  { %v9094_v39 = vpop.eup %9093  ;;  %v3551_v58 = vadd.f32 1.0, %v9092_v54  ;;  %v6769_v8 = vmul.f32 -1.442695, %v3504_v49  ;;  %v8133_v1 = vpop.f32.mrb[108].mxu1 }
 0x789   :  { %v3550_v31 = vadd.f32 1.0, %v9094_v39  ;;  %9111 = vpow2.f32 %v6770_v56  ;;  %v3507_v10 = vadd.f32 %v8133_v1, %v3346_v59  ;;  %v3475_v28 = vpop.f32.mrb[109].mxu1  ;;  %v9096_v25 = vpop.eup %9095 }
 0x78a   :  { %9113 = vrcp.f32 %v3551_v58  ;;  %v3506_v37 = vadd.f32 %v3475_v28, %v3345_v2  ;;  %v3548_v52 = vadd.f32 1.0, %v9096_v25 }
 0x78b   :  { %v9098_v34 = vpop.eup %9097  ;;  %9115 = vrcp.f32 %v3550_v31 }
 0x78c   :  { %v3553_v3 = vadd.f32 1.0, %v9098_v34  ;;  %9117 = vpow2.f32 %v6769_v8  ;;  %v8136_v21 = vpop.f32.mrb[110].mxu1  ;;  %v9100_v11 = vpop.eup %9099 }
 0x78d   :  { %9119 = vtanh.f32 %v3507_v10  ;;  %v3509_v22 = vadd.f32 %v8136_v21, %v3348_v6  ;;  %v3485_v24 = vpop.f32.mrb[111].mxu1  ;;  %v9102_v12 = vpop.eup %9101 }
 0x78e   :  { %9121 = vrcp.f32 %v3553_v3  ;;  %v9104_v15 = vpop.eup %9103  ;;  %v3552_v36 = vadd.f32 1.0, %v9102_v12  ;;  %v3508_v17 = vadd.f32 %v3485_v24, %v3347_v14  ;;  %v3611_v14 = vld [vmem:[#allocation2 + $0x328] sm:$0xff] }
 0x78f   :  { %9123 = vtanh.f32 %v3506_v37  ;;  %v9106_v23 = vpop.eup %9105 }
 0x790   :  { %9125 = vtanh.f32 %v3509_v22  ;;  %v9108_v18 = vpop.eup %9107  ;;  %v3555_v35 = vadd.f32 1.0, %v9106_v23 }
 0x791   :  { %9127 = vrcp.f32 %v3552_v36  ;;  %v9110_v19 = vpop.eup %9109  ;;  %v3610_v36 = vld [vmem:[#allocation2 + $0x320] sm:$0xff] }
 0x792   :  { %9129 = vrcp.f32 %v3548_v52  ;;  %v3554_v43 = vadd.f32 1.0, %v9110_v19  ;;  %v3608_v52 = vld [vmem:[#allocation2 + $0x310] sm:$0xff] }
 0x793   :  { %v9112_v26 = vpop.eup %9111  ;;  %9131 = vtanh.f32 %v3508_v17 }
 0x794   :  { %v9114_v27 = vpop.eup %9113  ;;  %9133 = vrcp.f32 %v3555_v35  ;;  %v3557_v58 = vadd.f32 1.0, %v9112_v26 }
 0x795   :  { %v9116_v29 = vpop.eup %9115  ;;  %v3587_v9 = vmul.f32 %v9114_v27, %v10993_v4  ;;  %v3613_v27 = vld [vmem:[#allocation2 + $0x338] sm:$0xff] }
 0x796   :  { %v9118_v30 = vpop.eup %9117  ;;  %v3586_v60 = vmul.f32 %v9116_v29, %v10997_v13 }
 0x797   :  { %v9120_v32 = vpop.eup %9119  ;;  %v3556_v59 = vadd.f32 1.0, %v9118_v30 }
 0x798   :  { %v9122_v33 = vpop.eup %9121  ;;  %v3591_v42 = vmul.f32 %v9120_v32, %v9100_v11 }
 0x799   :  { %v9124_v38 = vpop.eup %9123  ;;  %v3589_v20 = vmul.f32 %v9122_v33, %v10999_v5 }
 0x79a   :  { %v9126_v45 = vpop.eup %9125  ;;  %v11041_v47 = vadd.f32 %v3591_v42, %v3587_v9  ;;  %v3590_v49 = vmul.f32 %v9124_v38, %v9104_v15  ;;  %v3612_v9 = vld [vmem:[#allocation2 + $0x330] sm:$0xff] }
 0x79b   :  { %v9128_v54 = vpop.eup %9127  ;;  %v3593_v56 = vmul.f32 %v9126_v45, %v9108_v18 }
 0x79c   :  { %v9130_v39 = vpop.eup %9129  ;;  %v3588_v4 = vmul.f32 %v9128_v54, %v11003_v16  ;;  %9135 = vtanh.f32 %v11041_v47  ;;  %v11045_v8 = vadd.f32 %v3590_v49, %v3586_v60 }
 0x79d   :  { %v9132_v13 = vpop.eup %9131  ;;  %9137 = vrcp.f32 %v3554_v43  ;;  %v11047_v5 = vadd.f32 %v3593_v56, %v3589_v20  ;;  %v3615_v43 = vld [vmem:[#allocation2 + $0x348] sm:$0xff]  ;;  %v3614_v56 = vld [vmem:[#allocation2 + $0x340] sm:$0xff] }
 0x79e   :  { %9139 = vtanh.f32 %v11045_v8  ;;  %v3592_v1 = vmul.f32 %v9132_v13, %v9130_v39  ;;  %v9134_v16 = vpop.eup %9133 }
 0x79f   :  { %9141 = vtanh.f32 %v11047_v5 }
 0x7a0   :  { %9143 = vrcp.f32 %v3557_v58  ;;  %v11051_v31 = vadd.f32 %v3592_v1, %v3588_v4 }
 0x7a1   :  { %9145 = vrcp.f32 %v3556_v59 }
 0x7a2   :  { %9147 = vtanh.f32 %v11051_v31 }
 0x7a6   :  { %v9136_v10 = vpop.eup %9135 }
 0x7a7   :  { %v9138_v28 = vpop.eup %9137  ;;  %v3603_v25 = vmul.f32 %v9136_v10, %v9134_v16  ;;  %v3617_v16 = vld [vmem:[#allocation2 + $0x358] sm:$0xff] }
 0x7a8   :  { %v9140_v2 = vpop.eup %9139 }
 0x7a9   :  { %v9142_v34 = vpop.eup %9141  ;;  %v3602_v37 = vmul.f32 %v9140_v2, %v9138_v28 }
 0x7aa   :  { %v9144_v3 = vpop.eup %9143 }
 0x7ab   :  { %v9146_v6 = vpop.eup %9145  ;;  %v8563_v21 = vpack.c.bf16 %v3603_v25, %v3602_v37  ;;  %v3605_v11 = vmul.f32 %v9144_v3, %v9142_v34  ;;  %v3616_v25 = vld [vmem:[#allocation2 + $0x350] sm:$0xff] }
 0x7ac   :  { %v9148_v22 = vpop.eup %9147 }
 0x7ad   :  { %8564 = vmatprep.subr.bf16.mxu0 %v8563_v21  ;;  %v3604_v24 = vmul.f32 %v9148_v22, %v9146_v6  ;;  %v3619_v22 = vld [vmem:[#allocation2 + $0x368] sm:$0xff] }
 0x7ae   :  { %8566 = vmatpush3.bf16.msra.mxu0 %v8563_v21 }
 0x7af   :  { %v8567_v12 = vpack.c.bf16 %v3605_v11, %v3604_v24 }
 0x7b1   :  { %8568 = vmatprep.subr.bf16.mxu0 %v8567_v12 }
 0x7b2   :  { %8570 = vmatpush3.bf16.msra.mxu0 %v8567_v12 }
 0x7b5   :  { %8146 = vmatmul.mubr.msk.f32.vlgmr.msra.gmra.mrb[112].mxu0 %vm1935_vm6, %v10881_v62  ;;  %v3607_v62 = vld [vmem:[#allocation2 + $0x308] sm:$0xff] }
 0x7b6   :  { %8148 = vmatprep.mubr.msk.f32.mxu0 %vm1935_vm6, %v10888_v0 }
 0x7b9   :  { %8149 = vmatmul.mubr.msk.f32.gmra.mrb[114].mxu0 %vm1935_vm6, %v10895_v44 }
 0x7ba   :  { %8151 = vmatprep.mubr.msk.f32.mxu0 %vm1935_vm6, %v10902_v46  ;;  %v3606_v46 = vld [vmem:[#allocation2 + $0x300] sm:$0xff] }
 0x7bd   :  { %8152 = vmatmul.mubr.msk.f32.gmra.mrb[116].mxu0 %vm1935_vm6, %v10909_v48 }
 0x7be   :  { %8154 = vmatprep.mubr.msk.f32.mxu0 %vm1935_vm6, %v10916_v50 }
 0x7c1   :  { %8155 = vmatmul.mubr.msk.f32.gmra.mrb[118].mxu0 %vm1935_vm6, %v10923_v53 }
 0x7c2   :  { %8157 = vmatprep.mubr.msk.f32.mxu0 %vm1935_vm6, %v10930_v55 }
 0x7c5   :  { %8158 = vmatmul.mubr.msk.f32.gmra.mrb[120].mxu0 %vm1935_vm6, %v10937_v57  ;;  %v3609_v57 = vld [vmem:[#allocation2 + $0x318] sm:$0xff] }
 0x7c6   :  { %8160 = vmatprep.mubr.msk.f32.mxu0 %vm1935_vm6, %v10944_v40 }
 0x7c9   :  { %8161 = vmatmul.mubr.msk.f32.gmra.mrb[122].mxu0 %vm1935_vm6, %v10951_v41 }
 0x7ca   :  { %8163 = vmatprep.mubr.msk.f32.mxu0 %vm1935_vm6, %v10958_v51 }
 0x7cd   :  { %8164 = vmatmul.mubr.msk.f32.gmra.mrb[124].mxu0 %vm1935_vm6, %v10965_v61 }
 0x7ce   :  { %8166 = vmatprep.mubr.msk.f32.mxu0 %vm1935_vm6, %v10972_v63 }
 0x7d1   :  { %8167 = vmatmul.mubr.msk.f32.gmra.mrb[126].mxu0 %vm1935_vm6, %v10979_v7 }
 0x888   :  { %v8147_v0 = vpop.f32.mrb[112].mxu0 }
 0x889   :  { %v3768_v44 = vadd.f32 %v8147_v0, %v3607_v62  ;;  %v3688_v48 = vpop.f32.mrb[113].mxu0 }
 0x88a   :  { %v3767_v50 = vadd.f32 %v3688_v48, %v3606_v46  ;;  %v3618_v46 = vld [vmem:[#allocation2 + $0x360] sm:$0xff] }
 0x88b   :  { %v6788_v53 = vmul.f32 -1.442695, %v3768_v44 }
 0x88c   :  { %v6787_v55 = vmul.f32 -1.442695, %v3767_v50  ;;  %v8150_v40 = vpop.f32.mrb[114].mxu0 }
 0x88d   :  { %9149 = vpow2.f32 %v6788_v53  ;;  %v3770_v41 = vadd.f32 %v8150_v40, %v3609_v57  ;;  %v3698_v51 = vpop.f32.mrb[115].mxu0 }
 0x88e   :  { %9151 = vpow2.f32 %v6787_v55  ;;  %v3769_v63 = vadd.f32 %v3698_v51, %v3608_v52  ;;  %v3621_v55 = vld [vmem:[#allocation2 + $0x378] sm:$0xff] }
 0x88f   :  { %v6790_v61 = vmul.f32 -1.442695, %v3770_v41 }
 0x890   :  { %v8153_v15 = vpop.f32.mrb[116].mxu0  ;;  %v6789_v19 = vmul.f32 -1.442695, %v3769_v63  ;;  %v3620_v63 = vld [vmem:[#allocation2 + $0x370] sm:$0xff] }
 0x891   :  { %9153 = vpow2.f32 %v6790_v61  ;;  %v3772_v7 = vadd.f32 %v8153_v15, %v3611_v14  ;;  %v3708_v17 = vpop.f32.mrb[117].mxu0 }
 0x892   :  { %v3771_v23 = vadd.f32 %v3708_v17, %v3610_v36 }
 0x893   :  { %v6792_v18 = vmul.f32 -1.442695, %v3772_v7 }
 0x894   :  { %v6791_v26 = vmul.f32 -1.442695, %v3771_v23  ;;  %v8156_v29 = vpop.f32.mrb[118].mxu0 }
 0x895   :  { %9155 = vpow2.f32 %v6792_v18  ;;  %v3774_v30 = vadd.f32 %v8156_v29, %v3613_v27  ;;  %v3718_v32 = vpop.f32.mrb[119].mxu0 }
 0x896   :  { %9157 = vpow2.f32 %v6791_v26  ;;  %v3773_v35 = vadd.f32 %v3718_v32, %v3612_v9 }
 0x897   :  { %v9150_v33 = vpop.eup %9149  ;;  %v6794_v60 = vmul.f32 -1.442695, %v3774_v30  ;;  %9159 = vpow2.f32 %v6789_v19 }
 0x898   :  { %v9152_v42 = vpop.eup %9151  ;;  %v3820_v38 = vadd.f32 1.0, %v9150_v33  ;;  %v6793_v20 = vmul.f32 -1.442695, %v3773_v35  ;;  %v8159_v45 = vpop.f32.mrb[120].mxu0 }
 0x899   :  { %v3819_v49 = vadd.f32 1.0, %v9152_v42  ;;  %9161 = vpow2.f32 %v6794_v60  ;;  %v3776_v54 = vadd.f32 %v8159_v45, %v3615_v43  ;;  %v3728_v39 = vpop.f32.mrb[121].mxu0 }
 0x89a   :  { %v3775_v4 = vadd.f32 %v3728_v39, %v3614_v56  ;;  %9163 = vrcp.f32 %v3820_v38 }
 0x89b   :  { %v9154_v58 = vpop.eup %9153  ;;  %v6796_v13 = vmul.f32 -1.442695, %v3776_v54  ;;  %9165 = vpow2.f32 %v6793_v20 }
 0x89c   :  { %v3822_v59 = vadd.f32 1.0, %v9154_v58  ;;  %v6795_v1 = vmul.f32 -1.442695, %v3775_v4  ;;  %v8162_v10 = vpop.f32.mrb[122].mxu0  ;;  %9167 = vrcp.f32 %v3819_v49 }
 0x89d   :  { %v3778_v28 = vadd.f32 %v8162_v10, %v3617_v16  ;;  %v3738_v2 = vpop.f32.mrb[123].mxu0  ;;  %9169 = vpow2.f32 %v6796_v13 }
 0x89e   :  { %v3777_v34 = vadd.f32 %v3738_v2, %v3616_v25  ;;  %9171 = vrcp.f32 %v3822_v59 }
 0x89f   :  { %v9156_v37 = vpop.eup %9155  ;;  %v6798_v3 = vmul.f32 -1.442695, %v3778_v28  ;;  %9173 = vpow2.f32 %v6795_v1 }
 0x8a0   :  { %v9158_v6 = vpop.eup %9157  ;;  %v3824_v21 = vadd.f32 1.0, %v9156_v37  ;;  %v6797_v11 = vmul.f32 -1.442695, %v3777_v34  ;;  %v8165_v24 = vpop.f32.mrb[124].mxu0 }
 0x8a1   :  { %v3823_v12 = vadd.f32 1.0, %v9158_v6  ;;  %9175 = vpow2.f32 %v6798_v3  ;;  %v3780_v62 = vadd.f32 %v8165_v24, %v3619_v22  ;;  %v3748_v0 = vpop.f32.mrb[125].mxu0  ;;  %v9160_v44 = vpop.eup %9159  ;;  %v9402_v24 = vld [vmem:[%s11702_s2 + $0x8] sm:$0xff] }
 0x8a2   :  { %9177 = vrcp.f32 %v3824_v21  ;;  %v3779_v50 = vadd.f32 %v3748_v0, %v3618_v46  ;;  %v3821_v52 = vadd.f32 1.0, %v9160_v44  ;;  %v9405_v0 = vld [vmem:[%s11702_s2 + $0x20] sm:$0xff]  ;;  %v9406_v44 = vld [vmem:[%s11702_s2 + $0x28] sm:$0xff]  ;;  %v9407_v46 = vld [vmem:[%s11702_s2 + $0x30] sm:$0xff] }
 0x8a3   :  { %v9162_v48 = vpop.eup %9161  ;;  %9179 = vrcp.f32 %v3823_v12  ;;  %v9403_v12 = vld [vmem:[%s11702_s2 + $0x10] sm:$0xff] }
 0x8a4   :  { %v3826_v53 = vadd.f32 1.0, %v9162_v48  ;;  %9181 = vpow2.f32 %v6797_v11  ;;  %v8168_v57 = vpop.f32.mrb[126].mxu0  ;;  %v9164_v40 = vpop.eup %9163  ;;  %v9408_v48 = vld [vmem:[%s11702_s2 + $0x38] sm:$0xff] }
 0x8a5   :  { %9183 = vtanh.f32 %v3780_v62  ;;  %v3782_v41 = vadd.f32 %v8168_v57, %v3621_v55  ;;  %v3758_v51 = vpop.f32.mrb[127].mxu0  ;;  %v9166_v61 = vpop.eup %9165  ;;  %v9404_v62 = vld [vmem:[%s11702_s2 + $0x18] sm:$0xff]  ;;  %v9411_v55 = vld [vmem:[%s11702_s2 + $0x50] sm:$0xff] }
 0x8a6   :  { %9185 = vrcp.f32 %v3826_v53  ;;  %v9168_v14 = vpop.eup %9167  ;;  %v3825_v15 = vadd.f32 1.0, %v9166_v61  ;;  %v3781_v7 = vadd.f32 %v3758_v51, %v3620_v63  ;;  %v9410_v53 = vld [vmem:[%s11702_s2 + $0x48] sm:$0xff]  ;;  %v9412_v57 = vld [vmem:[%s11702_s2 + $0x58] sm:$0xff]  ;;  %v9415_v51 = vld [vmem:[%s11702_s2 + $0x70] sm:$0xff] }
 0x8a7   :  { %9187 = vtanh.f32 %v3779_v50  ;;  %v9170_v36 = vpop.eup %9169  ;;  %v9409_v50 = vld [vmem:[%s11702_s2 + $0x40] sm:$0xff]  ;;  %v9416_v61 = vld [vmem:[%s11702_s2 + $0x78] sm:$0xff]  ;;  %v4302_v63 = vld [vmem:[#allocation7 + $0x8] sm:$0xff] }
 0x8a8   :  { %9189 = vtanh.f32 %v3782_v41  ;;  %v9172_v17 = vpop.eup %9171  ;;  %v3828_v9 = vadd.f32 1.0, %v9170_v36  ;;  %v9414_v41 = vld [vmem:[%s11702_s2 + $0x68] sm:$0xff]  ;;  %v4309_v36 = vld [vmem:[#allocation7 + $0x40] sm:$0xff] }
 0x8a9   :  { %9191 = vrcp.f32 %v3825_v15  ;;  %v9174_v23 = vpop.eup %9173 }
 0x8aa   :  { %9193 = vrcp.f32 %v3821_v52  ;;  %v3827_v38 = vadd.f32 1.0, %v9174_v23  ;;  %v4152_v52 = vld [vmem:[%s11705_s5] sm:$0xff]  ;;  %v4318_v23 = vld [vmem:[#allocation7 + $0x88] sm:$0xff] }
 0x8ab   :  { %v9176_v18 = vpop.eup %9175  ;;  %9195 = vtanh.f32 %v3781_v7  ;;  %8209 = vmatprep.mubr.msk.f32.mxu0 %vm366_vm13, %v4152_v52  ;;  %v4301_v7 = vld [vmem:[#allocation7] sm:$0xff] }
 0x8ac   :  { %v9178_v19 = vpop.eup %9177  ;;  %9197 = vrcp.f32 %v3828_v9  ;;  %v3830_v39 = vadd.f32 1.0, %v9176_v18  ;;  %v4326_v18 = vld [vmem:[#allocation7 + $0xc8] sm:$0xff] }
 0x8ad   :  { %v9180_v26 = vpop.eup %9179  ;;  %v3860_v29 = vmul.f32 %v9178_v19, %v11041_v47  ;;  %v8595_v19 = vpack.c.bf16 %v4326_v18, %v4318_v23 }
 0x8ae   :  { %v9182_v27 = vpop.eup %9181  ;;  %v3859_v35 = vmul.f32 %v9180_v26, %v11045_v8  ;;  %v4317_v26 = vld [vmem:[#allocation7 + $0x80] sm:$0xff] }
 0x8af   :  { %v9184_v30 = vpop.eup %9183  ;;  %v3829_v58 = vadd.f32 1.0, %v9182_v27  ;;  %v4325_v27 = vld [vmem:[#allocation7 + $0xc0] sm:$0xff] }
 0x8b0   :  { %v9186_v32 = vpop.eup %9185  ;;  %v3864_v33 = vmul.f32 %v9184_v30, %v9164_v40  ;;  %v9413_v40 = vld [vmem:[%s11702_s2 + $0x60] sm:$0xff]  ;;  %v3880_v30 = vld [vmem:[#allocation2 + $0x388] sm:$0xff] }
 0x8b1   :  { %v9188_v60 = vpop.eup %9187  ;;  %v3862_v42 = vmul.f32 %v9186_v32, %v11047_v5 }
 0x8b2   :  { %v9190_v20 = vpop.eup %9189  ;;  %v11087_v43 = vadd.f32 %v3864_v33, %v3860_v29  ;;  %v3863_v45 = vmul.f32 %v9188_v60, %v9168_v14  ;;  %v4310_v14 = vld [vmem:[#allocation7 + $0x48] sm:$0xff]  ;;  %v8597_v29 = vpack.c.bf16 %v4325_v27, %v4317_v26 }
 0x8b3   :  { %v9192_v49 = vpop.eup %9191  ;;  %v3866_v54 = vmul.f32 %v9190_v20, %v9172_v17  ;;  %v8591_v15 = vpack.c.bf16 %v4310_v14, %v4302_v63  ;;  %v8593_v17 = vpack.c.bf16 %v4309_v36, %v4301_v7  ;;  %v3882_v20 = vld [vmem:[#allocation2 + $0x398] sm:$0xff]  ;;  %v3889_v14 = vld [vmem:[#allocation2 + $0x3d0] sm:$0xff]  ;;  %v3892_v26 = vld [vmem:[#allocation2 + $0x3e8] sm:$0xff] }
 0x8b4   :  { %v9194_v56 = vpop.eup %9193  ;;  %v3861_v47 = vmul.f32 %v9192_v49, %v11051_v31  ;;  %9199 = vtanh.f32 %v11087_v43  ;;  %v11091_v4 = vadd.f32 %v3863_v45, %v3859_v35  ;;  %v3879_v35 = vld [vmem:[#allocation2 + $0x380] sm:$0xff] }
 0x8b5   :  { %v9196_v8 = vpop.eup %9195  ;;  %9201 = vrcp.f32 %v3827_v38  ;;  %v11093_v5 = vadd.f32 %v3866_v54, %v3862_v42 }
 0x8b6   :  { %9203 = vtanh.f32 %v11091_v4  ;;  %v3865_v13 = vmul.f32 %v9196_v8, %v9194_v56  ;;  %v9198_v31 = vpop.eup %9197  ;;  %v3884_v8 = vld [vmem:[#allocation2 + $0x3a8] sm:$0xff] }
 0x8b7   :  { %9205 = vtanh.f32 %v11093_v5 }
 0x8b8   :  { %9207 = vrcp.f32 %v3830_v39  ;;  %v11097_v59 = vadd.f32 %v3865_v13, %v3861_v47  ;;  %v3881_v47 = vld [vmem:[#allocation2 + $0x390] sm:$0xff] }
 0x8b9   :  { %9209 = vrcp.f32 %v3829_v58 }
 0x8ba   :  { %9211 = vtanh.f32 %v11097_v59 }
 0x8be   :  { %v9200_v1 = vpop.eup %9199 }
 0x8bf   :  { %v9202_v16 = vpop.eup %9201  ;;  %v3876_v10 = vmul.f32 %v9200_v1, %v9198_v31  ;;  %v3883_v31 = vld [vmem:[#allocation2 + $0x3a0] sm:$0xff] }
 0x8c0   :  { %v9204_v28 = vpop.eup %9203 }
 0x8c1   :  { %v9206_v25 = vpop.eup %9205  ;;  %v3875_v2 = vmul.f32 %v9204_v28, %v9202_v16 }
 0x8c2   :  { %v9208_v34 = vpop.eup %9207 }
 0x8c3   :  { %v9210_v37 = vpop.eup %9209  ;;  %v8571_v3 = vpack.c.bf16 %v3876_v10, %v3875_v2  ;;  %v3878_v6 = vmul.f32 %v9208_v34, %v9206_v25  ;;  %v3886_v2 = vld [vmem:[#allocation2 + $0x3b8] sm:$0xff] }
 0x8c4   :  { %v9212_v21 = vpop.eup %9211 }
 0x8c5   :  { %8572 = vmatprep.subr.bf16.mxu1 %v8571_v3  ;;  %v3877_v11 = vmul.f32 %v9212_v21, %v9210_v37 }
 0x8c6   :  { %8574 = vmatpush3.bf16.msra.mxu1 %v8571_v3  ;;  %v3885_v3 = vld [vmem:[#allocation2 + $0x3b0] sm:$0xff] }
 0x8c7   :  { %v8575_v22 = vpack.c.bf16 %v3878_v6, %v3877_v11 }
 0x8c9   :  { %8576 = vmatprep.subr.bf16.mxu1 %v8575_v22 }
 0x8ca   :  { %8578 = vmatpush3.bf16.msra.mxu1 %v8575_v22 }
 0x8cb   :  { %8592 = vmatprep.subr.bf16.mxu1 %v8591_v15 }
 0x8cd   :  { %8178 = vmatmul.mubr.msk.f32.vlgmr.msra.gmra.mrb[112].mxu1 %vm1935_vm6, %v9402_v24 }
 0x8ce   :  { %8180 = vmatprep.mubr.msk.f32.mxu1 %vm1935_vm6, %v9403_v12  ;;  %8594 = vmatpush1.bf16.msra.mxu1 %v8593_v17 }
 0x8cf   :  { %8596 = vmatprep.subr.bf16.mxu1 %v8595_v19 }
 0x8d1   :  { %8181 = vmatmul.mubr.msk.f32.gmra.mrb[114].mxu1 %vm1935_vm6, %v9404_v62 }
 0x8d2   :  { %8183 = vmatprep.mubr.msk.f32.mxu1 %vm1935_vm6, %v9405_v0  ;;  %8598 = vmatpush1.bf16.msra.mxu1 %v8597_v29  ;;  %v3888_v0 = vld [vmem:[#allocation2 + $0x3c8] sm:$0xff] }
 0x8d5   :  { %8184 = vmatmul.mubr.msk.f32.gmra.mrb[116].mxu1 %vm1935_vm6, %v9406_v44 }
 0x8d6   :  { %8186 = vmatprep.mubr.msk.f32.mxu1 %vm1935_vm6, %v9407_v46 }
 0x8d9   :  { %8187 = vmatmul.mubr.msk.f32.gmra.mrb[118].mxu1 %vm1935_vm6, %v9408_v48 }
 0x8da   :  { %8189 = vmatprep.mubr.msk.f32.mxu1 %vm1935_vm6, %v9409_v50  ;;  %v3887_v50 = vld [vmem:[#allocation2 + $0x3c0] sm:$0xff] }
 0x8dd   :  { %8190 = vmatmul.mubr.msk.f32.gmra.mrb[120].mxu1 %vm1935_vm6, %v9410_v53 }
 0x8de   :  { %8192 = vmatprep.mubr.msk.f32.mxu1 %vm1935_vm6, %v9411_v55 }
 0x8e1   :  { %8193 = vmatmul.mubr.msk.f32.gmra.mrb[122].mxu1 %vm1935_vm6, %v9412_v57 }
 0x8e2   :  { %8195 = vmatprep.mubr.msk.f32.mxu1 %vm1935_vm6, %v9413_v40 }
 0x8e5   :  { %8196 = vmatmul.mubr.msk.f32.gmra.mrb[124].mxu1 %vm1935_vm6, %v9414_v41 }
 0x8e6   :  { %8198 = vmatprep.mubr.msk.f32.mxu1 %vm1935_vm6, %v9415_v51 }
 0x8e9   :  { %8199 = vmatmul.mubr.msk.f32.gmra.mrb[126].mxu1 %vm1935_vm6, %v9416_v61  ;;  %v3890_v61 = vld [vmem:[#allocation2 + $0x3d8] sm:$0xff] }
 0x9a0   :  { %v8179_v9 = vpop.f32.mrb[112].mxu1 }
 0x9a1   :  { %v4041_v32 = vadd.f32 %v8179_v9, %v3880_v30  ;;  %v3961_v33 = vpop.f32.mrb[113].mxu1 }
 0x9a2   :  { %v4040_v60 = vadd.f32 %v3961_v33, %v3879_v35  ;;  %v3891_v35 = vld [vmem:[#allocation2 + $0x3e0] sm:$0xff] }
 0x9a3   :  { %v6816_v42 = vmul.f32 -1.442695, %v4041_v32 }
 0x9a4   :  { %v6815_v38 = vmul.f32 -1.442695, %v4040_v60  ;;  %v8182_v45 = vpop.f32.mrb[114].mxu1 }
 0x9a5   :  { %9213 = vpow2.f32 %v6816_v42  ;;  %v4043_v49 = vadd.f32 %v8182_v45, %v3882_v20  ;;  %v3971_v54 = vpop.f32.mrb[115].mxu1 }
 0x9a6   :  { %9215 = vpow2.f32 %v6815_v38  ;;  %v4042_v39 = vadd.f32 %v3971_v54, %v3881_v47  ;;  %v3894_v38 = vld [vmem:[#allocation2 + $0x3f8] sm:$0xff] }
 0x9a7   :  { %v6818_v56 = vmul.f32 -1.442695, %v4043_v49 }
 0x9a8   :  { %v8185_v58 = vpop.f32.mrb[116].mxu1  ;;  %v6817_v28 = vmul.f32 -1.442695, %v4042_v39  ;;  %v3893_v39 = vld [vmem:[#allocation2 + $0x3f0] sm:$0xff] }
 0x9a9   :  { %9217 = vpow2.f32 %v6818_v56  ;;  %v4045_v13 = vadd.f32 %v8185_v58, %v3884_v8  ;;  %v3981_v1 = vpop.f32.mrb[117].mxu1 }
 0x9aa   :  { %v4044_v16 = vadd.f32 %v3981_v1, %v3883_v31 }
 0x9ab   :  { %v6820_v10 = vmul.f32 -1.442695, %v4045_v13 }
 0x9ac   :  { %v6819_v25 = vmul.f32 -1.442695, %v4044_v16  ;;  %v8188_v34 = vpop.f32.mrb[118].mxu1 }
 0x9ad   :  { %9219 = vpow2.f32 %v6820_v10  ;;  %v4047_v37 = vadd.f32 %v8188_v34, %v3886_v2  ;;  %v3991_v6 = vpop.f32.mrb[119].mxu1 }
 0x9ae   :  { %9221 = vpow2.f32 %v6819_v25  ;;  %v4046_v21 = vadd.f32 %v3991_v6, %v3885_v3 }
 0x9af   :  { %v9214_v11 = vpop.eup %9213  ;;  %v6822_v22 = vmul.f32 -1.442695, %v4047_v37  ;;  %9223 = vpow2.f32 %v6817_v28 }
 0x9b0   :  { %v9216_v24 = vpop.eup %9215  ;;  %v4093_v12 = vadd.f32 1.0, %v9214_v11  ;;  %v6821_v62 = vmul.f32 -1.442695, %v4046_v21  ;;  %v8191_v44 = vpop.f32.mrb[120].mxu1 }
 0x9b1   :  { %v4092_v46 = vadd.f32 1.0, %v9216_v24  ;;  %9225 = vpow2.f32 %v6822_v22  ;;  %v4049_v48 = vadd.f32 %v8191_v44, %v3888_v0  ;;  %v4001_v53 = vpop.f32.mrb[121].mxu1 }
 0x9b2   :  { %v4048_v55 = vadd.f32 %v4001_v53, %v3887_v50  ;;  %9227 = vrcp.f32 %v4093_v12 }
 0x9b3   :  { %v9218_v57 = vpop.eup %9217  ;;  %v6824_v40 = vmul.f32 -1.442695, %v4049_v48  ;;  %9229 = vpow2.f32 %v6821_v62 }
 0x9b4   :  { %v4095_v41 = vadd.f32 1.0, %v9218_v57  ;;  %v6823_v51 = vmul.f32 -1.442695, %v4048_v55  ;;  %v8194_v52 = vpop.f32.mrb[122].mxu1  ;;  %9231 = vrcp.f32 %v4092_v46 }
 0x9b5   :  { %v4051_v63 = vadd.f32 %v8194_v52, %v3890_v61  ;;  %v4011_v15 = vpop.f32.mrb[123].mxu1  ;;  %9233 = vpow2.f32 %v6824_v40 }
 0x9b6   :  { %v4050_v7 = vadd.f32 %v4011_v15, %v3889_v14  ;;  %9235 = vrcp.f32 %v4095_v41 }
 0x9b7   :  { %v9220_v36 = vpop.eup %9219  ;;  %v6826_v17 = vmul.f32 -1.442695, %v4051_v63  ;;  %9237 = vpow2.f32 %v6823_v51 }
 0x9b8   :  { %v9222_v23 = vpop.eup %9221  ;;  %v4097_v18 = vadd.f32 1.0, %v9220_v36  ;;  %v6825_v19 = vmul.f32 -1.442695, %v4050_v7  ;;  %v8197_v27 = vpop.f32.mrb[124].mxu1 }
 0x9b9   :  { %v4096_v29 = vadd.f32 1.0, %v9222_v23  ;;  %9239 = vpow2.f32 %v6826_v17  ;;  %v4053_v30 = vadd.f32 %v8197_v27, %v3892_v26  ;;  %v4021_v9 = vpop.f32.mrb[125].mxu1  ;;  %v9224_v32 = vpop.eup %9223  ;;  %v4304_v27 = vld [vmem:[#allocation7 + $0x18] sm:$0xff] }
 0x9ba   :  { %9241 = vrcp.f32 %v4097_v18  ;;  %v4052_v60 = vadd.f32 %v4021_v9, %v3891_v35  ;;  %v4094_v47 = vadd.f32 1.0, %v9224_v32  ;;  %v4303_v9 = vld [vmem:[#allocation7 + $0x10] sm:$0xff]  ;;  %v4320_v35 = vld [vmem:[#allocation7 + $0x98] sm:$0xff] }
 0x9bb   :  { %v9226_v33 = vpop.eup %9225  ;;  %9243 = vrcp.f32 %v4096_v29  ;;  %v4312_v29 = vld [vmem:[#allocation7 + $0x58] sm:$0xff]  ;;  %v4311_v32 = vld [vmem:[#allocation7 + $0x50] sm:$0xff] }
 0x9bc   :  { %v4099_v42 = vadd.f32 1.0, %v9226_v33  ;;  %9245 = vpow2.f32 %v6825_v19  ;;  %v8200_v20 = vpop.f32.mrb[126].mxu1  ;;  %v9228_v45 = vpop.eup %9227  ;;  %v4328_v33 = vld [vmem:[#allocation7 + $0xd8] sm:$0xff] }
 0x9bd   :  { %9247 = vtanh.f32 %v4053_v30  ;;  %v4055_v49 = vadd.f32 %v8200_v20, %v3894_v38  ;;  %v4031_v54 = vpop.f32.mrb[127].mxu1  ;;  %v9230_v56 = vpop.eup %9229  ;;  %v8599_v30 = vpack.c.bf16 %v4312_v29, %v4304_v27  ;;  %v4154_v38 = vld [vmem:[%s11705_s5 + $0x10] sm:$0xff]  ;;  %v8603_v20 = vpack.c.bf16 %v4328_v33, %v4320_v35  ;;  %v4720_v27 = vld [vmem:[#allocation8 + $0x98] sm:$0xff]  ;;  %v4725_v35 = vld [vmem:[#allocation8 + $0xc0] sm:$0xff] }
 0x9be   :  { %9249 = vrcp.f32 %v4099_v42  ;;  %v9232_v8 = vpop.eup %9231  ;;  %v4098_v58 = vadd.f32 1.0, %v9230_v56  ;;  %v4054_v13 = vadd.f32 %v4031_v54, %v3893_v39  ;;  %v8601_v42 = vpack.c.bf16 %v4311_v32, %v4303_v9  ;;  %v4155_v54 = vld [vmem:[%s11705_s5 + $0x18] sm:$0xff]  ;;  %v4157_v39 = vld [vmem:[%s11705_s5 + $0x28] sm:$0xff]  ;;  %v4717_v32 = vld [vmem:[#allocation8 + $0x80] sm:$0xff] }
 0x9bf   :  { %9251 = vtanh.f32 %v4052_v60  ;;  %v9234_v31 = vpop.eup %9233  ;;  %v4153_v60 = vld [vmem:[%s11705_s5 + $0x8] sm:$0xff]  ;;  %v4728_v29 = vld [vmem:[#allocation8 + $0xd8] sm:$0xff] }
 0x9c0   :  { %9253 = vtanh.f32 %v4055_v49  ;;  %v9236_v1 = vpop.eup %9235  ;;  %v4101_v37 = vadd.f32 1.0, %v9234_v31  ;;  %v4327_v49 = vld [vmem:[#allocation7 + $0xd0] sm:$0xff]  ;;  %v4306_v31 = vld [vmem:[#allocation7 + $0x28] sm:$0xff] }
 0x9c1   :  { %9255 = vrcp.f32 %v4098_v58  ;;  %v9238_v16 = vpop.eup %9237  ;;  %v4159_v58 = vld [vmem:[%s11705_s5 + $0x38] sm:$0xff] }
 0x9c2   :  { %9257 = vrcp.f32 %v4094_v47  ;;  %v4100_v6 = vadd.f32 1.0, %v9238_v16  ;;  %v4156_v47 = vld [vmem:[%s11705_s5 + $0x20] sm:$0xff]  ;;  %v4308_v16 = vld [vmem:[#allocation7 + $0x38] sm:$0xff] }
 0x9c3   :  { %v9240_v10 = vpop.eup %9239  ;;  %9259 = vtanh.f32 %v4054_v13  ;;  %v9592_v13 = vmov 0.0  }
 0x9c4   :  { %v9242_v28 = vpop.eup %9241  ;;  %v4103_v62 = vadd.f32 1.0, %v9240_v10  ;;  %9261 = vrcp.f32 %v4101_v37  ;;  %4409 = vmatprep.mubr.f32.mxu1 %v9592_v13  ;;  %v4307_v37 = vld [vmem:[#allocation7 + $0x30] sm:$0xff] }
 0x9c5   :  { %v9244_v25 = vpop.eup %9243  ;;  %v4133_v34 = vmul.f32 %v9242_v28, %v11087_v43  ;;  %9263 = vrcp.f32 %v4100_v6  ;;  %v4316_v28 = vld [vmem:[#allocation7 + $0x78] sm:$0xff]  ;;  %v4322_v6 = vld [vmem:[#allocation7 + $0xa8] sm:$0xff] }
 0x9c6   :  { %v9246_v2 = vpop.eup %9245  ;;  %v4132_v11 = vmul.f32 %v9244_v25, %v11091_v4  ;;  %v8615_v25 = vpack.c.bf16 %v4316_v28, %v4308_v16  ;;  %v4715_v16 = vld [vmem:[#allocation8 + $0x70] sm:$0xff]  ;;  %v4730_v28 = vld [vmem:[#allocation8 + $0xe8] sm:$0xff] }
 0x9c7   :  { %v9248_v3 = vpop.eup %9247  ;;  %v4102_v4 = vadd.f32 1.0, %v9246_v2  ;;  %v4305_v2 = vld [vmem:[#allocation7 + $0x20] sm:$0xff] }
 0x9c8   :  { %v9250_v21 = vpop.eup %9249  ;;  %v4137_v22 = vmul.f32 %v9248_v3, %v9228_v45  ;;  %v4319_v45 = vld [vmem:[#allocation7 + $0x90] sm:$0xff] }
 0x9c9   :  { %v9252_v24 = vpop.eup %9251  ;;  %v4135_v12 = vmul.f32 %v9250_v21, %v11093_v5  ;;  %v8605_v56 = vpack.c.bf16 %v4327_v49, %v4319_v45  ;;  %v4315_v3 = vld [vmem:[#allocation7 + $0x70] sm:$0xff]  ;;  %v4330_v21 = vld [vmem:[#allocation7 + $0xe8] sm:$0xff]  ;;  %v4708_v49 = vld [vmem:[#allocation8 + $0x38] sm:$0xff] }
 0x9ca   :  { %v9254_v0 = vpop.eup %9253  ;;  %v4141_v44 = vadd.f32 %v4137_v22, %v4133_v34  ;;  %v4136_v46 = vmul.f32 %v9252_v24, %v9232_v8  ;;  %v4158_v8 = vld [vmem:[%s11705_s5 + $0x30] sm:$0xff]  ;;  %v4313_v34 = vld [vmem:[#allocation7 + $0x60] sm:$0xff]  ;;  %v4332_v22 = vld [vmem:[#allocation7 + $0xf8] sm:$0xff] }
 0x9cb   :  { %v9256_v48 = vpop.eup %9255  ;;  %v4139_v50 = vmul.f32 %v9254_v0, %v9236_v1  ;;  %v4314_v1 = vld [vmem:[#allocation7 + $0x68] sm:$0xff]  ;;  %v4321_v0 = vld [vmem:[#allocation7 + $0xa0] sm:$0xff] }
 0x9cc   :  { %v9258_v53 = vpop.eup %9257  ;;  %v4134_v43 = vmul.f32 %v9256_v48, %v11097_v59  ;;  %9265 = vtanh.f32 %v4141_v44  ;;  %v4140_v55 = vadd.f32 %v4136_v46, %v4132_v11  ;;  %v8607_v10 = vpack.c.bf16 %v4314_v1, %v4306_v31  ;;  %v4324_v11 = vld [vmem:[#allocation7 + $0xb8] sm:$0xff]  ;;  %v4329_v44 = vld [vmem:[#allocation7 + $0xe0] sm:$0xff]  ;;  %v4714_v45 = vld [vmem:[#allocation8 + $0x68] sm:$0xff] }
 0x9cd   :  { %v9260_v57 = vpop.eup %9259  ;;  %9267 = vrcp.f32 %v4103_v62  ;;  %v4143_v40 = vadd.f32 %v4139_v50, %v4135_v12  ;;  %v8609_v12 = vpack.c.bf16 %v4313_v34, %v4305_v2  ;;  %v8617_v62 = vpack.c.bf16 %v4315_v3, %v4307_v37  ;;  %v4713_v31 = vld [vmem:[#allocation8 + $0x60] sm:$0xff]  ;;  %v4707_v1 = vld [vmem:[#allocation8 + $0x30] sm:$0xff]  ;;  %v4732_v2 = vld [vmem:[#allocation8 + $0xf8] sm:$0xff] }
 0x9ce   :  { %9269 = vtanh.f32 %v4140_v55  ;;  %v4138_v41 = vmul.f32 %v9260_v57, %v9258_v53  ;;  %v9262_v51 = vpop.eup %9261  ;;  %8608 = vmatprep.subr.bf16.mxu1 %v8607_v10  ;;  %v8611_v48 = vpack.c.bf16 %v4330_v21, %v4322_v6  ;;  %v8619_v50 = vpack.c.bf16 %v4332_v22, %v4324_v11  ;;  %v4323_v53 = vld [vmem:[#allocation7 + $0xb0] sm:$0xff]  ;;  %v4702_v55 = vld [vmem:[#allocation8 + $0x8] sm:$0xff]  ;;  %v4721_v3 = vld [vmem:[#allocation8 + $0xa0] sm:$0xff] }
 0x9cf   :  { %9271 = vtanh.f32 %v4143_v40  ;;  %v9264_v61 = vpop.eup %9263  ;;  %v4710_v57 = vld [vmem:[#allocation8 + $0x48] sm:$0xff]  ;;  %v4712_v40 = vld [vmem:[#allocation8 + $0x58] sm:$0xff]  ;;  %v8649_v37 = vpack.c.bf16 %v4715_v16, %v4707_v1  ;;  %v4729_v11 = vld [vmem:[#allocation8 + $0xe0] sm:$0xff] }
 0x9d0   :  { %v4142_v5 = vadd.f32 %v4138_v41, %v4134_v43  ;;  %9273 = vrcp.f32 %v4102_v4  ;;  %v4331_v43 = vld [vmem:[#allocation7 + $0xf0] sm:$0xff]  ;;  %v4704_v4 = vld [vmem:[#allocation8 + $0x18] sm:$0xff]  ;;  %v4722_v10 = vld [vmem:[#allocation8 + $0xa8] sm:$0xff] }
 0x9d1   :  { %v8643_v6 = vpack.c.bf16 %v4730_v28, %v4722_v10  ;;  %v4723_v22 = vld [vmem:[#allocation8 + $0xb0] sm:$0xff]  ;;  %v8733_v1 = vld [vmem:[#allocation10 + $0x140] sm:$0xff]  }
 0x9d2   :  { %9275 = vtanh.f32 %v4142_v5  ;;  %v8613_v5 = vpack.c.bf16 %v4329_v44, %v4321_v0  ;;  %v8701_v0 = vld [vmem:[#allocation10 + $0x40] sm:$0xff]  }
 0x9d3   :  { %v8702_v44 = vld [vmem:[#allocation10 + $0xc0] sm:$0xff]  }
 0x9d4   :  { %v8734_v16 = vld [vmem:[#allocation10 + $0x1c0] sm:$0xff]  }
 0x9d6   :  { %v9266_v52 = vpop.eup %9265 }
 0x9d7   :  { %v9268_v63 = vpop.eup %9267  ;;  %v4149_v14 = vmul.f32 %v9266_v52, %v9262_v51  ;;  %v8621_v51 = vpack.c.bf16 %v4331_v43, %v4323_v53  ;;  %v8623_v52 = vpack.c.bf16 %v4710_v57, %v4702_v55  ;;  %v8706_v53 = vld [vmem:[#allocation10 + $0xc8] sm:$0xff]   ;;  %v8710_v57 = vld [vmem:[#allocation10 + $0xd0] sm:$0xff]  }
 0x9d8   :  { %v9270_v15 = vpop.eup %9269  ;;  %v8707_v43 = vld [vmem:[#allocation10 + $0x8] sm:$0xff]  }
 0x9d9   :  { %v9272_v7 = vpop.eup %9271  ;;  %v4148_v59 = vmul.f32 %v9270_v15, %v9264_v61  ;;  %v8708_v55 = vld [vmem:[#allocation10 + $0x88] sm:$0xff]  }
 0x9da   :  { %v4151_v36 = vmul.f32 %v9272_v7, %v9268_v63  ;;  %v9274_v17 = vpop.eup %9273  ;;  %v8631_v63 = vpack.c.bf16 %v4712_v40, %v4704_v4  ;;  %v4701_v7 = vld [vmem:[#allocation8] sm:$0xff]  ;;  %v8711_v4 = vld [vmem:[#allocation10 + $0x10] sm:$0xff]  }
 0x9db   :  { %v8579_v23 = vpack.c.bf16 %v4149_v14, %v4148_v59  ;;  %v4709_v59 = vld [vmem:[#allocation8 + $0x40] sm:$0xff]  ;;  %v8712_v40 = vld [vmem:[#allocation10 + $0x90] sm:$0xff]  }
 0x9dc   :  { %v9276_v18 = vpop.eup %9275 }
 0x9dd   :  { %8581 = vmatprep.subr.msk.bf16.mxu0 %vm8580_vm9, %v8579_v23  ;;  %v4150_v19 = vmul.f32 %v9276_v18, %v9274_v17  ;;  %v4703_v17 = vld [vmem:[#allocation8 + $0x10] sm:$0xff]  ;;  %v4718_v18 = vld [vmem:[#allocation8 + $0x88] sm:$0xff] }
 0x9de   :  { %8584 = vmatpush3.bf16.xpose.msk.msra.mxu0 %vm8580_vm9, %v8579_v23  ;;  %v4711_v23 = vld [vmem:[#allocation8 + $0x50] sm:$0xff] }
 0x9df   :  { %v8585_v26 = vpack.c.bf16 %v4151_v36, %v4150_v19  ;;  %v8633_v9 = vpack.c.bf16 %v4711_v23, %v4703_v17  ;;  %v8721_v23 = vld [vmem:[#allocation10 + $0x68] sm:$0xff]  }
 0x9e1   :  { %8587 = vmatprep.subr.msk.bf16.mxu0 %vm8580_vm9, %v8585_v26 }
 0x9e6   :  { %8590 = vmatpush3.bf16.xpose.msk.msra.mxu0 %vm8580_vm9, %v8585_v26  ;;  %v4726_v26 = vld [vmem:[#allocation8 + $0xc8] sm:$0xff] }
 0x9e7   :  { %8600 = vmatprep.subr.bf16.mxu0 %v8599_v30  ;;  %v8625_v30 = vpack.c.bf16 %v4709_v59, %v4701_v7  ;;  %v8627_v33 = vpack.c.bf16 %v4726_v26, %v4718_v18  ;;  %v8722_v18 = vld [vmem:[#allocation10 + $0xe8] sm:$0xff]  }
 0x9e8   :  { %v8724_v26 = vld [vmem:[#allocation10 + $0xa8] sm:$0xff]  }
 0x9ed   :  { %8210 = vmatmul.mubr.msk.f32.vlgmr.msra.gmra.mrb[128].mxu0 %vm366_vm13, %v4153_v60  ;;  %v8635_v60 = vpack.c.bf16 %v4728_v29, %v4720_v27 }
 0x9ee   :  { %8212 = vmatprep.mubr.msk.f32.mxu0 %vm366_vm13, %v4154_v38  ;;  %8602 = vmatpush1.bf16.msra.mxu0 %v8601_v42  ;;  %v4719_v42 = vld [vmem:[#allocation8 + $0x90] sm:$0xff] }
 0x9ef   :  { %8604 = vmatprep.subr.bf16.mxu0 %v8603_v20  ;;  %v4727_v38 = vld [vmem:[#allocation8 + $0xd0] sm:$0xff]  ;;  %v4706_v20 = vld [vmem:[#allocation8 + $0x28] sm:$0xff] }
 0x9f1   :  { %8213 = vmatmul.mubr.msk.f32.gmra.mrb[130].mxu0 %vm366_vm13, %v4155_v54  ;;  %v4716_v54 = vld [vmem:[#allocation8 + $0x78] sm:$0xff] }
 0x9f2   :  { %8215 = vmatprep.mubr.msk.f32.mxu0 %vm366_vm13, %v4156_v47  ;;  %8606 = vmatpush1.bf16.msra.mxu0 %v8605_v56  ;;  %v8629_v56 = vpack.c.bf16 %v4725_v35, %v4717_v32  ;;  %v8637_v47 = vpack.c.bf16 %v4727_v38, %v4719_v42  ;;  %v8725_v32 = vld [vmem:[#allocation10 + $0x70] sm:$0xff]  }
 0x9f3   :  { %8616 = vmatprep.subr.bf16.mxu0 %v8615_v25  ;;  %v4724_v25 = vld [vmem:[#allocation8 + $0xb8] sm:$0xff]  ;;  %v8726_v35 = vld [vmem:[#allocation10 + $0xf0] sm:$0xff]  }
 0x9f4   :  { %v8651_v21 = vpack.c.bf16 %v4732_v2, %v4724_v25 }
 0x9f5   :  { %8216 = vmatmul.mubr.msk.f32.gmra.mrb[132].mxu0 %vm366_vm13, %v4157_v39  ;;  %v8639_v39 = vpack.c.bf16 %v4714_v45, %v4706_v20 }
 0x9f6   :  { %8218 = vmatprep.mubr.msk.f32.mxu0 %vm366_vm13, %v4158_v8  ;;  %v8647_v8 = vpack.c.bf16 %v4716_v54, %v4708_v49  ;;  %v8729_v49 = vld [vmem:[#allocation10 + $0x78] sm:$0xff]  }
 0x9f7   :  { %v8730_v54 = vld [vmem:[#allocation10 + $0xf8] sm:$0xff]  }
 0x9f9   :  { %8219 = vmatmul.mubr.msk.f32.gmra.mrb[134].mxu0 %vm366_vm13, %v4159_v58  ;;  %v4705_v58 = vld [vmem:[#allocation8 + $0x20] sm:$0xff] }
 0x9fa   :  { %4498 = vmatprep.mubr.f32.mxu0 %v9592_v13  ;;  %v8641_v34 = vpack.c.bf16 %v4713_v31, %v4705_v58 }
 0xac0   :  { %v11200_v24 = vpop.f32.mrb[128].mxu0 }
 0xac1   :  { %v4262_v46 = vpop.f32.mrb[129].mxu0 }
 0xac2   :  { %6839 = vmatmul.mubr.msk.f32.vlgmr.msra.gmra.mrb[128].mxu1 %vm1935_vm6, %v4262_v46  ;;  %6843 = vmatmul.mubr.msk.f32.vlgmr.msra.gmra.mrb[136].mxu0 %vm1935_vm6, %v4262_v46 }
 0xac3   :  { %4415 = vmatprep.mubr.f32.mxu1 %v9592_v13  ;;  %4504 = vmatprep.mubr.f32.mxu0 %v9592_v13 }
 0xac4   :  { %v11206_v41 = vpop.f32.mrb[130].mxu0  ;;  %8610 = vmatpush1.bf16.msra.mxu1 %v8609_v12  ;;  %8618 = vmatpush1.bf16.msra.mxu0 %v8617_v62  ;;  %v8645_v12 = vpack.c.bf16 %v4729_v11, %v4721_v3 }
 0xac5   :  { %v11208_v61 = vpop.f32.mrb[131].mxu0  ;;  %8612 = vmatprep.subr.bf16.mxu1 %v8611_v48  ;;  %8620 = vmatprep.subr.bf16.mxu0 %v8619_v50  ;;  %v8704_v48 = vld [vmem:[#allocation10 + $0x80] sm:$0xff]   ;;  %v8705_v50 = vld [vmem:[#allocation10 + $0x48] sm:$0xff]  }
 0xac6   :  { %6840 = vmatmul.mubr.msk.f32.gmra.mrb[130].mxu1 %vm1935_vm6, %v11200_v24  ;;  %6844 = vmatmul.mubr.msk.f32.gmra.mrb[138].mxu0 %vm1935_vm6, %v11200_v24 }
 0xac7   :  { %4421 = vmatprep.mubr.f32.mxu1 %v9592_v13  ;;  %4510 = vmatprep.mubr.f32.mxu0 %v9592_v13 }
 0xac8   :  { %8614 = vmatpush1.bf16.msra.mxu1 %v8613_v5  ;;  %8622 = vmatpush1.bf16.msra.mxu0 %v8621_v51  ;;  %v11216_v14 = vpop.f32.mrb[132].mxu0  ;;  %v8714_v5 = vld [vmem:[#allocation10 + $0xd8] sm:$0xff]  }
 0xac9   :  { %8624 = vmatprep.subr.bf16.mxu1 %v8623_v52  ;;  %8632 = vmatprep.subr.bf16.mxu0 %v8631_v63  ;;  %v11218_v15 = vpop.f32.mrb[133].mxu0  ;;  %v8715_v51 = vld [vmem:[#allocation10 + $0x18] sm:$0xff]   ;;  %v8717_v52 = vld [vmem:[#allocation10 + $0x60] sm:$0xff]  }
 0xaca   :  { %6841 = vmatmul.mubr.msk.f32.gmra.mrb[132].mxu1 %vm1935_vm6, %v11208_v61  ;;  %6845 = vmatmul.mubr.msk.f32.gmra.mrb[140].mxu0 %vm1935_vm6, %v11208_v61  ;;  %v8718_v63 = vld [vmem:[#allocation10 + $0xe0] sm:$0xff]  }
 0xacb   :  { %4427 = vmatprep.mubr.f32.mxu1 %v9592_v13  ;;  %4516 = vmatprep.mubr.f32.mxu0 %v9592_v13 }
 0xacc   :  { %v11226_v36 = vpop.f32.mrb[134].mxu0 }
 0xacd   :  { %v11228_v19 = vpop.f32.mrb[135].mxu0 }
 0xace   :  { %6842 = vmatmul.mubr.msk.f32.gmra.mrb[134].mxu1 %vm1935_vm6, %v11206_v41  ;;  %6846 = vmatmul.mubr.msk.f32.gmra.mrb[142].mxu0 %vm1935_vm6, %v11206_v41 }
 0xacf   :  { %4587 = vmatprep.mubr.f32.mxu1 %v9592_v13  ;;  %4676 = vmatprep.mubr.f32.mxu0 %v9592_v13 }
 0xad2   :  { %6847 = vmatmul.mubr.msk.f32.vlgmr.msra.gmra.mrb[136].mxu1 %vm1935_vm6, %v4262_v46  ;;  %6851 = vmatmul.mubr.msk.f32.vlgmr.msra.gmra.mrb[144].mxu0 %vm1935_vm6, %v4262_v46  ;;  %v8703_v46 = vld [vmem:[#allocation10] sm:$0xff]  }
 0xad3   :  { %4593 = vmatprep.mubr.f32.mxu1 %v9592_v13  ;;  %4682 = vmatprep.mubr.f32.mxu0 %v9592_v13 }
 0xad4   :  { %8626 = vmatpush1.bf16.msra.mxu1 %v8625_v30  ;;  %8634 = vmatpush1.bf16.msra.mxu0 %v8633_v9 }
 0xad5   :  { %8628 = vmatprep.subr.bf16.mxu1 %v8627_v33  ;;  %8636 = vmatprep.subr.bf16.mxu0 %v8635_v60  ;;  %v8727_v33 = vld [vmem:[#allocation10 + $0x30] sm:$0xff]  }
 0xad6   :  { %6848 = vmatmul.mubr.msk.f32.gmra.mrb[138].mxu1 %vm1935_vm6, %v11200_v24  ;;  %6852 = vmatmul.mubr.msk.f32.gmra.mrb[146].mxu0 %vm1935_vm6, %v11200_v24  ;;  %v4731_v24 = vld [vmem:[#allocation8 + $0xf0] sm:$0xff] }
 0xad7   :  { %4599 = vmatprep.mubr.f32.mxu1 %v9592_v13  ;;  %4688 = vmatprep.mubr.f32.mxu0 %v9592_v13  ;;  %v8653_v62 = vpack.c.bf16 %v4731_v24, %v4723_v22  ;;  %v8728_v60 = vld [vmem:[#allocation10 + $0xb0] sm:$0xff]  }
 0xad8   :  { %8630 = vmatpush1.bf16.msra.mxu1 %v8629_v56  ;;  %8638 = vmatpush1.bf16.msra.mxu0 %v8637_v47  ;;  %v8731_v56 = vld [vmem:[#allocation10 + $0x38] sm:$0xff]  }
 0xad9   :  { %8640 = vmatprep.subr.bf16.mxu1 %v8639_v39  ;;  %8648 = vmatprep.subr.bf16.mxu0 %v8647_v8  ;;  %v8732_v47 = vld [vmem:[#allocation10 + $0xb8] sm:$0xff]  }
 0xada   :  { %6849 = vmatmul.mubr.msk.f32.gmra.mrb[140].mxu1 %vm1935_vm6, %v11208_v61  ;;  %6853 = vmatmul.mubr.msk.f32.gmra.mrb[148].mxu0 %vm1935_vm6, %v11208_v61  ;;  %v8716_v61 = vld [vmem:[#allocation10 + $0x98] sm:$0xff]  }
 0xadb   :  { %4605 = vmatprep.mubr.f32.mxu1 %v9592_v13  ;;  %4694 = vmatprep.mubr.f32.mxu0 %v9592_v13 }
 0xade   :  { %6850 = vmatmul.mubr.msk.f32.gmra.mrb[142].mxu1 %vm1935_vm6, %v11206_v41  ;;  %6854 = vmatmul.mubr.msk.f32.gmra.mrb[150].mxu0 %vm1935_vm6, %v11206_v41  ;;  %v8713_v41 = vld [vmem:[#allocation10 + $0x58] sm:$0xff]  }
 0xadf   :  { %4809 = vmatprep.mubr.f32.mxu1 %v9592_v13  ;;  %4898 = vmatprep.mubr.f32.mxu0 %v9592_v13 }
 0xae2   :  { %6855 = vmatmul.mubr.msk.f32.vlgmr.msra.gmra.mrb[144].mxu1 %vm1935_vm6, %v11218_v15  ;;  %6859 = vmatmul.mubr.msk.f32.vlgmr.msra.gmra.mrb[152].mxu0 %vm1935_vm6, %v11218_v15 }
 0xae3   :  { %4815 = vmatprep.mubr.f32.mxu1 %v9592_v13  ;;  %4904 = vmatprep.mubr.f32.mxu0 %v9592_v13 }
 0xae4   :  { %8642 = vmatpush1.bf16.msra.mxu1 %v8641_v34  ;;  %8650 = vmatpush1.bf16.msra.mxu0 %v8649_v37 }
 0xae5   :  { %8644 = vmatprep.subr.bf16.mxu1 %v8643_v6  ;;  %8652 = vmatprep.subr.bf16.mxu0 %v8651_v21 }
 0xae6   :  { %6856 = vmatmul.mubr.msk.f32.gmra.mrb[146].mxu1 %vm1935_vm6, %v11216_v14  ;;  %6860 = vmatmul.mubr.msk.f32.gmra.mrb[154].mxu0 %vm1935_vm6, %v11216_v14 }
 0xae7   :  { %4821 = vmatprep.mubr.f32.mxu1 %v9592_v13  ;;  %4910 = vmatprep.mubr.f32.mxu0 %v9592_v13 }
 0xae8   :  { %8646 = vmatpush1.bf16.msra.mxu1 %v8645_v12  ;;  %8654 = vmatpush1.bf16.msra.mxu0 %v8653_v62 }
 0xae9   :  { %7365 = vmatprep.subr.bf16.mxu1 %v8701_v0  ;;  %7393 = vmatprep.subr.bf16.mxu0 %v8702_v44 }
 0xaea   :  { %6857 = vmatmul.mubr.msk.f32.gmra.mrb[148].mxu1 %vm1935_vm6, %v11228_v19  ;;  %6861 = vmatmul.mubr.msk.f32.gmra.mrb[156].mxu0 %vm1935_vm6, %v11228_v19 }
 0xaeb   :  { %4827 = vmatprep.mubr.f32.mxu1 %v9592_v13  ;;  %4916 = vmatprep.mubr.f32.mxu0 %v9592_v13 }
 0xaee   :  { %6858 = vmatmul.mubr.msk.f32.gmra.mrb[150].mxu1 %vm1935_vm6, %v11226_v36  ;;  %6862 = vmatmul.mubr.msk.f32.gmra.mrb[158].mxu0 %vm1935_vm6, %v11226_v36 }
 0xaef   :  { %4987 = vmatprep.mubr.f32.mxu1 %v9592_v13  ;;  %5076 = vmatprep.mubr.f32.mxu0 %v9592_v13 }
 0xaf2   :  { %6863 = vmatmul.mubr.msk.f32.vlgmr.msra.gmra.mrb[152].mxu1 %vm1935_vm6, %v11218_v15  ;;  %6867 = vmatmul.mubr.msk.f32.vlgmr.msra.gmra.mrb[160].mxu0 %vm1935_vm6, %v11218_v15  ;;  %v8720_v15 = vld [vmem:[#allocation10 + $0xa0] sm:$0xff]  }
 0xaf3   :  { %4993 = vmatprep.mubr.f32.mxu1 %v9592_v13  ;;  %5082 = vmatprep.mubr.f32.mxu0 %v9592_v13 }
 0xaf4   :  { %7366 = vmatpush3.bf16.msra.mxu1 %v8703_v46  ;;  %7394 = vmatpush3.bf16.msra.mxu0 %v8704_v48 }
 0xaf5   :  { %7367 = vmatprep.subr.bf16.mxu1 %v8705_v50  ;;  %7395 = vmatprep.subr.bf16.mxu0 %v8706_v53 }
 0xaf6   :  { %6864 = vmatmul.mubr.msk.f32.gmra.mrb[154].mxu1 %vm1935_vm6, %v11216_v14  ;;  %6868 = vmatmul.mubr.msk.f32.gmra.mrb[162].mxu0 %vm1935_vm6, %v11216_v14  ;;  %v8719_v14 = vld [vmem:[#allocation10 + $0x20] sm:$0xff]  }
 0xaf7   :  { %4999 = vmatprep.mubr.f32.mxu1 %v9592_v13  ;;  %5088 = vmatprep.mubr.f32.mxu0 %v9592_v13 }
 0xaf8   :  { %7368 = vmatpush3.bf16.msra.mxu1 %v8707_v43  ;;  %7396 = vmatpush3.bf16.msra.mxu0 %v8708_v55 }
 0xaf9   :  { %7397 = vmatprep.subr.bf16.mxu0 %v8710_v57 }
 0xafa   :  { %6865 = vmatmul.mubr.msk.f32.gmra.mrb[156].mxu1 %vm1935_vm6, %v11228_v19  ;;  %6869 = vmatmul.mubr.msk.f32.gmra.mrb[164].mxu0 %vm1935_vm6, %v11228_v19  ;;  %v8723_v19 = vld [vmem:[#allocation10 + $0x28] sm:$0xff]  }
 0xafb   :  { %5005 = vmatprep.mubr.f32.mxu1 %v9592_v13  ;;  %5094 = vmatprep.mubr.f32.mxu0 %v9592_v13  ;;  %v8709_v13 = vld [vmem:[#allocation10 + $0x50] sm:$0xff]  }
 0xafc   :  { %7369 = vmatprep.subr.bf16.mxu1 %v8709_v13  ;;  %7398 = vmatpush3.bf16.msra.mxu0 %v8712_v40 }
 0xafd   :  { %7370 = vmatpush3.bf16.msra.mxu1 %v8711_v4  ;;  %7399 = vmatprep.subr.bf16.mxu0 %v8714_v5 }
 0xafe   :  { %6866 = vmatmul.mubr.msk.f32.gmra.mrb[158].mxu1 %vm1935_vm6, %v11226_v36  ;;  %6870 = vmatmul.mubr.msk.f32.gmra.mrb[166].mxu0 %vm1935_vm6, %v11226_v36 }
 0xaff   :  { %7371 = vmatprep.subr.bf16.mxu1 %v8713_v41 }
 0xb00   :  { %7400 = vmatpush3.bf16.msra.mxu0 %v8716_v61 }
 0xb01   :  { %7372 = vmatpush3.bf16.msra.mxu1 %v8715_v51  ;;  %7401 = vmatprep.subr.bf16.mxu0 %v8718_v63 }
 0xb02   :  { %7373 = vmatprep.subr.bf16.mxu1 %v8717_v52 }
 0xb04   :  { %7402 = vmatpush3.bf16.msra.mxu0 %v8720_v15 }
 0xb05   :  { %7374 = vmatpush3.bf16.msra.mxu1 %v8719_v14  ;;  %7403 = vmatprep.subr.bf16.mxu0 %v8722_v18 }
 0xb06   :  { %7375 = vmatprep.subr.bf16.mxu1 %v8721_v23 }
 0xb08   :  { %7404 = vmatpush3.bf16.msra.mxu0 %v8724_v26 }
 0xb09   :  { %7376 = vmatpush3.bf16.msra.mxu1 %v8723_v19  ;;  %7405 = vmatprep.subr.bf16.mxu0 %v8726_v35 }
 0xb0a   :  { %7377 = vmatprep.subr.bf16.mxu1 %v8725_v32 }
 0xb0c   :  { %7406 = vmatpush3.bf16.msra.mxu0 %v8728_v60 }
 0xb0d   :  { %7378 = vmatpush3.bf16.msra.mxu1 %v8727_v33  ;;  %7407 = vmatprep.subr.bf16.mxu0 %v8730_v54 }
 0xb0e   :  { %7379 = vmatprep.subr.bf16.mxu1 %v8729_v49 }
 0xb10   :  { %7408 = vmatpush3.bf16.msra.mxu0 %v8732_v47 }
 0xb11   :  { %7380 = vmatpush3.bf16.msra.mxu1 %v8731_v56  ;;  %7449 = vmatprep.subr.bf16.mxu0 %v8734_v16 }
 0xb12   :  { %7421 = vmatprep.subr.bf16.mxu1 %v8733_v1 }
 0xb95   :  { %v11304_v7 = vpop.f32.mrb[128].mxu1  ;;  %v11306_v59 = vpop.f32.mrb[136].mxu0 }
 0xb96   :  { %v11308_v36 = vpop.f32.mrb[129].mxu1  ;;  %v11310_v17 = vpop.f32.mrb[137].mxu0 }
 0xb99   :  { %v4417_v27 = vpop.f32.mrb[130].mxu1  ;;  %v4506_v29 = vpop.f32.mrb[138].mxu0 }
 0xb9a   :  { %v4419_v30 = vpop.f32.mrb[131].mxu1  ;;  %v4508_v9 = vpop.f32.mrb[139].mxu0 }
 0xb9d   :  { %v4423_v42 = vpop.f32.mrb[132].mxu1  ;;  %v4512_v38 = vpop.f32.mrb[140].mxu0 }
 0xb9e   :  { %v4425_v20 = vpop.f32.mrb[133].mxu1  ;;  %v4514_v45 = vpop.f32.mrb[141].mxu0 }
 0xba1   :  { %v4429_v39 = vpop.f32.mrb[134].mxu1  ;;  %v4518_v8 = vpop.f32.mrb[142].mxu0 }
 0xba2   :  { %v4431_v58 = vpop.f32.mrb[135].mxu1  ;;  %v4520_v31 = vpop.f32.mrb[143].mxu0 }
 0xba5   :  { %v11312_v10 = vpop.f32.mrb[136].mxu1  ;;  %v11314_v28 = vpop.f32.mrb[144].mxu0 }
 0xba6   :  { %v11316_v25 = vpop.f32.mrb[137].mxu1  ;;  %v11318_v2 = vpop.f32.mrb[145].mxu0 }
 0xba9   :  { %v11320_v34 = vpop.f32.mrb[138].mxu1  ;;  %v11322_v37 = vpop.f32.mrb[146].mxu0 }
 0xbaa   :  { %v11324_v3 = vpop.f32.mrb[139].mxu1  ;;  %v11326_v6 = vpop.f32.mrb[147].mxu0 }
 0xbad   :  { %v11328_v21 = vpop.f32.mrb[140].mxu1  ;;  %v11330_v11 = vpop.f32.mrb[148].mxu0 }
 0xbae   :  { %v11332_v22 = vpop.f32.mrb[141].mxu1  ;;  %v11334_v24 = vpop.f32.mrb[149].mxu0 }
 0xbb1   :  { %v11336_v12 = vpop.f32.mrb[142].mxu1  ;;  %v11338_v62 = vpop.f32.mrb[150].mxu0 }
 0xbb2   :  { %v11340_v0 = vpop.f32.mrb[143].mxu1  ;;  %v11342_v44 = vpop.f32.mrb[151].mxu0 }
 0xbb5   :  { %v4811_v46 = vpop.f32.mrb[144].mxu1  ;;  %v4900_v48 = vpop.f32.mrb[152].mxu0 }
 0xbb6   :  { %v11345_v50 = vmul.f32 %v4811_v46, %v11304_v7  ;;  %v11348_v53 = vmul.f32 %v4900_v48, %v11306_v59  ;;  %v4813_v43 = vpop.f32.mrb[145].mxu1  ;;  %v4902_v55 = vpop.f32.mrb[153].mxu0 }
 0xbb7   :  { %v11351_v13 = vmul.f32 %v4813_v43, %v11308_v36  ;;  %v11354_v57 = vmul.f32 %v4902_v55, %v11310_v17 }
 0xbb9   :  { %11741 = vst [vmem:[#allocation18_spill] sm:$0xff] %v11354_v57  ;;  %v4817_v4 = vpop.f32.mrb[146].mxu1  ;;  %v4906_v40 = vpop.f32.mrb[154].mxu0 }
 0xbba   :  { %v11356_v41 = vmul.f32 %v4817_v4, %v4417_v27  ;;  %v11358_v5 = vmul.f32 %v4906_v40, %v4506_v29  ;;  %v4819_v51 = vpop.f32.mrb[147].mxu1  ;;  %v4908_v61 = vpop.f32.mrb[155].mxu0 }
 0xbbb   :  { %v11360_v52 = vmul.f32 %v4819_v51, %v4419_v30  ;;  %v11362_v63 = vmul.f32 %v4908_v61, %v4508_v9 }
 0xbbc   :  { %v5133_v14 = vmax.f32 %v11345_v50, %v11356_v41  ;;  %v5151_v15 = vmax.f32 %v11348_v53, %v11358_v5 }
 0xbbd   :  { %11742 = vst [vmem:[#allocation19_spill] sm:$0xff] %v11362_v63  ;;  %v5142_v7 = vmax.f32 %v11351_v13, %v11360_v52  ;;  %v5160_v59 = vmax.f32 %v11354_v57, %v11362_v63  ;;  %v4823_v36 = vpop.f32.mrb[148].mxu1  ;;  %v4912_v17 = vpop.f32.mrb[156].mxu0 }
 0xbbe   :  { %v11372_v23 = vmul.f32 %v4823_v36, %v4423_v42  ;;  %v11374_v18 = vmul.f32 %v4912_v17, %v4512_v38  ;;  %v4825_v19 = vpop.f32.mrb[149].mxu1  ;;  %v4914_v26 = vpop.f32.mrb[157].mxu0 }
 0xbbf   :  { %v11376_v27 = vmul.f32 %v4825_v19, %v4425_v20  ;;  %v11378_v29 = vmul.f32 %v4914_v26, %v4514_v45 }
 0xbc0   :  { %11743 = vst [vmem:[#allocation20_spill] sm:$0xff] %v11374_v18  ;;  %v5134_v32 = vmax.f32 %v5133_v14, %v11372_v23  ;;  %v5152_v35 = vmax.f32 %v5151_v15, %v11374_v18 }
 0xbc1   :  { %11744 = vst [vmem:[#allocation21_spill] sm:$0xff] %v11376_v27  ;;  %11745 = vst [vmem:[#allocation22_spill] sm:$0xff] %v11378_v29  ;;  %v4829_v30 = vpop.f32.mrb[150].mxu1  ;;  %v4918_v9 = vpop.f32.mrb[158].mxu0  ;;  %v5143_v38 = vmax.f32 %v5142_v7, %v11376_v27  ;;  %v5161_v54 = vmax.f32 %v5160_v59, %v11378_v29 }
 0xbc2   :  { %v11382_v33 = vmul.f32 %v4829_v30, %v4429_v39  ;;  %v11384_v60 = vmul.f32 %v4918_v9, %v4518_v8  ;;  %v4831_v42 = vpop.f32.mrb[151].mxu1  ;;  %v4920_v49 = vpop.f32.mrb[159].mxu0 }
 0xbc3   :  { %v11388_v20 = vmul.f32 %v4831_v42, %v4431_v58  ;;  %v11390_v45 = vmul.f32 %v4920_v49, %v4520_v31 }
 0xbc4   :  { %v5135_v56 = vmax.f32 %v5134_v32, %v11382_v33  ;;  %v5153_v47 = vmax.f32 %v5152_v35, %v11384_v60 }
 0xbc5   :  { %11746 = vst [vmem:[#allocation23_spill] sm:$0xff] %v11390_v45  ;;  %v5144_v1 = vmax.f32 %v5143_v38, %v11388_v20  ;;  %v5162_v39 = vmax.f32 %v5161_v54, %v11390_v45  ;;  %v4989_v8 = vpop.f32.mrb[152].mxu1  ;;  %v5078_v16 = vpop.f32.mrb[160].mxu0 }
 0xbc6   :  { %v5136_v46 = vrot.slane %v5135_v56, 4  ;;  %v5154_v48 = vrot.slane %v5153_v47, 4  ;;  %v11397_v43 = vmul.f32 %v4989_v8, %v11312_v10  ;;  %v11400_v58 = vmul.f32 %v5078_v16, %v11314_v28  ;;  %v4991_v31 = vpop.f32.mrb[153].mxu1  ;;  %v5080_v55 = vpop.f32.mrb[161].mxu0 }
 0xbc7   :  { %v5145_v4 = vrot.slane %v5144_v1, 4  ;;  %v5163_v40 = vrot.slane %v5162_v39, 4  ;;  %v11403_v51 = vmul.f32 %v4991_v31, %v11316_v25  ;;  %v11406_v61 = vmul.f32 %v5080_v55, %v11318_v2 }
 0xbc8   :  { %11747 = vst [vmem:[#allocation24_spill] sm:$0xff] %v11397_v43  ;;  %11748 = vst [vmem:[#allocation25_spill] sm:$0xff] %v11400_v58  ;;  %v5137_v14 = vmax.f32 %v5135_v56, %v5136_v46  ;;  %v5155_v15 = vmax.f32 %v5153_v47, %v5154_v48 }
 0xbc9   :  { %v5146_v7 = vmax.f32 %v5144_v1, %v5145_v4  ;;  %v5164_v59 = vmax.f32 %v5162_v39, %v5163_v40  ;;  %v4995_v36 = vpop.f32.mrb[154].mxu1  ;;  %v5084_v10 = vpop.f32.mrb[162].mxu0 }
 0xbca   :  { %v5138_v17 = vrot.slane %v5137_v14, 2  ;;  %v5156_v19 = vrot.slane %v5155_v15, 2  ;;  %v11409_v28 = vmul.f32 %v4995_v36, %v11320_v34  ;;  %v11412_v26 = vmul.f32 %v5084_v10, %v11322_v37  ;;  %v4997_v30 = vpop.f32.mrb[155].mxu1  ;;  %v5086_v25 = vpop.f32.mrb[163].mxu0 }
 0xbcb   :  { %v5147_v9 = vrot.slane %v5146_v7, 2  ;;  %v5165_v32 = vrot.slane %v5164_v59, 2  ;;  %v11415_v2 = vmul.f32 %v4997_v30, %v11324_v3  ;;  %v11418_v35 = vmul.f32 %v5086_v25, %v11326_v6 }
 0xbcc   :  { %11749 = vst [vmem:[#allocation26_spill] sm:$0xff] %v11409_v28  ;;  %11750 = vst [vmem:[#allocation27_spill] sm:$0xff] %v11412_v26  ;;  %v5139_v42 = vmax.f32 %v5137_v14, %v5138_v17  ;;  %v5157_v49 = vmax.f32 %v5155_v15, %v5156_v19  ;;  %v5169_v38 = vmax.f32 %v11397_v43, %v11409_v28 }
 0xbcd   :  { %v5187_v34 = vmax.f32 %v11400_v58, %v11412_v26  ;;  %v5148_v37 = vmax.f32 %v5146_v7, %v5147_v9  ;;  %v5166_v54 = vmax.f32 %v5164_v59, %v5165_v32  ;;  %v5178_v56 = vmax.f32 %v11403_v51, %v11415_v2  ;;  %v5001_v47 = vpop.f32.mrb[156].mxu1  ;;  %v5090_v1 = vpop.f32.mrb[164].mxu0 }
 0xbce   :  { %v5196_v3 = vmax.f32 %v11406_v61, %v11418_v35  ;;  %v5140_v6 = vrot.slane %v5139_v42, 1  ;;  %v5158_v39 = vrot.slane %v5157_v49, 1  ;;  %v11429_v8 = vmul.f32 %v5001_v47, %v11328_v21  ;;  %v5003_v46 = vpop.f32.mrb[157].mxu1  ;;  %v5092_v48 = vpop.f32.mrb[165].mxu0 }
 0xbcf   :  { %v11432_v16 = vmul.f32 %v5090_v1, %v11330_v11  ;;  %v5149_v31 = vrot.slane %v5148_v37, 1  ;;  %v5167_v55 = vrot.slane %v5166_v54, 1  ;;  %v11435_v4 = vmul.f32 %v5003_v46, %v11332_v22 }
 0xbd0   :  { %11751 = vst [vmem:[#allocation28_spill] sm:$0xff] %v11429_v8  ;;  %v11438_v40 = vmul.f32 %v5092_v48, %v11334_v24  ;;  %v5141_v14 = vmax.f32 %v5139_v42, %v5140_v6  ;;  %v5159_v15 = vmax.f32 %v5157_v49, %v5158_v39  ;;  %v5170_v39 = vmax.f32 %v5169_v38, %v11429_v8 }
 0xbd1   :  { %11752 = vst [vmem:[#allocation29_spill] sm:$0xff] %v11432_v16  ;;  %v5150_v7 = vmax.f32 %v5148_v37, %v5149_v31  ;;  %v5007_v59 = vpop.f32.mrb[158].mxu1  ;;  %v5096_v36 = vpop.f32.mrb[166].mxu0  ;;  %v11447_v9 = vmax.f32 %v5166_v54, %v5167_v55  ;;  %v5188_v48 = vmax.f32 %v5187_v34, %v11432_v16  ;;  %v5179_v31 = vmax.f32 %v5178_v56, %v11435_v4 }
 0xbd2   :  { %v5205_v21 = vsub.f32 %v11345_v50, %v5141_v14  ;;  %v5213_v11 = vsub.f32 %v11356_v41, %v5141_v14  ;;  %v5221_v10 = vsub.f32 %v11372_v23, %v5141_v14  ;;  %v5229_v17 = vsub.f32 %v11382_v33, %v5141_v14  ;;  %v5009_v19 = vpop.f32.mrb[159].mxu1  ;;  %v5098_v30 = vpop.f32.mrb[167].mxu0 }
 0xbd3   :  { %v5207_v22 = vsub.f32 %v11348_v53, %v5159_v15  ;;  %v5215_v24 = vsub.f32 %v11358_v5, %v5159_v15  ;;  %v5223_v25 = vsub.f32 %v11374_v18, %v5159_v15  ;;  %v5206_v37 = vsub.f32 %v11351_v13, %v5150_v7 }
 0xbd4   :  { %v5237_v32 = vmul.f32 1.442695, %v5205_v21  ;;  %v5253_v42 = vmul.f32 1.442695, %v5213_v11  ;;  %v5269_v49 = vmul.f32 1.442695, %v5221_v10  ;;  %v5231_v1 = vsub.f32 %v11384_v60, %v5159_v15 }
 0xbd5   :  { %v5285_v47 = vmul.f32 1.442695, %v5229_v17  ;;  %v5214_v6 = vsub.f32 %v11360_v52, %v5150_v7  ;;  %v5241_v46 = vmul.f32 1.442695, %v5207_v22  ;;  %v5257_v54 = vmul.f32 1.442695, %v5215_v24 }
 0xbd6   :  { %9277 = vpow2.f32 %v5237_v32  ;;  %v5222_v55 = vsub.f32 %v11376_v27, %v5150_v7  ;;  %v5230_v14 = vsub.f32 %v11388_v20, %v5150_v7  ;;  %v5273_v21 = vmul.f32 1.442695, %v5223_v25 }
 0xbd7   :  { %9279 = vpow2.f32 %v5253_v42  ;;  %v5208_v15 = vsub.f32 %v11354_v57, %v11447_v9  ;;  %v5216_v38 = vsub.f32 %v11362_v63, %v11447_v9  ;;  %v5289_v11 = vmul.f32 1.442695, %v5231_v1 }
 0xbd8   :  { %9281 = vpow2.f32 %v5269_v49  ;;  %v5232_v34 = vsub.f32 %v11390_v45, %v11447_v9  ;;  %v5197_v56 = vmax.f32 %v5196_v3, %v11438_v40  ;;  %v5239_v10 = vmul.f32 1.442695, %v5206_v37 }
 0xbd9   :  { %9283 = vpow2.f32 %v5285_v47  ;;  %v5255_v17 = vmul.f32 1.442695, %v5214_v6  ;;  %v11465_v7 = vmul.f32 %v5007_v59, %v11336_v12  ;;  %v5271_v22 = vmul.f32 1.442695, %v5222_v55 }
 0xbda   :  { %9285 = vpow2.f32 %v5241_v46  ;;  %v5287_v24 = vmul.f32 1.442695, %v5230_v14  ;;  %v11468_v25 = vmul.f32 %v5096_v36, %v11338_v62  ;;  %v11472_v42 = vmul.f32 %v5009_v19, %v11340_v0 }
 0xbdb   :  { %11753 = vst [vmem:[#allocation30_spill] sm:$0xff] %v11465_v7  ;;  %9287 = vpow2.f32 %v5257_v54  ;;  %v5171_v32 = vmax.f32 %v5170_v39, %v11465_v7  ;;  %v11475_v3 = vmul.f32 %v5098_v30, %v11342_v44  ;;  %v5224_v12 = vsub.f32 %v11378_v29, %v11447_v9 }
 0xbdc   :  { %11754 = vst [vmem:[#allocation31_spill] sm:$0xff] %v11468_v25  ;;  %9289 = vpow2.f32 %v5273_v21  ;;  %v5243_v59 = vmul.f32 1.442695, %v5208_v15  ;;  %v5189_v49 = vmax.f32 %v5188_v48, %v11468_v25  ;;  %v5180_v62 = vmax.f32 %v5179_v31, %v11472_v42 }
 0xbdd   :  { %9291 = vpow2.f32 %v5289_v11  ;;  %v5172_v37 = vrot.slane %v5171_v32, 4  ;;  %v5198_v36 = vmax.f32 %v5197_v56, %v11475_v3  ;;  %v5259_v47 = vmul.f32 1.442695, %v5216_v38 }
 0xbde   :  { %9293 = vpow2.f32 %v5239_v10  ;;  %v5190_v0 = vrot.slane %v5189_v49, 4  ;;  %v5181_v30 = vrot.slane %v5180_v62, 4  ;;  %v5275_v9 = vmul.f32 1.442695, %v5224_v12 }
 0xbdf   :  { %9295 = vpow2.f32 %v5255_v17  ;;  %v5173_v44 = vmax.f32 %v5171_v32, %v5172_v37  ;;  %v5199_v1 = vrot.slane %v5198_v36, 4  ;;  %v5291_v14 = vmul.f32 1.442695, %v5232_v34 }
 0xbe0   :  { %v11482_v19 = vpop.eup %9277  ;;  %9297 = vpow2.f32 %v5271_v22  ;;  %v5191_v39 = vmax.f32 %v5189_v49, %v5190_v0  ;;  %v5182_v54 = vmax.f32 %v5180_v62, %v5181_v30 }
 0xbe1   :  { %v11484_v6 = vpop.eup %9279  ;;  %9299 = vpow2.f32 %v5287_v24  ;;  %v5174_v31 = vrot.slane %v5173_v44, 2  ;;  %v5200_v15 = vmax.f32 %v5198_v36, %v5199_v1 }
 0xbe2   :  { %v11486_v46 = vpop.eup %9281  ;;  %v5301_v48 = vadd.f32 %v11484_v6, %v11482_v19  ;;  %9301 = vpow2.f32 %v5243_v59  ;;  %v5192_v21 = vrot.slane %v5191_v39, 2  ;;  %v5183_v10 = vrot.slane %v5182_v54, 2 }
 0xbe3   :  { %v11490_v55 = vpop.eup %9283  ;;  %9303 = vpow2.f32 %v5259_v47  ;;  %v5175_v56 = vmax.f32 %v5173_v44, %v5174_v31  ;;  %v5201_v24 = vrot.slane %v5200_v15, 2 }
 0xbe4   :  { %v11492_v38 = vpop.eup %9285  ;;  %v5302_v11 = vadd.f32 %v11486_v46, %v5301_v48  ;;  %9305 = vpow2.f32 %v5275_v9  ;;  %v5193_v22 = vmax.f32 %v5191_v39, %v5192_v21  ;;  %v5184_v49 = vmax.f32 %v5182_v54, %v5183_v10 }
 0xbe5   :  { %v11495_v17 = vpop.eup %9287  ;;  %v5176_v59 = vrot.slane %v5175_v56, 1  ;;  %9307 = vpow2.f32 %v5291_v14  ;;  %v5202_v39 = vmax.f32 %v5200_v15, %v5201_v24 }
 0xbe6   :  { %v11497_v32 = vpop.eup %9289  ;;  %v5303_v12 = vadd.f32 %v11490_v55, %v5302_v11  ;;  %v5319_v34 = vadd.f32 %v11495_v17, %v11492_v38  ;;  %v5194_v62 = vrot.slane %v5193_v22, 1  ;;  %v5185_v9 = vrot.slane %v5184_v49, 1 }
 0xbe7   :  { %v11502_v37 = vpop.eup %9291  ;;  %v5177_v44 = vmax.f32 %v5175_v56, %v5176_v59 }
 0xbe8   :  { %v11504_v36 = vpop.eup %9293  ;;  %v5304_v47 = vrot.slane %v5303_v12, 4  ;;  %v5320_v0 = vadd.f32 %v11497_v32, %v5319_v34  ;;  %v5195_v1 = vmax.f32 %v5193_v22, %v5194_v62 }
 0xbe9   :  { %v11507_v30 = vpop.eup %9295  ;;  %v5209_v21 = vsub.f32 %v11397_v43, %v5177_v44  ;;  %v5217_v10 = vsub.f32 %v11409_v28, %v5177_v44  ;;  %v5225_v56 = vsub.f32 %v11429_v8, %v5177_v44  ;;  %v5233_v22 = vsub.f32 %v11465_v7, %v5177_v44 }
 0xbea   :  { %v11509_v48 = vpop.eup %9297  ;;  %v5305_v31 = vadd.f32 %v5304_v47, %v5303_v12  ;;  %v5321_v54 = vadd.f32 %v11502_v37, %v5320_v0  ;;  %v5310_v14 = vadd.f32 %v11507_v30, %v11504_v36  ;;  %v5211_v15 = vsub.f32 %v11400_v58, %v5195_v1 }
 0xbeb   :  { %11755 = vst [vmem:[#allocation32_spill] sm:$0xff] %v11509_v48  ;;  %v11515_v11 = vpop.eup %9299  ;;  %v5245_v62 = vmul.f32 1.442695, %v5209_v21  ;;  %v5261_v0 = vmul.f32 1.442695, %v5217_v10  ;;  %v5219_v18 = vsub.f32 %v11412_v26, %v5195_v1  ;;  %v5203_v28 = vrot.slane %v5202_v39, 1 }
 0xbec   :  { %v11521_v24 = vpop.eup %9301  ;;  %v5306_v12 = vrot.slane %v5305_v31, 2  ;;  %v5322_v34 = vrot.slane %v5321_v54, 4  ;;  %v5311_v59 = vadd.f32 %v11509_v48, %v5310_v14  ;;  %v5277_v43 = vmul.f32 1.442695, %v5225_v56 }
 0xbed   :  { %v11524_v47 = vpop.eup %9303  ;;  %9309 = vpow2.f32 %v5245_v62  ;;  %v5293_v27 = vmul.f32 1.442695, %v5233_v22  ;;  %v5227_v14 = vsub.f32 %v11432_v16, %v5195_v1  ;;  %v5235_v21 = vsub.f32 %v11468_v25, %v5195_v1 }
 0xbee   :  { %11756 = vst [vmem:[#allocation33_spill] sm:$0xff] %v11524_v47  ;;  %v5307_v29 = vadd.f32 %v5306_v12, %v5305_v31  ;;  %v5323_v8 = vadd.f32 %v5322_v34, %v5321_v54  ;;  %v5312_v44 = vadd.f32 %v11515_v11, %v5311_v59  ;;  %v5328_v58 = vadd.f32 %v11524_v47, %v11521_v24  ;;  %v11530_v7 = vpop.eup %9305 }
 0xbef   :  { %v11535_v31 = vpop.eup %9307  ;;  %9311 = vpow2.f32 %v5261_v0  ;;  %v5249_v54 = vmul.f32 1.442695, %v5211_v15  ;;  %v5265_v12 = vmul.f32 1.442695, %v5219_v18  ;;  %v5281_v34 = vmul.f32 1.442695, %v5227_v14 }
 0xbf0   :  { %v5308_v10 = vrot.slane %v5307_v29, 1  ;;  %v5324_v56 = vrot.slane %v5323_v8, 2  ;;  %v5313_v48 = vrot.slane %v5312_v44, 4  ;;  %v5329_v26 = vadd.f32 %v11530_v7, %v5328_v58 }
 0xbf1   :  { %9313 = vpow2.f32 %v5277_v43  ;;  %v5297_v62 = vmul.f32 1.442695, %v5235_v21  ;;  %v5186_v16 = vmax.f32 %v5184_v49, %v5185_v9  ;;  %v5204_v1 = vmax.f32 %v5202_v39, %v5203_v28 }
 0xbf2   :  { %v5309_v59 = vadd.f32 %v5308_v10, %v5307_v29  ;;  %v5325_v63 = vadd.f32 %v5324_v56, %v5323_v8  ;;  %v5314_v57 = vadd.f32 %v5313_v48, %v5312_v44  ;;  %v5330_v22 = vadd.f32 %v11535_v31, %v5329_v26 }
 0xbf3   :  { %v5210_v58 = vsub.f32 %v11403_v51, %v5186_v16  ;;  %v5218_v15 = vsub.f32 %v11415_v2, %v5186_v16  ;;  %v5226_v18 = vsub.f32 %v11435_v4, %v5186_v16  ;;  %v5234_v43 = vsub.f32 %v11472_v42, %v5186_v16 }
 0xbf4   :  { %9315 = vrcp.f32 %v5309_v59  ;;  %v5326_v25 = vrot.slane %v5325_v63, 1  ;;  %v5315_v47 = vrot.slane %v5314_v57, 2  ;;  %v5331_v45 = vrot.slane %v5330_v22, 4 }
 0xbf5   :  { %9317 = vpow2.f32 %v5293_v27  ;;  %v5247_v26 = vmul.f32 1.442695, %v5210_v58  ;;  %v5263_v9 = vmul.f32 1.442695, %v5218_v15  ;;  %v5279_v27 = vmul.f32 1.442695, %v5226_v18 }
 0xbf6   :  { %v5327_v29 = vadd.f32 %v5326_v25, %v5325_v63  ;;  %v5316_v8 = vadd.f32 %v5315_v47, %v5314_v57  ;;  %v5332_v48 = vadd.f32 %v5331_v45, %v5330_v22  ;;  %9319 = vpow2.f32 %v5249_v54 }
 0xbf7   :  { %9321 = vpow2.f32 %v5265_v12  ;;  %v11542_v39 = vpop.eup %9309  ;;  %v5212_v0 = vsub.f32 %v11406_v61, %v5204_v1  ;;  %v5220_v44 = vsub.f32 %v11418_v35, %v5204_v1  ;;  %v5228_v45 = vsub.f32 %v11438_v40, %v5204_v1 }
 0xbf8   :  { %9323 = vrcp.f32 %v5327_v29  ;;  %v5317_v28 = vrot.slane %v5316_v8, 1  ;;  %v5333_v49 = vrot.slane %v5332_v48, 2  ;;  %v5295_v16 = vmul.f32 1.442695, %v5234_v43 }
 0xbf9   :  { %9325 = vpow2.f32 %v5281_v34  ;;  %v11547_v25 = vpop.eup %9311  ;;  %v5236_v21 = vsub.f32 %v11475_v3, %v5204_v1  ;;  %v5251_v56 = vmul.f32 1.442695, %v5212_v0  ;;  %v5267_v54 = vmul.f32 1.442695, %v5220_v44 }
 0xbfa   :  { %v5318_v63 = vadd.f32 %v5317_v28, %v5316_v8  ;;  %v5334_v57 = vadd.f32 %v5333_v49, %v5332_v48  ;;  %9327 = vpow2.f32 %v5297_v62  ;;  %v5337_v14 = vadd.f32 %v11547_v25, %v11542_v39 }
 0xbfb   :  { %9329 = vpow2.f32 %v5247_v26  ;;  %v11552_v10 = vpop.eup %9313  ;;  %v5283_v22 = vmul.f32 1.442695, %v5228_v45  ;;  %v5299_v8 = vmul.f32 1.442695, %v5236_v21 }
 0xbfc   :  { %9331 = vrcp.f32 %v5318_v63  ;;  %v5335_v47 = vrot.slane %v5334_v57, 1  ;;  %v5338_v59 = vadd.f32 %v11552_v10, %v5337_v14 }
 0xbfd   :  { %9333 = vpow2.f32 %v5263_v9 }
 0xbfe   :  { %v9316_v12 = vpop.eup %9315  ;;  %v5336_v34 = vadd.f32 %v5335_v47, %v5334_v57  ;;  %9335 = vpow2.f32 %v5279_v27 }
 0xbff   :  { %v11555_v62 = vpop.eup %9317  ;;  %v5405_v58 = vmul.f32 %v9316_v12, %v11490_v55  ;;  %9337 = vpow2.f32 %v5295_v16  ;;  %v5374_v15 = vmul.f32 %v9316_v12, %v11482_v19  ;;  %v5389_v1 = vmul.f32 %v9316_v12, %v11484_v6 }
 0xc00   :  { %v11560_v18 = vpop.eup %9319  ;;  %9339 = vrcp.f32 %v5336_v34  ;;  %v5339_v29 = vadd.f32 %v11555_v62, %v5338_v59  ;;  %v5397_v48 = vmul.f32 %v9316_v12, %v11486_v46 }
 0xc01   :  { %v11564_v43 = vpop.eup %9321  ;;  %v11567_v26 = vmul.f32 %v5405_v58, %v11382_v33  ;;  %9341 = vpow2.f32 %v5251_v56  ;;  %v5413_v55 = vmul.f32 %v5374_v15, %v11345_v50  ;;  %v5421_v19 = vmul.f32 %v5389_v1, %v11356_v41 }
 0xc02   :  { %v9324_v28 = vpop.eup %9323  ;;  %v5340_v6 = vrot.slane %v5339_v29, 4  ;;  %v5355_v49 = vadd.f32 %v11564_v43, %v11560_v18  ;;  %9343 = vpow2.f32 %v5267_v54  ;;  %v11574_v9 = vmul.f32 %v5397_v48, %v11372_v23 }
 0xc03   :  { %v11576_v46 = vpop.eup %9325  ;;  %v5469_v27 = vmax.f32 %v11567_v26, 0.0  ;;  %v5407_v33 = vmul.f32 %v9324_v28, %v11502_v37  ;;  %9345 = vpow2.f32 %v5283_v22  ;;  %v5445_v0 = vmax.f32 %v5413_v55, 0.0 }
 0xc04   :  { %v11580_v50 = vpop.eup %9327  ;;  %v5341_v41 = vadd.f32 %v5340_v6, %v5339_v29  ;;  %v5356_v44 = vadd.f32 %v11576_v46, %v5355_v49  ;;  %9347 = vpow2.f32 %v5299_v8  ;;  %v5453_v63 = vmax.f32 %v5421_v19, 0.0 }
 0xc05   :  { %v11583_v57 = vpop.eup %9329  ;;  %v11586_v23 = vmul.f32 %v5407_v33, %v11384_v60  ;;  %v5378_v45 = vmul.f32 %v9324_v28, %v11492_v38  ;;  %v5391_v16 = vmul.f32 %v9324_v28, %v11495_v17  ;;  %v5461_v37 = vmax.f32 %v11574_v9, 0.0 }
 0xc06   :  { %v9332_v47 = vpop.eup %9331  ;;  %v5342_v14 = vrot.slane %v5341_v41, 2  ;;  %v5357_v21 = vadd.f32 %v11580_v50, %v5356_v44  ;;  %v5477_v56 = vpack.c.bf16 %v5453_v63, %v5445_v0  ;;  %v11593_v54 = vmul.f32 %v9324_v28, %v11497_v32  ;;  %v11757_v63 = vld [vmem:[#allocation23_spill] sm:$0xff] }
 0xc07   :  { %v11595_v12 = vpop.eup %9333  ;;  %v5471_v34 = vmax.f32 %v11586_v23, 0.0  ;;  %v5406_v60 = vmul.f32 %v9332_v47, %v11515_v11  ;;  %v5376_v38 = vmul.f32 %v9332_v47, %v11504_v36  ;;  %v5390_v17 = vmul.f32 %v9332_v47, %v11507_v30 }
 0xc08   :  { %v11601_v59 = vpop.eup %9335  ;;  %v5343_v22 = vadd.f32 %v5342_v14, %v5341_v41  ;;  %v5358_v58 = vrot.slane %v5357_v21, 4  ;;  %v5346_v15 = vadd.f32 %v11595_v12, %v11583_v57  ;;  %v5415_v32 = vmul.f32 %v5378_v45, %v11348_v53 }
 0xc09   :  { %v11606_v1 = vpop.eup %9337  ;;  %v11609_v29 = vmul.f32 %v5406_v60, %v11388_v20  ;;  %v5414_v11 = vmul.f32 %v5376_v38, %v11351_v13  ;;  %v5422_v36 = vmul.f32 %v5390_v17, %v11360_v52  ;;  %v5423_v30 = vmul.f32 %v5391_v16, %v11358_v5  ;;  %v8735_v60 = vld [vmem:[#allocation10 + $0x100] sm:$0xff]  }
 0xc0a   :  { %v9340_v8 = vpop.eup %9339  ;;  %v5344_v48 = vrot.slane %v5343_v22, 1  ;;  %v5359_v55 = vadd.f32 %v5358_v58, %v5357_v21  ;;  %v5347_v19 = vadd.f32 %v11601_v59, %v5346_v15  ;;  %v5447_v28 = vmax.f32 %v5415_v32, 0.0  ;;  %v11758_v21 = vld [vmem:[#allocation33_spill] sm:$0xff]  ;;  %v11759_v58 = vld [vmem:[#allocation18_spill] sm:$0xff] }
 0xc0b   :  { %v11615_v6 = vpop.eup %9341  ;;  %v5470_v53 = vmax.f32 %v11609_v29, 0.0  ;;  %v5408_v49 = vmul.f32 %v9340_v8, %v11535_v31  ;;  %v5446_v20 = vmax.f32 %v5414_v11, 0.0  ;;  %v5454_v33 = vmax.f32 %v5422_v36, 0.0  ;;  %v8737_v32 = vld [vmem:[#allocation10 + $0x148] sm:$0xff]  }
 0xc0c   :  { %v11619_v0 = vpop.eup %9343  ;;  %v5345_v13 = vadd.f32 %v5344_v48, %v5343_v22  ;;  %v5360_v52 = vrot.slane %v5359_v55, 2  ;;  %v5348_v5 = vadd.f32 %v11606_v1, %v5347_v19  ;;  %v5380_v41 = vmul.f32 %v9340_v8, %v11521_v24  ;;  %v11760_v11 = vld [vmem:[#allocation19_spill] sm:$0xff] }
 0xc0d   :  { %v11623_v44 = vpop.eup %9345  ;;  %v5440_v45 = vmul.f32 %v5408_v49, %v11757_v63  ;;  %v5364_v16 = vadd.f32 %v11619_v0, %v11615_v6  ;;  %v5478_v14 = vpack.c.bf16 %v5454_v33, %v5446_v20  ;;  %v5392_v31 = vmul.f32 %v9340_v8, %v11758_v21  ;;  %v11761_v33 = vld [vmem:[#allocation32_spill] sm:$0xff] }
 0xc0e   :  { %v11629_v38 = vpop.eup %9347  ;;  %9349 = vrcp.f32 %v5345_v13  ;;  %v5361_v17 = vadd.f32 %v5360_v52, %v5359_v55  ;;  %v5349_v22 = vrot.slane %v5348_v5, 4  ;;  %v5416_v15 = vmul.f32 %v5380_v41, %v11759_v58 }
 0xc0f   :  { %v5472_v24 = vmax.f32 %v5440_v45, 0.0  ;;  %v5365_v29 = vadd.f32 %v11623_v44, %v5364_v16  ;;  %6044 = vmatprep.mubr.bf16.mxu1 %v5478_v14  ;;  %v5424_v36 = vmul.f32 %v5392_v31, %v11760_v11  ;;  %v5455_v48 = vmax.f32 %v5423_v30, 0.0  ;;  %v8739_v45 = vld [vmem:[#allocation10 + $0x108] sm:$0xff]   ;;  %v11762_v14 = vld [vmem:[#allocation21_spill] sm:$0xff]  ;;  %v8741_v30 = vld [vmem:[#allocation10 + $0x150] sm:$0xff]  }
 0xc10   :  { %v5362_v19 = vrot.slane %v5361_v17, 1  ;;  %v5350_v49 = vadd.f32 %v5349_v22, %v5348_v5  ;;  %v5448_v20 = vmax.f32 %v5416_v15, 0.0  ;;  %6045 = vmatmul.mubr.bf16.vlgmr.msra.gmra.mrb[160].mxu1 %v5477_v56  ;;  %v5398_v63 = vmul.f32 %v9332_v47, %v11761_v33  ;;  %v8736_v31 = vld [vmem:[#allocation10 + $0x180] sm:$0xff]   ;;  %v8738_v15 = vld [vmem:[#allocation10 + $0x1c8] sm:$0xff]   ;;  %v8742_v33 = vld [vmem:[#allocation10 + $0x1d0] sm:$0xff]  }
 0xc11   :  { %v5366_v13 = vadd.f32 %v11629_v38, %v5365_v29  ;;  %v5456_v55 = vmax.f32 %v5424_v36, 0.0  ;;  %v5479_v52 = vpack.c.bf16 %v5455_v48, %v5447_v28  ;;  %7422 = vmatpush3.bf16.msra.mxu1 %v8735_v60  ;;  %v5400_v41 = vmul.f32 %v9340_v8, %v11530_v7  ;;  %v11763_v22 = vld [vmem:[#allocation22_spill] sm:$0xff]  ;;  %v11764_v60 = vld [vmem:[#allocation20_spill] sm:$0xff] }
 0xc12   :  { %v5363_v21 = vadd.f32 %v5362_v19, %v5361_v17  ;;  %v5351_v16 = vrot.slane %v5350_v49, 2  ;;  %v5430_v58 = vmul.f32 %v5398_v63, %v11762_v14  ;;  %7423 = vmatprep.subr.bf16.mxu1 %v8737_v32  ;;  %v5485_v56 = vpack.c.bf16 %v5469_v27, %v5461_v37  ;;  %v8743_v27 = vld [vmem:[#allocation10 + $0x110] sm:$0xff]   ;;  %v8740_v48 = vld [vmem:[#allocation10 + $0x188] sm:$0xff]   ;;  %v8745_v19 = vld [vmem:[#allocation10 + $0x158] sm:$0xff]  }
 0xc13   :  { %v5367_v47 = vrot.slane %v5366_v13, 4  ;;  %v5480_v5 = vpack.c.bf16 %v5456_v55, %v5448_v20  ;;  %v5432_v28 = vmul.f32 %v5400_v41, %v11763_v22  ;;  %v5431_v7 = vmul.f32 %v11593_v54, %v11764_v60  ;;  %v8746_v14 = vld [vmem:[#allocation10 + $0x1d8] sm:$0xff]  }
 0xc14   :  { %9351 = vrcp.f32 %v5363_v21  ;;  %v5352_v8 = vadd.f32 %v5351_v16, %v5350_v49  ;;  %v5462_v17 = vmax.f32 %v5430_v58, 0.0  ;;  %v8749_v21 = vld [vmem:[#allocation10 + $0x160] sm:$0xff]  }
 0xc15   :  { %v5368_v29 = vadd.f32 %v5367_v47, %v5366_v13  ;;  %6093 = vmatprep.mubr.bf16.mxu0 %v5480_v5  ;;  %v5464_v32 = vmax.f32 %v5432_v28, 0.0  ;;  %7424 = vmatpush3.bf16.msra.mxu1 %v8739_v45  ;;  %v5463_v9 = vmax.f32 %v5431_v7, 0.0  ;;  %v8744_v45 = vld [vmem:[#allocation10 + $0x190] sm:$0xff]   ;;  %v11767_v58 = vld [vmem:[#allocation26_spill] sm:$0xff]  ;;  %v8748_v7 = vld [vmem:[#allocation10 + $0x198] sm:$0xff]  }
 0xc16   :  { %v5353_v11 = vrot.slane %v5352_v8, 1  ;;  %6094 = vmatmul.mubr.bf16.vlgmr.msra.gmra.mrb[168].mxu0 %v5479_v52  ;;  %v5486_v26 = vpack.c.bf16 %v5470_v53, %v5462_v17  ;;  %7425 = vmatprep.subr.bf16.mxu1 %v8741_v30  ;;  %v11768_v30 = vld [vmem:[#allocation28_spill] sm:$0xff] }
 0xc17   :  { %v5369_v37 = vrot.slane %v5368_v29, 2  ;;  %7450 = vmatpush3.bf16.msra.mxu0 %v8736_v31  ;;  %v5488_v36 = vpack.c.bf16 %v5472_v24, %v5464_v32  ;;  %v5487_v54 = vpack.c.bf16 %v5471_v34, %v5463_v9  ;;  %v8747_v24 = vld [vmem:[#allocation10 + $0x118] sm:$0xff]   ;;  %v11765_v34 = vld [vmem:[#allocation30_spill] sm:$0xff] }
 0xc18   :  { %v9350_v49 = vpop.eup %9349  ;;  %v5354_v20 = vadd.f32 %v5353_v11, %v5352_v8  ;;  %6052 = vmatprep.mubr.bf16.mxu1 %v5486_v26  ;;  %7451 = vmatprep.subr.bf16.mxu0 %v8738_v15  ;;  %v8753_v8 = vld [vmem:[#allocation10 + $0x168] sm:$0xff]  }
 0xc19   :  { %v5409_v63 = vmul.f32 %v9350_v49, %v11555_v62  ;;  %v5370_v13 = vadd.f32 %v5369_v37, %v5368_v29  ;;  %6101 = vmatprep.mubr.bf16.mxu0 %v5488_v36  ;;  %6053 = vmatmul.mubr.bf16.gmra.mrb[164].mxu1 %v5485_v56  ;;  %v5382_v53 = vmul.f32 %v9350_v49, %v11542_v39  ;;  %v11766_v62 = vld [vmem:[#allocation24_spill] sm:$0xff]  ;;  %v8750_v29 = vld [vmem:[#allocation10 + $0x1e0] sm:$0xff]   ;;  %v11769_v26 = vld [vmem:[#allocation31_spill] sm:$0xff] }
 0xc1a   :  { %9353 = vrcp.f32 %v5354_v20  ;;  %7426 = vmatpush3.bf16.msra.mxu1 %v8743_v27  ;;  %v5393_v55 = vmul.f32 %v9350_v49, %v11547_v25  ;;  %v5401_v23 = vmul.f32 %v9350_v49, %v11552_v10  ;;  %v8751_v10 = vld [vmem:[#allocation10 + $0x120] sm:$0xff]   ;;  %v11771_v36 = vld [vmem:[#allocation27_spill] sm:$0xff] }
 0xc1b   :  { %v5441_v52 = vmul.f32 %v5409_v63, %v11765_v34  ;;  %v5371_v41 = vrot.slane %v5370_v13, 1  ;;  %7452 = vmatpush3.bf16.msra.mxu0 %v8740_v48  ;;  %7427 = vmatprep.subr.bf16.mxu1 %v8745_v19  ;;  %v5417_v16 = vmul.f32 %v5382_v53, %v11766_v62  ;;  %v11772_v19 = vld [vmem:[#allocation29_spill] sm:$0xff]  ;;  %v8757_v20 = vld [vmem:[#allocation10 + $0x170] sm:$0xff]  }
 0xc1c   :  { %7453 = vmatprep.subr.bf16.mxu0 %v8742_v33  ;;  %v5425_v39 = vmul.f32 %v5393_v55, %v11767_v58  ;;  %v5433_v56 = vmul.f32 %v5401_v23, %v11768_v30 }
 0xc1d   :  { %v5473_v47 = vmax.f32 %v5441_v52, 0.0  ;;  %v5372_v5 = vadd.f32 %v5371_v41, %v5370_v13  ;;  %v5449_v25 = vmax.f32 %v5417_v16, 0.0  ;;  %v8759_v52 = vld [vmem:[#allocation10 + $0x130] sm:$0xff]  }
 0xc1e   :  { %v9352_v31 = vpop.eup %9351  ;;  %6102 = vmatmul.mubr.bf16.gmra.mrb[172].mxu0 %v5487_v54  ;;  %7428 = vmatpush3.bf16.msra.mxu1 %v8747_v24  ;;  %v5457_v22 = vmax.f32 %v5425_v39, 0.0  ;;  %v5465_v28 = vmax.f32 %v5433_v56, 0.0  ;;  %v8755_v54 = vld [vmem:[#allocation10 + $0x128] sm:$0xff]  }
 0xc1f   :  { %v5411_v60 = vmul.f32 %v9352_v31, %v11580_v50  ;;  %9355 = vrcp.f32 %v5372_v5  ;;  %7454 = vmatpush3.bf16.msra.mxu0 %v8744_v45  ;;  %7429 = vmatprep.subr.bf16.mxu1 %v8749_v21  ;;  %v5386_v17 = vmul.f32 %v9352_v31, %v11560_v18  ;;  %v5395_v15 = vmul.f32 %v9352_v31, %v11564_v43  ;;  %v11770_v50 = vld [vmem:[#allocation25_spill] sm:$0xff] }
 0xc20   :  { %7455 = vmatprep.subr.bf16.mxu0 %v8746_v14  ;;  %v11658_v32 = vpack.c.bf16 %v5457_v22, %v5449_v25  ;;  %v11660_v9 = vpack.c.bf16 %v5473_v47, %v5465_v28  ;;  %v5403_v11 = vmul.f32 %v9352_v31, %v11576_v46  ;;  %v8752_v43 = vld [vmem:[#allocation10 + $0x1a0] sm:$0xff]   ;;  %v8754_v46 = vld [vmem:[#allocation10 + $0x1e8] sm:$0xff]   ;;  %v8760_v25 = vld [vmem:[#allocation10 + $0x1b0] sm:$0xff]  }
 0xc21   :  { %v5443_v27 = vmul.f32 %v5411_v60, %v11769_v26  ;;  %v5419_v37 = vmul.f32 %v5386_v17, %v11770_v50  ;;  %v5427_v48 = vmul.f32 %v5395_v15, %v11771_v36  ;;  %v8756_v14 = vld [vmem:[#allocation10 + $0x1a8] sm:$0xff]   ;;  %v6216_v26 = vld [vmem:[#allocation11 + $0x20] sm:$0xff]  ;;  %v6218_v50 = vld [vmem:[#allocation11 + $0x30] sm:$0xff] }
 0xc22   :  { %7430 = vmatpush3.bf16.msra.mxu1 %v8751_v10  ;;  %v5435_v18 = vmul.f32 %v5403_v11, %v11772_v19  ;;  %v6222_v19 = vld [vmem:[#allocation11 + $0x50] sm:$0xff] }
 0xc23   :  { %v5475_v49 = vmax.f32 %v5443_v27, 0.0  ;;  %7456 = vmatpush3.bf16.msra.mxu0 %v8748_v7  ;;  %7431 = vmatprep.subr.bf16.mxu1 %v8753_v8  ;;  %v5451_v33 = vmax.f32 %v5419_v37, 0.0  ;;  %v5459_v63 = vmax.f32 %v5427_v48, 0.0  ;;  %v8764_v8 = vld [vmem:[#allocation10 + $0x1b8] sm:$0xff]   ;;  %v6217_v27 = vld [vmem:[#allocation11 + $0x28] sm:$0xff]  ;;  %v6220_v48 = vld [vmem:[#allocation11 + $0x40] sm:$0xff] }
 0xc24   :  { %v9354_v13 = vpop.eup %9353  ;;  %7457 = vmatprep.subr.bf16.mxu0 %v8750_v29  ;;  %v5467_v53 = vmax.f32 %v5435_v18, 0.0  ;;  %v6215_v29 = vld [vmem:[#allocation11 + $0x18] sm:$0xff] }
 0xc25   :  { %v5410_v24 = vmul.f32 %v9354_v13, %v11606_v1  ;;  %v5384_v55 = vmul.f32 %v9354_v13, %v11583_v57  ;;  %v5394_v23 = vmul.f32 %v9354_v13, %v11595_v12  ;;  %v5483_v34 = vpack.c.bf16 %v5459_v63, %v5451_v33  ;;  %v8761_v1 = vld [vmem:[#allocation10 + $0x178] sm:$0xff]   ;;  %v8758_v57 = vld [vmem:[#allocation10 + $0x1f0] sm:$0xff]  }
 0xc26   :  { %7432 = vmatpush3.bf16.msra.mxu1 %v8755_v54  ;;  %v5402_v41 = vmul.f32 %v9354_v13, %v11601_v59  ;;  %v5491_v45 = vpack.c.bf16 %v5475_v49, %v5467_v53  ;;  %v6219_v37 = vld [vmem:[#allocation11 + $0x38] sm:$0xff]  ;;  %v6226_v33 = vld [vmem:[#allocation11 + $0x70] sm:$0xff] }
 0xc27   :  { %v5442_v21 = vmul.f32 %v5410_v24, %v11472_v42  ;;  %v5418_v62 = vmul.f32 %v5384_v55, %v11403_v51  ;;  %v5426_v16 = vmul.f32 %v5394_v23, %v11415_v2  ;;  %7458 = vmatpush3.bf16.msra.mxu0 %v8752_v43  ;;  %7433 = vmatprep.subr.bf16.mxu1 %v8757_v20  ;;  %v8763_v2 = vld [vmem:[#allocation10 + $0x138] sm:$0xff]   ;;  %v6224_v43 = vld [vmem:[#allocation11 + $0x60] sm:$0xff]  ;;  %v6225_v20 = vld [vmem:[#allocation11 + $0x68] sm:$0xff] }
 0xc28   :  { %7459 = vmatprep.subr.bf16.mxu0 %v8754_v46  ;;  %v5434_v12 = vmul.f32 %v5402_v41, %v11435_v4  ;;  %v8667_v36 = vpack.c.bf16 %v6219_v37, %v6218_v50  ;;  %v6223_v18 = vld [vmem:[#allocation11 + $0x58] sm:$0xff]  ;;  %v8679_v63 = vpack.c.bf16 %v6225_v20, %v6224_v43 }
 0xc29   :  { %v9356_v58 = vpop.eup %9355  ;;  %v5474_v39 = vmax.f32 %v5442_v21, 0.0  ;;  %v5450_v30 = vmax.f32 %v5418_v62, 0.0  ;;  %v5458_v56 = vmax.f32 %v5426_v16, 0.0  ;;  %v8675_v49 = vpack.c.bf16 %v6223_v18, %v6222_v19  ;;  %v6227_v13 = vld [vmem:[#allocation11 + $0x78] sm:$0xff] }
 0xc2a   :  { %v5412_v59 = vmul.f32 %v9356_v58, %v11629_v38  ;;  %v5388_v42 = vmul.f32 %v9356_v58, %v11615_v6  ;;  %v5396_v51 = vmul.f32 %v9356_v58, %v11619_v0  ;;  %7434 = vmatpush3.bf16.msra.mxu1 %v8759_v52  ;;  %v5466_v47 = vmax.f32 %v5434_v12, 0.0  ;;  %v8762_v38 = vld [vmem:[#allocation10 + $0x1f8] sm:$0xff]  }
 0xc2b   :  { %v5482_v5 = vpack.c.bf16 %v5458_v56, %v5450_v30  ;;  %7460 = vmatpush3.bf16.msra.mxu0 %v8756_v14  ;;  %7435 = vmatprep.subr.bf16.mxu1 %v8761_v1  ;;  %v5404_v31 = vmul.f32 %v9356_v58, %v11623_v44  ;;  %v8683_v46 = vpack.c.bf16 %v6227_v13, %v6226_v33 }
 0xc2c   :  { %v5444_v4 = vmul.f32 %v5412_v59, %v11475_v3  ;;  %v5420_v10 = vmul.f32 %v5388_v42, %v11406_v61  ;;  %v5428_v22 = vmul.f32 %v5396_v51, %v11418_v35  ;;  %7461 = vmatprep.subr.bf16.mxu0 %v8758_v57  ;;  %v5490_v6 = vpack.c.bf16 %v5474_v39, %v5466_v47  ;;  %v6212_v35 = vld [vmem:[#allocation11] sm:$0xff]  ;;  %v6214_v3 = vld [vmem:[#allocation11 + $0x10] sm:$0xff] }
 0xc2d   :  { %6142 = vmatprep.mubr.bf16.mxu1 %v5482_v5  ;;  %v5436_v0 = vmul.f32 %v5404_v31, %v11438_v40  ;;  %v6213_v40 = vld [vmem:[#allocation11 + $0x8] sm:$0xff]  ;;  %v8659_v11 = vpack.c.bf16 %v6215_v29, %v6214_v3 }
 0xc2e   :  { %v5476_v28 = vmax.f32 %v5444_v4, 0.0  ;;  %v5452_v60 = vmax.f32 %v5420_v10, 0.0  ;;  %v5460_v7 = vmax.f32 %v5428_v22, 0.0  ;;  %7436 = vmatpush3.bf16.msra.mxu1 %v8763_v2  ;;  %v8655_v15 = vpack.c.bf16 %v6213_v40, %v6212_v35 }
 0xc2f   :  { %7462 = vmatpush3.bf16.msra.mxu0 %v8760_v25  ;;  %v5468_v17 = vmax.f32 %v5436_v0, 0.0 }
 0xc30   :  { %v5484_v44 = vpack.c.bf16 %v5460_v7, %v5452_v60  ;;  %7463 = vmatprep.subr.bf16.mxu0 %v8762_v38  ;;  %8656 = vmatprep.subr.bf16.mxu1 %v8655_v15 }
 0xc31   :  { %6143 = vmatmul.mubr.bf16.vlgmr.msra.gmra.mrb[168].mxu1 %v11658_v32  ;;  %v5492_v61 = vpack.c.bf16 %v5476_v28, %v5468_v17  ;;  %v8663_v32 = vpack.c.bf16 %v6217_v27, %v6216_v26 }
 0xc32   :  { %6191 = vmatprep.mubr.bf16.mxu0 %v5484_v44  ;;  %6150 = vmatprep.mubr.bf16.mxu1 %v5490_v6 }
 0xc33   :  { %7464 = vmatpush3.bf16.msra.mxu0 %v8764_v8  ;;  %8658 = vmatpush3.bf16.msra.mxu1 %v8655_v15 }
 0xc34   :  { %8660 = vmatprep.subr.bf16.mxu1 %v8659_v11 }
 0xc36   :  { %6192 = vmatmul.mubr.bf16.vlgmr.msra.gmra.mrb[176].mxu0 %v5483_v34  ;;  %v6871_v34 = vld [vmem:[%s11709_s9] ss:$0 sm:$0xff] }
 0xc37   :  { %6199 = vmatprep.mubr.bf16.mxu0 %v5492_v61  ;;  %8662 = vmatpush3.bf16.msra.mxu1 %v8659_v11 }
 0xc38   :  { %8664 = vmatprep.subr.bf16.mxu1 %v8663_v32 }
 0xc39   :  { %6151 = vmatmul.mubr.bf16.gmra.mrb[172].mxu1 %v11660_v9  ;;  %v6221_v9 = vld [vmem:[#allocation11 + $0x48] sm:$0xff] }
 0xc3a   :  { %v8671_v54 = vpack.c.bf16 %v6221_v9, %v6220_v48 }
 0xc3b   :  { %8666 = vmatpush3.bf16.msra.mxu1 %v8663_v32 }
 0xc3c   :  { %8668 = vmatprep.subr.bf16.mxu1 %v8667_v36 }
 0xc3e   :  { %6200 = vmatmul.mubr.bf16.gmra.mrb[180].mxu0 %v5491_v45 }
 0xc3f   :  { %8670 = vmatpush3.bf16.msra.mxu1 %v8667_v36 }
 0xc40   :  { %8672 = vmatprep.subr.bf16.mxu1 %v8671_v54 }
 0xc43   :  { %8674 = vmatpush3.bf16.msra.mxu1 %v8671_v54 }
 0xc44   :  { %8676 = vmatprep.subr.bf16.mxu1 %v8675_v49 }
 0xc47   :  { %8678 = vmatpush3.bf16.msra.mxu1 %v8675_v49 }
 0xc48   :  { %8680 = vmatprep.subr.bf16.mxu1 %v8679_v63 }
 0xc4b   :  { %8682 = vmatpush3.bf16.msra.mxu1 %v8679_v63 }
 0xc4c   :  { %8684 = vmatprep.subr.bf16.mxu1 %v8683_v46 }
 0xc4f   :  { %8686 = vmatpush3.bf16.msra.mxu1 %v8683_v46 }
 0xce3   :  { %v7381_v53 = vpop.f32.mrb[160].mxu1 }
 0xce4   :  { %v7382_v24 = vpop.f32.mrb[161].mxu1 }
 0xce5   :  { %v7383_v55 = vadd.f32 %v7382_v24, %v7381_v53  ;;  %v7384_v23 = vpop.f32.mrb[162].mxu1 }
 0xce6   :  { %v7385_v52 = vpop.f32.mrb[163].mxu1 }
 0xce7   :  { %v7386_v41 = vadd.f32 %v7385_v52, %v7384_v23  ;;  %v6047_v21 = vadd.f32 %v7383_v55, %v6871_v34  ;;  %v6936_v52 = vld [vmem:[#allocation13] ss:$0 sm:$0xff] }
 0xce9   :  { %v7409_v45 = vpop.f32.mrb[168].mxu0  ;;  %v6050_v1 = vadd.f32 %v7386_v41, %v6871_v34 }
 0xcea   :  { %v7410_v62 = vpop.f32.mrb[169].mxu0 }
 0xceb   :  { %v7411_v16 = vadd.f32 %v7410_v62, %v7409_v45  ;;  %v7412_v14 = vpop.f32.mrb[170].mxu0 }
 0xcec   :  { %v7413_v57 = vpop.f32.mrb[171].mxu0  ;;  %v7387_v12 = vpop.f32.mrb[164].mxu1 }
 0xced   :  { %v6096_v58 = vadd.f32 %v7411_v16, %v6047_v21  ;;  %v7414_v39 = vadd.f32 %v7413_v57, %v7412_v14  ;;  %v7388_v30 = vpop.f32.mrb[165].mxu1 }
 0xcee   :  { %v7389_v56 = vadd.f32 %v7388_v30, %v7387_v12  ;;  %v7390_v59 = vpop.f32.mrb[166].mxu1 }
 0xcef   :  { %v6099_v42 = vadd.f32 %v7414_v39, %v6050_v1  ;;  %v7391_v51 = vpop.f32.mrb[167].mxu1 }
 0xcf0   :  { %v7392_v2 = vadd.f32 %v7391_v51, %v7390_v59  ;;  %v6055_v5 = vadd.f32 %v7389_v56, %v6871_v34 }
 0xcf1   :  { %v7415_v47 = vpop.f32.mrb[172].mxu0 }
 0xcf2   :  { %v7416_v25 = vpop.f32.mrb[173].mxu0  ;;  %v6058_v10 = vadd.f32 %v7392_v2, %v6871_v34 }
 0xcf3   :  { %v7417_v31 = vadd.f32 %v7416_v25, %v7415_v47  ;;  %v7418_v4 = vpop.f32.mrb[174].mxu0 }
 0xcf4   :  { %v7419_v22 = vpop.f32.mrb[175].mxu0 }
 0xcf5   :  { %v6104_v38 = vadd.f32 %v7417_v31, %v6055_v5  ;;  %v7420_v6 = vadd.f32 %v7419_v22, %v7418_v4 }
 0xcf7   :  { %v6107_v0 = vadd.f32 %v7420_v6, %v6058_v10 }
 0xd04   :  { %v7437_v28 = vpop.f32.mrb[168].mxu1 }
 0xd05   :  { %v7438_v60 = vpop.f32.mrb[169].mxu1 }
 0xd06   :  { %v7439_v7 = vadd.f32 %v7438_v60, %v7437_v28  ;;  %v7440_v8 = vpop.f32.mrb[170].mxu1 }
 0xd07   :  { %v7441_v17 = vpop.f32.mrb[171].mxu1 }
 0xd08   :  { %v6145_v44 = vadd.f32 %v7439_v7, %v6096_v58  ;;  %v7442_v61 = vadd.f32 %v7441_v17, %v7440_v8 }
 0xd09   :  { %v7465_v35 = vpop.f32.mrb[176].mxu0 }
 0xd0a   :  { %v7466_v40 = vpop.f32.mrb[177].mxu0  ;;  %v6148_v3 = vadd.f32 %v7442_v61, %v6099_v42 }
 0xd0b   :  { %v7467_v15 = vadd.f32 %v7466_v40, %v7465_v35  ;;  %v7468_v29 = vpop.f32.mrb[178].mxu0 }
 0xd0c   :  { %v7469_v11 = vpop.f32.mrb[179].mxu0  ;;  %v7443_v26 = vpop.f32.mrb[172].mxu1 }
 0xd0d   :  { %v6194_v27 = vadd.f32 %v7467_v15, %v6145_v44  ;;  %v7470_v32 = vadd.f32 %v7469_v11, %v7468_v29  ;;  %v7444_v50 = vpop.f32.mrb[173].mxu1 }
 0xd0e   :  { %v7445_v37 = vadd.f32 %v7444_v50, %v7443_v26  ;;  %v7446_v36 = vpop.f32.mrb[174].mxu1 }
 0xd0f   :  { %v6208_v48 = vmax.f32 %v6194_v27, 0.0  ;;  %v6197_v9 = vadd.f32 %v7470_v32, %v6148_v3  ;;  %v7447_v54 = vpop.f32.mrb[175].mxu1 }
 0xd10   :  { %v6153_v19 = vadd.f32 %v7445_v37, %v6104_v38  ;;  %v7448_v18 = vadd.f32 %v7447_v54, %v7446_v36 }
 0xd11   :  { %v6209_v49 = vmax.f32 %v6197_v9, 0.0  ;;  %v7471_v43 = vpop.f32.mrb[180].mxu0  ;;  %8253 = vmatprep.mubr.f32.mxu1 %v6208_v48 }
 0xd12   :  { %v7472_v20 = vpop.f32.mrb[181].mxu0  ;;  %v6156_v33 = vadd.f32 %v7448_v18, %v6107_v0 }
 0xd13   :  { %v7473_v63 = vadd.f32 %v7472_v20, %v7471_v43  ;;  %v7474_v13 = vpop.f32.mrb[182].mxu0  ;;  %8254 = vmatmul.mubr.f32.vlgmr.msra.gmra.mrb[176].mxu1 %v6209_v49 }
 0xd14   :  { %v7475_v46 = vpop.f32.mrb[183].mxu0 }
 0xd15   :  { %v6202_v53 = vadd.f32 %v7473_v63, %v6153_v19  ;;  %v7476_v24 = vadd.f32 %v7475_v46, %v7474_v13 }
 0xd17   :  { %v6210_v55 = vmax.f32 %v6202_v53, 0.0  ;;  %v6205_v23 = vadd.f32 %v7476_v24, %v6156_v33 }
 0xd19   :  { %v6211_v34 = vmax.f32 %v6205_v23, 0.0  ;;  %8256 = vmatprep.mubr.f32.mxu1 %v6210_v55 }
 0xd1b   :  { %8257 = vmatmul.mubr.f32.gmra.mrb[178].mxu1 %v6211_v34 }
 0xde6   :  { %v8255_v41 = vpop.f32.mrb[176].mxu1 }
 0xde7   :  { %v6307_v45 = vadd.f32 %v8255_v41, %v6936_v52  ;;  %v6301_v21 = vpop.f32.mrb[177].mxu1 }
 0xde8   :  { %v6302_v62 = vadd.f32 %v6936_v52, %v6301_v21 }
 0xde9   :  { %6321 = vst [vmem:[%s11712_s12 + $0x8] sm:$0xff] %v6307_v45 }
 0xdea   :  { %6320 = vst [vmem:[%s11712_s12] sm:$0xff] %v6302_v62 }
 0xdee   :  { %v8258_v16 = vpop.f32.mrb[178].mxu1 }
 0xdef   :  { %v6317_v14 = vadd.f32 %v8258_v16, %v6936_v52  ;;  %v6311_v1 = vpop.f32.mrb[179].mxu1 }
 0xdf0   :  { %v6312_v57 = vadd.f32 %v6936_v52, %v6311_v1 }
 0xdf1   :  { %6323 = vst [vmem:[%s11712_s12 + $0x18] sm:$0xff] %v6317_v14 }
 0xdf2   :  { %6322 = vst [vmem:[%s11712_s12 + $0x10] sm:$0xff] %v6312_v57 }
 0xdf3   :  { %6328 = vsyncpa [#allocation4], 1 }
 0xdf4   :  { %6329 = vsyncpa [#allocation6], 1 }
 0xdf5   :  { %6330 = vsyncpa [#allocation9], 1 }
 0xdf6   :  { %6331 = vsyncpa [#allocation12], 1 }

</bundles_post_ra>
